<compile_context>
chip_gen: v7x
topology: tpu7x:2x2x1
jax: 0.10.0
libtpu: 0.0.40
codegen_flags: <defaults>
</compile_context>

<pallas_src>
import jax
import jax.numpy as jnp
from jax.experimental import pallas as pl
from jax.experimental.pallas import tpu as pltpu


def _round_up(x, m):
    return ((x + m - 1) // m) * m


def _make_fused_doubleconv_kernel(h, w, c_mid):
    """Fused (conv3x3 + BN + ReLU) x2 kernel body for one batch sample."""
    wp = w + 2                       # padded row stride
    l_acc = _round_up(h * wp, 128)   # lane-aligned accumulation / roll window

    def conv3x3(read_base, w_ref, n_out):
        # 3 base loads (one per ky row offset) + XLU rolls for the kx shifts.
        acc = jnp.zeros((n_out, l_acc), jnp.float32)
        for ky in range(3):
            base = read_base(ky)                               # (c, l_acc)
            for kx in range(3):
                if kx == 0:
                    shifted = base
                else:
                    # Want shifted[q] = base[q + kx].  pltpu.roll follows jnp.roll
                    # semantics (out[q] = in[q - shift]), so shift = l_acc - kx.
                    # The wrapped lanes land only on q >= h*wp (garbage region),
                    # which is masked out / never stored.
                    shifted = pltpu.roll(base, shift=l_acc - kx, axis=1)
                acc = acc + jnp.dot(w_ref[3 * ky + kx], shifted,
                                    preferred_element_type=jnp.float32)
        return acc

    def kernel(x_ref, w1_ref, b1_ref, w2_ref, b2_ref, mask_ref, o_ref, xp2_ref):
        # x_ref   : (C_in, L_in)   pre-padded flat input, row stride wp, L_in = 2*wp + l_acc
        # w*_ref  : (9, C_out, C_in) BN-folded taps, k = 3*ky + kx
        # b*_ref  : (C, 1)         BN-folded bias (lane-broadcast)
        # mask_ref: (1, l_acc)     1.0 on valid output lanes (col < w and row < h)
        # o_ref   : (C_out, h, w)  dense NCHW output block
        # xp2_ref : (C_mid, 2*wp + l_acc) VMEM scratch holding conv2's padded input

        # ---- conv1 + BN1 + ReLU (reads the pre-padded flat input) ----
        acc1 = conv3x3(lambda ky: x_ref[:, ky * wp: ky * wp + l_acc], w1_ref, c_mid)
        h1 = jnp.maximum(acc1 + b1_ref[...], 0.0) * mask_ref[...]

        # Hand conv1's activations to conv2 entirely inside VMEM: this single
        # lane-dense store lands them exactly where conv2's zero-padded layout wants
        # them (offset wp+1 == row 1, col 1).  The mask already wrote zeros into every
        # border lane the store covers (left/right cols, bottom rows), so only the
        # tiny top border needs explicit zeroing -- done every step so the kernel is
        # correct under megacore grid sharding and stale-scratch reuse.
        xp2_ref[:, :wp + 1] = jnp.zeros((c_mid, wp + 1), xp2_ref.dtype)
        xp2_ref[:, wp + 1: wp + 1 + l_acc] = h1.astype(xp2_ref.dtype)

        # ---- conv2 + BN2 + ReLU straight from the VMEM scratch (no HBM round-trip) ----
        acc2 = conv3x3(lambda ky: xp2_ref[:, ky * wp: ky * wp + l_acc], w2_ref,
                       o_ref.shape[0])
        h2 = jnp.maximum(acc2 + b2_ref[...], 0.0)

        # Fused column drop: store only the w valid columns of each row, so the
        # wrapper never needs an extra HBM pass to strip the pad columns.
        # TODO(synk): at production H, replace the unrolled loop with a row-tiled grid.
        for y in range(h):
            o_ref[:, y, :] = h2[:, y * wp: y * wp + w].astype(o_ref.dtype)

    return kernel


def _fold_bn(weight, gamma, beta, mean, var, eps=1e-5):
    """Fold inference BatchNorm into conv taps: y = conv(x, W*s) + (beta - mean*s)."""
    scale = gamma / jnp.sqrt(var + eps)
    w_eff = weight * scale[:, None, None, None]
    c_out, c_in = weight.shape[0], weight.shape[1]
    w_taps = jnp.transpose(w_eff, (2, 3, 0, 1)).reshape(9, c_out, c_in)  # k = 3*ky+kx
    b_eff = (beta - mean * scale).reshape(c_out, 1)
    return w_taps, b_eff


def double_conv_pallas(x, p):
    """DoubleConv (inference) on NCHW input x via one fused Pallas kernel."""
    n, c_in, h, w = x.shape
    wp = w + 2
    l_acc = _round_up(h * wp, 128)
    l_in = 2 * wp + l_acc

    # Pre-pad once in the wrapper (fused by XLA into the concat/upsample fusion);
    # flatten spatial onto the lane axis with row stride wp.
    xpad = jnp.pad(x, ((0, 0), (0, 0), (1, 1), (1, 1))).reshape(n, c_in, (h + 2) * wp)
    xpad = jnp.pad(xpad, ((0, 0), (0, 0), (0, l_in - (h + 2) * wp)))

    w1_t, b1 = _fold_bn(p["w1"], p["g1"], p["b1"], p["m1"], p["v1"])
    w2_t, b2 = _fold_bn(p["w2"], p["g2"], p["b2"], p["m2"], p["v2"])
    c_mid = p["w1"].shape[0]
    c_out = p["w2"].shape[0]

    # Valid-lane mask (host-precomputed so the kernel needs no integer mod):
    # 1.0 where flat position q is a real output (col < w and row < h), else 0.0.
    cols = jnp.arange(l_acc, dtype=jnp.int32)
    mask = (((cols % wp) < w) & (cols < h * wp)).astype(x.dtype).reshape(1, l_acc)

    kernel = _make_fused_doubleconv_kernel(h, w, c_mid)

    cost = pl.CostEstimate(
        flops=2 * n * h * w * 9 * (c_in * c_mid + c_mid * c_out),
        transcendentals=0,
        bytes_accessed=4 * (n * c_in * l_in + n * c_out * h * w
                            + 9 * (c_mid * c_in + c_out * c_mid)
                            + c_mid + c_out + l_acc),
    )

    return pl.pallas_call(
        kernel,
        out_shape=jax.ShapeDtypeStruct((n, c_out, h, w), x.dtype),
        grid_spec=pltpu.PrefetchScalarGridSpec(
            num_scalar_prefetch=0,
            grid=(n,),
            in_specs=[
                pl.BlockSpec((None, c_in, l_in), lambda i: (i, 0, 0)),
                pl.BlockSpec((9, c_mid, c_in), lambda i: (0, 0, 0)),
                pl.BlockSpec((c_mid, 1), lambda i: (0, 0)),
                pl.BlockSpec((9, c_out, c_mid), lambda i: (0, 0, 0)),
                pl.BlockSpec((c_out, 1), lambda i: (0, 0)),
                pl.BlockSpec((1, l_acc), lambda i: (0, 0)),
            ],
            out_specs=pl.BlockSpec((None, c_out, h, w), lambda i: (i, 0, 0, 0)),
            scratch_shapes=[pltpu.VMEM((c_mid, 2 * wp + l_acc), x.dtype)],
        ),
        compiler_params=pltpu.CompilerParams(
            dimension_semantics=("parallel",),   # batch axis -> both TCs on v7x
            vmem_limit_bytes=32 * 1024 * 1024,   # explicit, safe on v5e/v6e/v7x
        ),
        cost_estimate=cost,
    )(xpad, w1_t, b1, w2_t, b2, mask)


def _bilinear_upsample_x2_align_corners(x):
    """nn.Upsample(scale_factor=2, mode='bilinear', align_corners=True) on NCHW."""
    # TODO(synk): gather-based interpolation stays in plain JAX; a Pallas version would
    # need in-kernel gathers and is not worth it for this small preprocessing step.
    n, c, h, w = x.shape
    oh, ow = 2 * h, 2 * w
    ys = jnp.linspace(0.0, h - 1.0, oh, dtype=x.dtype)
    xs = jnp.linspace(0.0, w - 1.0, ow, dtype=x.dtype)
    iy0 = jnp.floor(ys).astype(jnp.int32)
    ix0 = jnp.floor(xs).astype(jnp.int32)
    iy1 = jnp.minimum(iy0 + 1, h - 1)
    ix1 = jnp.minimum(ix0 + 1, w - 1)
    wy = (ys - iy0.astype(x.dtype))[None, None, :, None]
    wx = (xs - ix0.astype(x.dtype))[None, None, None, :]
    top = x[:, :, iy0, :] * (1.0 - wy) + x[:, :, iy1, :] * wy        # (n, c, oh, w)
    return top[:, :, :, ix0] * (1.0 - wx) + top[:, :, :, ix1] * wx   # (n, c, oh, ow)


def _upsample_pad_concat(x1, x2):
    x1u = _bilinear_upsample_x2_align_corners(x1)
    dy = x2.shape[2] - x1u.shape[2]
    dx = x2.shape[3] - x1u.shape[3]
    x1u = jnp.pad(x1u, ((0, 0), (0, 0),
                        (dy // 2, dy - dy // 2),
                        (dx // 2, dx - dx // 2)))
    return jnp.concatenate([x2, x1u], axis=1)


def up_forward_pallas(x1, x2, p):
    """Forward pass of Up (inference): upsample -> pad -> concat -> DoubleConv."""
    xcat = _upsample_pad_concat(x1, x2)          # (N, C_in, H, W), NCHW kept throughout
    return double_conv_pallas(xcat, p)


# ------------------------- plain-JAX reference -------------------------

def _conv_bn_relu_ref(x, weight, gamma, beta, mean, var, eps=1e-5):
    y = jax.lax.conv_general_dilated(
        x, weight, window_strides=(1, 1), padding=((1, 1), (1, 1)),
        dimension_numbers=("NCHW", "OIHW", "NCHW"),
        precision=jax.lax.Precision.HIGHEST)
    scale = gamma / jnp.sqrt(var + eps)
    shift = beta - mean * scale
    return jnp.maximum(y * scale[None, :, None, None] + shift[None, :, None, None], 0.0)


def up_forward_ref(x1, x2, p):
    xcat = _upsample_pad_concat(x1, x2)
    h1 = _conv_bn_relu_ref(xcat, p["w1"], p["g1"], p["b1"], p["m1"], p["v1"])
    return _conv_bn_relu_ref(h1, p["w2"], p["g2"], p["b2"], p["m2"], p["v2"])


if __name__ == "__main__":
    key = jax.random.PRNGKey(0)
    ks = jax.random.split(key, 12)

    N = 2
    IN_CH = 16                # channels after concat (x2 + upsampled x1)
    OUT_CH = 16
    MID_CH = IN_CH // 2       # DoubleConv mid_channels = in_channels // 2 (bilinear=True)
    C1 = IN_CH // 2           # x1 channels (decoder path)
    C2 = IN_CH - C1           # x2 channels (skip connection)
    H2 = W2 = 16              # x2 spatial
    H1 = W1 = 8               # x1 spatial (half resolution)

    x1 = jax.random.normal(ks[0], (N, C1, H1, W1), dtype=jnp.float32)
    x2 = jax.random.normal(ks[1], (N, C2, H2, W2), dtype=jnp.float32)

    params = {
        # Conv2d(IN_CH, MID_CH, 3, padding=1, bias=False) + BatchNorm2d(MID_CH)
        "w1": 0.2 * jax.random.normal(ks[2], (MID_CH, IN_CH, 3, 3), jnp.float32),
        "g1": 1.0 + 0.1 * jax.random.normal(ks[3], (MID_CH,), jnp.float32),
        "b1": 0.1 * jax.random.normal(ks[4], (MID_CH,), jnp.float32),
        "m1": 0.1 * jax.random.normal(ks[5], (MID_CH,), jnp.float32),
        "v1": 1.0 + 0.1 * jnp.abs(jax.random.normal(ks[6], (MID_CH,), jnp.float32)),
        # Conv2d(MID_CH, OUT_CH, 3, padding=1, bias=False) + BatchNorm2d(OUT_CH)
        "w2": 0.2 * jax.random.normal(ks[7], (OUT_CH, MID_CH, 3, 3), jnp.float32),
        "g2": 1.0 + 0.1 * jax.random.normal(ks[8], (OUT_CH,), jnp.float32),
        "b2": 0.1 * jax.random.normal(ks[9], (OUT_CH,), jnp.float32),
        "m2": 0.1 * jax.random.normal(ks[10], (OUT_CH,), jnp.float32),
        "v2": 1.0 + 0.1 * jnp.abs(jax.random.normal(ks[11], (OUT_CH,), jnp.float32)),
    }

    fwd = jax.jit(up_forward_pallas)
    out = jax.block_until_ready(fwd(x1, x2, params))

    ref = up_forward_ref(x1, x2, params)
    assert out.shape == (N, OUT_CH, H2, W2), out.shape
    err = float(jnp.max(jnp.abs(out - ref)))
    assert jnp.allclose(out, ref, atol=1e-3, rtol=1e-3), err

    print("KERNEL_OK")
</pallas_src>

<mosaic_0001>
module attributes {stable_mosaic.version = 11 : i64} {
  func.func @kernel(%arg0: i32, %arg1: memref<1x16x420xf32, #tpu.memory_space<vmem>>, %arg2: memref<9x8x16xf32, #tpu.memory_space<vmem>>, %arg3: memref<8x1xf32, #tpu.memory_space<vmem>>, %arg4: memref<9x16x8xf32, #tpu.memory_space<vmem>>, %arg5: memref<16x1xf32, #tpu.memory_space<vmem>>, %arg6: memref<1x384xf32, #tpu.memory_space<vmem>>, %arg7: memref<1x16x16x16xf32, #tpu.memory_space<vmem>>, %arg8: memref<8x420xf32, #tpu.memory_space<vmem>>) attributes {dimension_semantics = [#tpu.dimension_semantics<parallel>], iteration_bounds = array<i64: 2>, scalar_prefetch = 0 : i64, scratch_operands = 1 : i64, tpu.core_type = #tpu.core_type<tc>, window_params = [{transform_indices = @transform_0, window_bounds = array<i64: 1, 16, 420>}, {pipeline_mode = #tpu.pipeline_mode<synchronous>, transform_indices = @transform_1, window_bounds = array<i64: 9, 8, 16>}, {pipeline_mode = #tpu.pipeline_mode<synchronous>, transform_indices = @transform_2, window_bounds = array<i64: 8, 1>}, {pipeline_mode = #tpu.pipeline_mode<synchronous>, transform_indices = @transform_3, window_bounds = array<i64: 9, 16, 8>}, {pipeline_mode = #tpu.pipeline_mode<synchronous>, transform_indices = @transform_4, window_bounds = array<i64: 16, 1>}, {pipeline_mode = #tpu.pipeline_mode<synchronous>, transform_indices = @transform_5, window_bounds = array<i64: 1, 384>}, {transform_indices = @transform_6, window_bounds = array<i64: 1, 16, 16, 16>}]} {
    %cst = arith.constant 0.000000e+00 : f32
    %0 = vector.broadcast %cst : f32 to vector<8x384xf32>
    %c0 = arith.constant 0 : index
    %c0_0 = arith.constant 0 : index
    %c0_1 = arith.constant 0 : index
    %1 = vector.load %arg1[%c0, %c0_0, %c0_1] : memref<1x16x420xf32, #tpu.memory_space<vmem>>, vector<1x16x384xf32>
    %2 = vector.shape_cast %1 : vector<1x16x384xf32> to vector<16x384xf32>
    %c0_2 = arith.constant 0 : index
    %c0_3 = arith.constant 0 : index
    %c0_4 = arith.constant 0 : index
    %3 = vector.load %arg2[%c0_2, %c0_3, %c0_4] : memref<9x8x16xf32, #tpu.memory_space<vmem>>, vector<1x8x16xf32>
    %4 = vector.shape_cast %3 : vector<1x8x16xf32> to vector<8x16xf32>
    %cst_5 = arith.constant dense<0.000000e+00> : vector<8x384xf32>
    %5 = tpu.matmul %4, %2, %cst_5 {dimension_numbers = #tpu.dot_dimension_numbers<[1], [0], [0], [1], [0, 0, 1, 1], [], []>} : vector<8x16xf32>, vector<16x384xf32>, vector<8x384xf32> -> vector<8x384xf32>
    %6 = arith.addf %0, %5 : vector<8x384xf32>
    %c383_i32 = arith.constant 383 : i32
    %7 = tpu.dynamic_rotate %2 by %c383_i32 dim 1 : vector<16x384xf32>, i32 -> vector<16x384xf32>
    %c1 = arith.constant 1 : index
    %c0_6 = arith.constant 0 : index
    %c0_7 = arith.constant 0 : index
    %8 = vector.load %arg2[%c1, %c0_6, %c0_7] : memref<9x8x16xf32, #tpu.memory_space<vmem>>, vector<1x8x16xf32>
    %9 = vector.shape_cast %8 : vector<1x8x16xf32> to vector<8x16xf32>
    %cst_8 = arith.constant dense<0.000000e+00> : vector<8x384xf32>
    %10 = tpu.matmul %9, %7, %cst_8 {dimension_numbers = #tpu.dot_dimension_numbers<[1], [0], [0], [1], [0, 0, 1, 1], [], []>} : vector<8x16xf32>, vector<16x384xf32>, vector<8x384xf32> -> vector<8x384xf32>
    %11 = arith.addf %6, %10 : vector<8x384xf32>
    %c382_i32 = arith.constant 382 : i32
    %12 = tpu.dynamic_rotate %2 by %c382_i32 dim 1 : vector<16x384xf32>, i32 -> vector<16x384xf32>
    %c2 = arith.constant 2 : index
    %c0_9 = arith.constant 0 : index
    %c0_10 = arith.constant 0 : index
    %13 = vector.load %arg2[%c2, %c0_9, %c0_10] : memref<9x8x16xf32, #tpu.memory_space<vmem>>, vector<1x8x16xf32>
    %14 = vector.shape_cast %13 : vector<1x8x16xf32> to vector<8x16xf32>
    %cst_11 = arith.constant dense<0.000000e+00> : vector<8x384xf32>
    %15 = tpu.matmul %14, %12, %cst_11 {dimension_numbers = #tpu.dot_dimension_numbers<[1], [0], [0], [1], [0, 0, 1, 1], [], []>} : vector<8x16xf32>, vector<16x384xf32>, vector<8x384xf32> -> vector<8x384xf32>
    %16 = arith.addf %11, %15 : vector<8x384xf32>
    %c0_12 = arith.constant 0 : index
    %c0_13 = arith.constant 0 : index
    %c18 = arith.constant 18 : index
    %17 = vector.load %arg1[%c0_12, %c0_13, %c18] : memref<1x16x420xf32, #tpu.memory_space<vmem>>, vector<1x16x384xf32>
    %18 = vector.shape_cast %17 : vector<1x16x384xf32> to vector<16x384xf32>
    %c3 = arith.constant 3 : index
    %c0_14 = arith.constant 0 : index
    %c0_15 = arith.constant 0 : index
    %19 = vector.load %arg2[%c3, %c0_14, %c0_15] : memref<9x8x16xf32, #tpu.memory_space<vmem>>, vector<1x8x16xf32>
    %20 = vector.shape_cast %19 : vector<1x8x16xf32> to vector<8x16xf32>
    %cst_16 = arith.constant dense<0.000000e+00> : vector<8x384xf32>
    %21 = tpu.matmul %20, %18, %cst_16 {dimension_numbers = #tpu.dot_dimension_numbers<[1], [0], [0], [1], [0, 0, 1, 1], [], []>} : vector<8x16xf32>, vector<16x384xf32>, vector<8x384xf32> -> vector<8x384xf32>
    %22 = arith.addf %16, %21 : vector<8x384xf32>
    %c383_i32_17 = arith.constant 383 : i32
    %23 = tpu.dynamic_rotate %18 by %c383_i32_17 dim 1 : vector<16x384xf32>, i32 -> vector<16x384xf32>
    %c4 = arith.constant 4 : index
    %c0_18 = arith.constant 0 : index
    %c0_19 = arith.constant 0 : index
    %24 = vector.load %arg2[%c4, %c0_18, %c0_19] : memref<9x8x16xf32, #tpu.memory_space<vmem>>, vector<1x8x16xf32>
    %25 = vector.shape_cast %24 : vector<1x8x16xf32> to vector<8x16xf32>
    %cst_20 = arith.constant dense<0.000000e+00> : vector<8x384xf32>
    %26 = tpu.matmul %25, %23, %cst_20 {dimension_numbers = #tpu.dot_dimension_numbers<[1], [0], [0], [1], [0, 0, 1, 1], [], []>} : vector<8x16xf32>, vector<16x384xf32>, vector<8x384xf32> -> vector<8x384xf32>
    %27 = arith.addf %22, %26 : vector<8x384xf32>
    %c382_i32_21 = arith.constant 382 : i32
    %28 = tpu.dynamic_rotate %18 by %c382_i32_21 dim 1 : vector<16x384xf32>, i32 -> vector<16x384xf32>
    %c5 = arith.constant 5 : index
    %c0_22 = arith.constant 0 : index
    %c0_23 = arith.constant 0 : index
    %29 = vector.load %arg2[%c5, %c0_22, %c0_23] : memref<9x8x16xf32, #tpu.memory_space<vmem>>, vector<1x8x16xf32>
    %30 = vector.shape_cast %29 : vector<1x8x16xf32> to vector<8x16xf32>
    %cst_24 = arith.constant dense<0.000000e+00> : vector<8x384xf32>
    %31 = tpu.matmul %30, %28, %cst_24 {dimension_numbers = #tpu.dot_dimension_numbers<[1], [0], [0], [1], [0, 0, 1, 1], [], []>} : vector<8x16xf32>, vector<16x384xf32>, vector<8x384xf32> -> vector<8x384xf32>
    %32 = arith.addf %27, %31 : vector<8x384xf32>
    %c0_25 = arith.constant 0 : index
    %c0_26 = arith.constant 0 : index
    %c36 = arith.constant 36 : index
    %33 = vector.load %arg1[%c0_25, %c0_26, %c36] : memref<1x16x420xf32, #tpu.memory_space<vmem>>, vector<1x16x384xf32>
    %34 = vector.shape_cast %33 : vector<1x16x384xf32> to vector<16x384xf32>
    %c6 = arith.constant 6 : index
    %c0_27 = arith.constant 0 : index
    %c0_28 = arith.constant 0 : index
    %35 = vector.load %arg2[%c6, %c0_27, %c0_28] : memref<9x8x16xf32, #tpu.memory_space<vmem>>, vector<1x8x16xf32>
    %36 = vector.shape_cast %35 : vector<1x8x16xf32> to vector<8x16xf32>
    %cst_29 = arith.constant dense<0.000000e+00> : vector<8x384xf32>
    %37 = tpu.matmul %36, %34, %cst_29 {dimension_numbers = #tpu.dot_dimension_numbers<[1], [0], [0], [1], [0, 0, 1, 1], [], []>} : vector<8x16xf32>, vector<16x384xf32>, vector<8x384xf32> -> vector<8x384xf32>
    %38 = arith.addf %32, %37 : vector<8x384xf32>
    %c383_i32_30 = arith.constant 383 : i32
    %39 = tpu.dynamic_rotate %34 by %c383_i32_30 dim 1 : vector<16x384xf32>, i32 -> vector<16x384xf32>
    %c7 = arith.constant 7 : index
    %c0_31 = arith.constant 0 : index
    %c0_32 = arith.constant 0 : index
    %40 = vector.load %arg2[%c7, %c0_31, %c0_32] : memref<9x8x16xf32, #tpu.memory_space<vmem>>, vector<1x8x16xf32>
    %41 = vector.shape_cast %40 : vector<1x8x16xf32> to vector<8x16xf32>
    %cst_33 = arith.constant dense<0.000000e+00> : vector<8x384xf32>
    %42 = tpu.matmul %41, %39, %cst_33 {dimension_numbers = #tpu.dot_dimension_numbers<[1], [0], [0], [1], [0, 0, 1, 1], [], []>} : vector<8x16xf32>, vector<16x384xf32>, vector<8x384xf32> -> vector<8x384xf32>
    %43 = arith.addf %38, %42 : vector<8x384xf32>
    %c382_i32_34 = arith.constant 382 : i32
    %44 = tpu.dynamic_rotate %34 by %c382_i32_34 dim 1 : vector<16x384xf32>, i32 -> vector<16x384xf32>
    %c8 = arith.constant 8 : index
    %c0_35 = arith.constant 0 : index
    %c0_36 = arith.constant 0 : index
    %45 = vector.load %arg2[%c8, %c0_35, %c0_36] : memref<9x8x16xf32, #tpu.memory_space<vmem>>, vector<1x8x16xf32>
    %46 = vector.shape_cast %45 : vector<1x8x16xf32> to vector<8x16xf32>
    %cst_37 = arith.constant dense<0.000000e+00> : vector<8x384xf32>
    %47 = tpu.matmul %46, %44, %cst_37 {dimension_numbers = #tpu.dot_dimension_numbers<[1], [0], [0], [1], [0, 0, 1, 1], [], []>} : vector<8x16xf32>, vector<16x384xf32>, vector<8x384xf32> -> vector<8x384xf32>
    %48 = arith.addf %43, %47 : vector<8x384xf32>
    %c0_38 = arith.constant 0 : index
    %c0_39 = arith.constant 0 : index
    %49 = vector.load %arg3[%c0_38, %c0_39] : memref<8x1xf32, #tpu.memory_space<vmem>>, vector<8x1xf32>
    %50 = vector.broadcast %49 : vector<8x1xf32> to vector<8x384xf32>
    %51 = arith.addf %48, %50 : vector<8x384xf32>
    %cst_40 = arith.constant 0.000000e+00 : f32
    %52 = vector.broadcast %cst_40 : f32 to vector<8x384xf32>
    %53 = arith.maximumf %51, %52 : vector<8x384xf32>
    %c0_41 = arith.constant 0 : index
    %c0_42 = arith.constant 0 : index
    %54 = vector.load %arg6[%c0_41, %c0_42] : memref<1x384xf32, #tpu.memory_space<vmem>>, vector<1x384xf32>
    %55 = vector.broadcast %54 : vector<1x384xf32> to vector<8x384xf32>
    %56 = arith.mulf %53, %55 : vector<8x384xf32>
    %cst_43 = arith.constant 0.000000e+00 : f32
    %57 = vector.broadcast %cst_43 : f32 to vector<8x19xf32>
    %c0_44 = arith.constant 0 : index
    %c0_45 = arith.constant 0 : index
    %58 = vector.load %arg8[%c0_44, %c0_45] : memref<8x420xf32, #tpu.memory_space<vmem>>, vector<8x19xf32>
    tpu.vector_store %arg8[%c0_44, %c0_45], %57 {strides = array<i32>} : memref<8x420xf32, #tpu.memory_space<vmem>>, vector<8x19xf32>,
    %c0_46 = arith.constant 0 : index
    %c19 = arith.constant 19 : index
    %59 = vector.load %arg8[%c0_46, %c19] : memref<8x420xf32, #tpu.memory_space<vmem>>, vector<8x384xf32>
    tpu.vector_store %arg8[%c0_46, %c19], %56 {strides = array<i32>} : memref<8x420xf32, #tpu.memory_space<vmem>>, vector<8x384xf32>,
    %cst_47 = arith.constant 0.000000e+00 : f32
    %60 = vector.broadcast %cst_47 : f32 to vector<16x384xf32>
    %c0_48 = arith.constant 0 : index
    %c0_49 = arith.constant 0 : index
    %61 = vector.load %arg8[%c0_48, %c0_49] : memref<8x420xf32, #tpu.memory_space<vmem>>, vector<8x384xf32>
    %c0_50 = arith.constant 0 : index
    %c0_51 = arith.constant 0 : index
    %c0_52 = arith.constant 0 : index
    %62 = vector.load %arg4[%c0_50, %c0_51, %c0_52] : memref<9x16x8xf32, #tpu.memory_space<vmem>>, vector<1x16x8xf32>
    %63 = vector.shape_cast %62 : vector<1x16x8xf32> to vector<16x8xf32>
    %cst_53 = arith.constant dense<0.000000e+00> : vector<16x384xf32>
    %64 = tpu.matmul %63, %61, %cst_53 {dimension_numbers = #tpu.dot_dimension_numbers<[1], [0], [0], [1], [0, 0, 1, 1], [], []>} : vector<16x8xf32>, vector<8x384xf32>, vector<16x384xf32> -> vector<16x384xf32>
    %65 = arith.addf %60, %64 : vector<16x384xf32>
    %c383_i32_54 = arith.constant 383 : i32
    %66 = tpu.dynamic_rotate %61 by %c383_i32_54 dim 1 : vector<8x384xf32>, i32 -> vector<8x384xf32>
    %c1_55 = arith.constant 1 : index
    %c0_56 = arith.constant 0 : index
    %c0_57 = arith.constant 0 : index
    %67 = vector.load %arg4[%c1_55, %c0_56, %c0_57] : memref<9x16x8xf32, #tpu.memory_space<vmem>>, vector<1x16x8xf32>
    %68 = vector.shape_cast %67 : vector<1x16x8xf32> to vector<16x8xf32>
    %cst_58 = arith.constant dense<0.000000e+00> : vector<16x384xf32>
    %69 = tpu.matmul %68, %66, %cst_58 {dimension_numbers = #tpu.dot_dimension_numbers<[1], [0], [0], [1], [0, 0, 1, 1], [], []>} : vector<16x8xf32>, vector<8x384xf32>, vector<16x384xf32> -> vector<16x384xf32>
    %70 = arith.addf %65, %69 : vector<16x384xf32>
    %c382_i32_59 = arith.constant 382 : i32
    %71 = tpu.dynamic_rotate %61 by %c382_i32_59 dim 1 : vector<8x384xf32>, i32 -> vector<8x384xf32>
    %c2_60 = arith.constant 2 : index
    %c0_61 = arith.constant 0 : index
    %c0_62 = arith.constant 0 : index
    %72 = vector.load %arg4[%c2_60, %c0_61, %c0_62] : memref<9x16x8xf32, #tpu.memory_space<vmem>>, vector<1x16x8xf32>
    %73 = vector.shape_cast %72 : vector<1x16x8xf32> to vector<16x8xf32>
    %cst_63 = arith.constant dense<0.000000e+00> : vector<16x384xf32>
    %74 = tpu.matmul %73, %71, %cst_63 {dimension_numbers = #tpu.dot_dimension_numbers<[1], [0], [0], [1], [0, 0, 1, 1], [], []>} : vector<16x8xf32>, vector<8x384xf32>, vector<16x384xf32> -> vector<16x384xf32>
    %75 = arith.addf %70, %74 : vector<16x384xf32>
    %c0_64 = arith.constant 0 : index
    %c18_65 = arith.constant 18 : index
    %76 = vector.load %arg8[%c0_64, %c18_65] : memref<8x420xf32, #tpu.memory_space<vmem>>, vector<8x384xf32>
    %c3_66 = arith.constant 3 : index
    %c0_67 = arith.constant 0 : index
    %c0_68 = arith.constant 0 : index
    %77 = vector.load %arg4[%c3_66, %c0_67, %c0_68] : memref<9x16x8xf32, #tpu.memory_space<vmem>>, vector<1x16x8xf32>
    %78 = vector.shape_cast %77 : vector<1x16x8xf32> to vector<16x8xf32>
    %cst_69 = arith.constant dense<0.000000e+00> : vector<16x384xf32>
    %79 = tpu.matmul %78, %76, %cst_69 {dimension_numbers = #tpu.dot_dimension_numbers<[1], [0], [0], [1], [0, 0, 1, 1], [], []>} : vector<16x8xf32>, vector<8x384xf32>, vector<16x384xf32> -> vector<16x384xf32>
    %80 = arith.addf %75, %79 : vector<16x384xf32>
    %c383_i32_70 = arith.constant 383 : i32
    %81 = tpu.dynamic_rotate %76 by %c383_i32_70 dim 1 : vector<8x384xf32>, i32 -> vector<8x384xf32>
    %c4_71 = arith.constant 4 : index
    %c0_72 = arith.constant 0 : index
    %c0_73 = arith.constant 0 : index
    %82 = vector.load %arg4[%c4_71, %c0_72, %c0_73] : memref<9x16x8xf32, #tpu.memory_space<vmem>>, vector<1x16x8xf32>
    %83 = vector.shape_cast %82 : vector<1x16x8xf32> to vector<16x8xf32>
    %cst_74 = arith.constant dense<0.000000e+00> : vector<16x384xf32>
    %84 = tpu.matmul %83, %81, %cst_74 {dimension_numbers = #tpu.dot_dimension_numbers<[1], [0], [0], [1], [0, 0, 1, 1], [], []>} : vector<16x8xf32>, vector<8x384xf32>, vector<16x384xf32> -> vector<16x384xf32>
    %85 = arith.addf %80, %84 : vector<16x384xf32>
    %c382_i32_75 = arith.constant 382 : i32
    %86 = tpu.dynamic_rotate %76 by %c382_i32_75 dim 1 : vector<8x384xf32>, i32 -> vector<8x384xf32>
    %c5_76 = arith.constant 5 : index
    %c0_77 = arith.constant 0 : index
    %c0_78 = arith.constant 0 : index
    %87 = vector.load %arg4[%c5_76, %c0_77, %c0_78] : memref<9x16x8xf32, #tpu.memory_space<vmem>>, vector<1x16x8xf32>
    %88 = vector.shape_cast %87 : vector<1x16x8xf32> to vector<16x8xf32>
    %cst_79 = arith.constant dense<0.000000e+00> : vector<16x384xf32>
    %89 = tpu.matmul %88, %86, %cst_79 {dimension_numbers = #tpu.dot_dimension_numbers<[1], [0], [0], [1], [0, 0, 1, 1], [], []>} : vector<16x8xf32>, vector<8x384xf32>, vector<16x384xf32> -> vector<16x384xf32>
    %90 = arith.addf %85, %89 : vector<16x384xf32>
    %c0_80 = arith.constant 0 : index
    %c36_81 = arith.constant 36 : index
    %91 = vector.load %arg8[%c0_80, %c36_81] : memref<8x420xf32, #tpu.memory_space<vmem>>, vector<8x384xf32>
    %c6_82 = arith.constant 6 : index
    %c0_83 = arith.constant 0 : index
    %c0_84 = arith.constant 0 : index
    %92 = vector.load %arg4[%c6_82, %c0_83, %c0_84] : memref<9x16x8xf32, #tpu.memory_space<vmem>>, vector<1x16x8xf32>
    %93 = vector.shape_cast %92 : vector<1x16x8xf32> to vector<16x8xf32>
    %cst_85 = arith.constant dense<0.000000e+00> : vector<16x384xf32>
    %94 = tpu.matmul %93, %91, %cst_85 {dimension_numbers = #tpu.dot_dimension_numbers<[1], [0], [0], [1], [0, 0, 1, 1], [], []>} : vector<16x8xf32>, vector<8x384xf32>, vector<16x384xf32> -> vector<16x384xf32>
    %95 = arith.addf %90, %94 : vector<16x384xf32>
    %c383_i32_86 = arith.constant 383 : i32
    %96 = tpu.dynamic_rotate %91 by %c383_i32_86 dim 1 : vector<8x384xf32>, i32 -> vector<8x384xf32>
    %c7_87 = arith.constant 7 : index
    %c0_88 = arith.constant 0 : index
    %c0_89 = arith.constant 0 : index
    %97 = vector.load %arg4[%c7_87, %c0_88, %c0_89] : memref<9x16x8xf32, #tpu.memory_space<vmem>>, vector<1x16x8xf32>
    %98 = vector.shape_cast %97 : vector<1x16x8xf32> to vector<16x8xf32>
    %cst_90 = arith.constant dense<0.000000e+00> : vector<16x384xf32>
    %99 = tpu.matmul %98, %96, %cst_90 {dimension_numbers = #tpu.dot_dimension_numbers<[1], [0], [0], [1], [0, 0, 1, 1], [], []>} : vector<16x8xf32>, vector<8x384xf32>, vector<16x384xf32> -> vector<16x384xf32>
    %100 = arith.addf %95, %99 : vector<16x384xf32>
    %c382_i32_91 = arith.constant 382 : i32
    %101 = tpu.dynamic_rotate %91 by %c382_i32_91 dim 1 : vector<8x384xf32>, i32 -> vector<8x384xf32>
    %c8_92 = arith.constant 8 : index
    %c0_93 = arith.constant 0 : index
    %c0_94 = arith.constant 0 : index
    %102 = vector.load %arg4[%c8_92, %c0_93, %c0_94] : memref<9x16x8xf32, #tpu.memory_space<vmem>>, vector<1x16x8xf32>
    %103 = vector.shape_cast %102 : vector<1x16x8xf32> to vector<16x8xf32>
    %cst_95 = arith.constant dense<0.000000e+00> : vector<16x384xf32>
    %104 = tpu.matmul %103, %101, %cst_95 {dimension_numbers = #tpu.dot_dimension_numbers<[1], [0], [0], [1], [0, 0, 1, 1], [], []>} : vector<16x8xf32>, vector<8x384xf32>, vector<16x384xf32> -> vector<16x384xf32>
    %105 = arith.addf %100, %104 : vector<16x384xf32>
    %c0_96 = arith.constant 0 : index
    %c0_97 = arith.constant 0 : index
    %106 = vector.load %arg5[%c0_96, %c0_97] : memref<16x1xf32, #tpu.memory_space<vmem>>, vector<16x1xf32>
    %107 = vector.broadcast %106 : vector<16x1xf32> to vector<16x384xf32>
    %108 = arith.addf %105, %107 : vector<16x384xf32>
    %cst_98 = arith.constant 0.000000e+00 : f32
    %109 = vector.broadcast %cst_98 : f32 to vector<16x384xf32>
    %110 = arith.maximumf %108, %109 : vector<16x384xf32>
    %111 = vector.extract_strided_slice %110 {offsets = [0, 0], sizes = [16, 16], strides = [1, 1]} : vector<16x384xf32> to vector<16x16xf32>
    %c0_99 = arith.constant 0 : index
    %c0_100 = arith.constant 0 : index
    %c0_101 = arith.constant 0 : index
    %c0_102 = arith.constant 0 : index
    %112 = vector.load %arg7[%c0_99, %c0_100, %c0_101, %c0_102] : memref<1x16x16x16xf32, #tpu.memory_space<vmem>>, vector<1x16x1x16xf32>
    %113 = vector.shape_cast %112 : vector<1x16x1x16xf32> to vector<16x16xf32>
    %114 = vector.shape_cast %111 : vector<16x16xf32> to vector<1x16x1x16xf32>
    tpu.vector_store %arg7[%c0_99, %c0_100, %c0_101, %c0_102], %114 {strides = array<i32>} : memref<1x16x16x16xf32, #tpu.memory_space<vmem>>, vector<1x16x1x16xf32>,
    %115 = vector.extract_strided_slice %110 {offsets = [0, 18], sizes = [16, 16], strides = [1, 1]} : vector<16x384xf32> to vector<16x16xf32>
    %c0_103 = arith.constant 0 : index
    %c0_104 = arith.constant 0 : index
    %c1_105 = arith.constant 1 : index
    %c0_106 = arith.constant 0 : index
    %116 = vector.load %arg7[%c0_103, %c0_104, %c1_105, %c0_106] : memref<1x16x16x16xf32, #tpu.memory_space<vmem>>, vector<1x16x1x16xf32>
    %117 = vector.shape_cast %116 : vector<1x16x1x16xf32> to vector<16x16xf32>
    %118 = vector.shape_cast %115 : vector<16x16xf32> to vector<1x16x1x16xf32>
    tpu.vector_store %arg7[%c0_103, %c0_104, %c1_105, %c0_106], %118 {strides = array<i32>} : memref<1x16x16x16xf32, #tpu.memory_space<vmem>>, vector<1x16x1x16xf32>,
    %119 = vector.extract_strided_slice %110 {offsets = [0, 36], sizes = [16, 16], strides = [1, 1]} : vector<16x384xf32> to vector<16x16xf32>
    %c0_107 = arith.constant 0 : index
    %c0_108 = arith.constant 0 : index
    %c2_109 = arith.constant 2 : index
    %c0_110 = arith.constant 0 : index
    %120 = vector.load %arg7[%c0_107, %c0_108, %c2_109, %c0_110] : memref<1x16x16x16xf32, #tpu.memory_space<vmem>>, vector<1x16x1x16xf32>
    %121 = vector.shape_cast %120 : vector<1x16x1x16xf32> to vector<16x16xf32>
    %122 = vector.shape_cast %119 : vector<16x16xf32> to vector<1x16x1x16xf32>
    tpu.vector_store %arg7[%c0_107, %c0_108, %c2_109, %c0_110], %122 {strides = array<i32>} : memref<1x16x16x16xf32, #tpu.memory_space<vmem>>, vector<1x16x1x16xf32>,
    %123 = vector.extract_strided_slice %110 {offsets = [0, 54], sizes = [16, 16], strides = [1, 1]} : vector<16x384xf32> to vector<16x16xf32>
    %c0_111 = arith.constant 0 : index
    %c0_112 = arith.constant 0 : index
    %c3_113 = arith.constant 3 : index
    %c0_114 = arith.constant 0 : index
    %124 = vector.load %arg7[%c0_111, %c0_112, %c3_113, %c0_114] : memref<1x16x16x16xf32, #tpu.memory_space<vmem>>, vector<1x16x1x16xf32>
    %125 = vector.shape_cast %124 : vector<1x16x1x16xf32> to vector<16x16xf32>
    %126 = vector.shape_cast %123 : vector<16x16xf32> to vector<1x16x1x16xf32>
    tpu.vector_store %arg7[%c0_111, %c0_112, %c3_113, %c0_114], %126 {strides = array<i32>} : memref<1x16x16x16xf32, #tpu.memory_space<vmem>>, vector<1x16x1x16xf32>,
    %127 = vector.extract_strided_slice %110 {offsets = [0, 72], sizes = [16, 16], strides = [1, 1]} : vector<16x384xf32> to vector<16x16xf32>
    %c0_115 = arith.constant 0 : index
    %c0_116 = arith.constant 0 : index
    %c4_117 = arith.constant 4 : index
    %c0_118 = arith.constant 0 : index
    %128 = vector.load %arg7[%c0_115, %c0_116, %c4_117, %c0_118] : memref<1x16x16x16xf32, #tpu.memory_space<vmem>>, vector<1x16x1x16xf32>
    %129 = vector.shape_cast %128 : vector<1x16x1x16xf32> to vector<16x16xf32>
    %130 = vector.shape_cast %127 : vector<16x16xf32> to vector<1x16x1x16xf32>
    tpu.vector_store %arg7[%c0_115, %c0_116, %c4_117, %c0_118], %130 {strides = array<i32>} : memref<1x16x16x16xf32, #tpu.memory_space<vmem>>, vector<1x16x1x16xf32>,
    %131 = vector.extract_strided_slice %110 {offsets = [0, 90], sizes = [16, 16], strides = [1, 1]} : vector<16x384xf32> to vector<16x16xf32>
    %c0_119 = arith.constant 0 : index
    %c0_120 = arith.constant 0 : index
    %c5_121 = arith.constant 5 : index
    %c0_122 = arith.constant 0 : index
    %132 = vector.load %arg7[%c0_119, %c0_120, %c5_121, %c0_122] : memref<1x16x16x16xf32, #tpu.memory_space<vmem>>, vector<1x16x1x16xf32>
    %133 = vector.shape_cast %132 : vector<1x16x1x16xf32> to vector<16x16xf32>
    %134 = vector.shape_cast %131 : vector<16x16xf32> to vector<1x16x1x16xf32>
    tpu.vector_store %arg7[%c0_119, %c0_120, %c5_121, %c0_122], %134 {strides = array<i32>} : memref<1x16x16x16xf32, #tpu.memory_space<vmem>>, vector<1x16x1x16xf32>,
    %135 = vector.extract_strided_slice %110 {offsets = [0, 108], sizes = [16, 16], strides = [1, 1]} : vector<16x384xf32> to vector<16x16xf32>
    %c0_123 = arith.constant 0 : index
    %c0_124 = arith.constant 0 : index
    %c6_125 = arith.constant 6 : index
    %c0_126 = arith.constant 0 : index
    %136 = vector.load %arg7[%c0_123, %c0_124, %c6_125, %c0_126] : memref<1x16x16x16xf32, #tpu.memory_space<vmem>>, vector<1x16x1x16xf32>
    %137 = vector.shape_cast %136 : vector<1x16x1x16xf32> to vector<16x16xf32>
    %138 = vector.shape_cast %135 : vector<16x16xf32> to vector<1x16x1x16xf32>
    tpu.vector_store %arg7[%c0_123, %c0_124, %c6_125, %c0_126], %138 {strides = array<i32>} : memref<1x16x16x16xf32, #tpu.memory_space<vmem>>, vector<1x16x1x16xf32>,
    %139 = vector.extract_strided_slice %110 {offsets = [0, 126], sizes = [16, 16], strides = [1, 1]} : vector<16x384xf32> to vector<16x16xf32>
    %c0_127 = arith.constant 0 : index
    %c0_128 = arith.constant 0 : index
    %c7_129 = arith.constant 7 : index
    %c0_130 = arith.constant 0 : index
    %140 = vector.load %arg7[%c0_127, %c0_128, %c7_129, %c0_130] : memref<1x16x16x16xf32, #tpu.memory_space<vmem>>, vector<1x16x1x16xf32>
    %141 = vector.shape_cast %140 : vector<1x16x1x16xf32> to vector<16x16xf32>
    %142 = vector.shape_cast %139 : vector<16x16xf32> to vector<1x16x1x16xf32>
    tpu.vector_store %arg7[%c0_127, %c0_128, %c7_129, %c0_130], %142 {strides = array<i32>} : memref<1x16x16x16xf32, #tpu.memory_space<vmem>>, vector<1x16x1x16xf32>,
    %143 = vector.extract_strided_slice %110 {offsets = [0, 144], sizes = [16, 16], strides = [1, 1]} : vector<16x384xf32> to vector<16x16xf32>
    %c0_131 = arith.constant 0 : index
    %c0_132 = arith.constant 0 : index
    %c8_133 = arith.constant 8 : index
    %c0_134 = arith.constant 0 : index
    %144 = vector.load %arg7[%c0_131, %c0_132, %c8_133, %c0_134] : memref<1x16x16x16xf32, #tpu.memory_space<vmem>>, vector<1x16x1x16xf32>
    %145 = vector.shape_cast %144 : vector<1x16x1x16xf32> to vector<16x16xf32>
    %146 = vector.shape_cast %143 : vector<16x16xf32> to vector<1x16x1x16xf32>
    tpu.vector_store %arg7[%c0_131, %c0_132, %c8_133, %c0_134], %146 {strides = array<i32>} : memref<1x16x16x16xf32, #tpu.memory_space<vmem>>, vector<1x16x1x16xf32>,
    %147 = vector.extract_strided_slice %110 {offsets = [0, 162], sizes = [16, 16], strides = [1, 1]} : vector<16x384xf32> to vector<16x16xf32>
    %c0_135 = arith.constant 0 : index
    %c0_136 = arith.constant 0 : index
    %c9 = arith.constant 9 : index
    %c0_137 = arith.constant 0 : index
    %148 = vector.load %arg7[%c0_135, %c0_136, %c9, %c0_137] : memref<1x16x16x16xf32, #tpu.memory_space<vmem>>, vector<1x16x1x16xf32>
    %149 = vector.shape_cast %148 : vector<1x16x1x16xf32> to vector<16x16xf32>
    %150 = vector.shape_cast %147 : vector<16x16xf32> to vector<1x16x1x16xf32>
    tpu.vector_store %arg7[%c0_135, %c0_136, %c9, %c0_137], %150 {strides = array<i32>} : memref<1x16x16x16xf32, #tpu.memory_space<vmem>>, vector<1x16x1x16xf32>,
    %151 = vector.extract_strided_slice %110 {offsets = [0, 180], sizes = [16, 16], strides = [1, 1]} : vector<16x384xf32> to vector<16x16xf32>
    %c0_138 = arith.constant 0 : index
    %c0_139 = arith.constant 0 : index
    %c10 = arith.constant 10 : index
    %c0_140 = arith.constant 0 : index
    %152 = vector.load %arg7[%c0_138, %c0_139, %c10, %c0_140] : memref<1x16x16x16xf32, #tpu.memory_space<vmem>>, vector<1x16x1x16xf32>
    %153 = vector.shape_cast %152 : vector<1x16x1x16xf32> to vector<16x16xf32>
    %154 = vector.shape_cast %151 : vector<16x16xf32> to vector<1x16x1x16xf32>
    tpu.vector_store %arg7[%c0_138, %c0_139, %c10, %c0_140], %154 {strides = array<i32>} : memref<1x16x16x16xf32, #tpu.memory_space<vmem>>, vector<1x16x1x16xf32>,
    %155 = vector.extract_strided_slice %110 {offsets = [0, 198], sizes = [16, 16], strides = [1, 1]} : vector<16x384xf32> to vector<16x16xf32>
    %c0_141 = arith.constant 0 : index
    %c0_142 = arith.constant 0 : index
    %c11 = arith.constant 11 : index
    %c0_143 = arith.constant 0 : index
    %156 = vector.load %arg7[%c0_141, %c0_142, %c11, %c0_143] : memref<1x16x16x16xf32, #tpu.memory_space<vmem>>, vector<1x16x1x16xf32>
    %157 = vector.shape_cast %156 : vector<1x16x1x16xf32> to vector<16x16xf32>
    %158 = vector.shape_cast %155 : vector<16x16xf32> to vector<1x16x1x16xf32>
    tpu.vector_store %arg7[%c0_141, %c0_142, %c11, %c0_143], %158 {strides = array<i32>} : memref<1x16x16x16xf32, #tpu.memory_space<vmem>>, vector<1x16x1x16xf32>,
    %159 = vector.extract_strided_slice %110 {offsets = [0, 216], sizes = [16, 16], strides = [1, 1]} : vector<16x384xf32> to vector<16x16xf32>
    %c0_144 = arith.constant 0 : index
    %c0_145 = arith.constant 0 : index
    %c12 = arith.constant 12 : index
    %c0_146 = arith.constant 0 : index
    %160 = vector.load %arg7[%c0_144, %c0_145, %c12, %c0_146] : memref<1x16x16x16xf32, #tpu.memory_space<vmem>>, vector<1x16x1x16xf32>
    %161 = vector.shape_cast %160 : vector<1x16x1x16xf32> to vector<16x16xf32>
    %162 = vector.shape_cast %159 : vector<16x16xf32> to vector<1x16x1x16xf32>
    tpu.vector_store %arg7[%c0_144, %c0_145, %c12, %c0_146], %162 {strides = array<i32>} : memref<1x16x16x16xf32, #tpu.memory_space<vmem>>, vector<1x16x1x16xf32>,
    %163 = vector.extract_strided_slice %110 {offsets = [0, 234], sizes = [16, 16], strides = [1, 1]} : vector<16x384xf32> to vector<16x16xf32>
    %c0_147 = arith.constant 0 : index
    %c0_148 = arith.constant 0 : index
    %c13 = arith.constant 13 : index
    %c0_149 = arith.constant 0 : index
    %164 = vector.load %arg7[%c0_147, %c0_148, %c13, %c0_149] : memref<1x16x16x16xf32, #tpu.memory_space<vmem>>, vector<1x16x1x16xf32>
    %165 = vector.shape_cast %164 : vector<1x16x1x16xf32> to vector<16x16xf32>
    %166 = vector.shape_cast %163 : vector<16x16xf32> to vector<1x16x1x16xf32>
    tpu.vector_store %arg7[%c0_147, %c0_148, %c13, %c0_149], %166 {strides = array<i32>} : memref<1x16x16x16xf32, #tpu.memory_space<vmem>>, vector<1x16x1x16xf32>,
    %167 = vector.extract_strided_slice %110 {offsets = [0, 252], sizes = [16, 16], strides = [1, 1]} : vector<16x384xf32> to vector<16x16xf32>
    %c0_150 = arith.constant 0 : index
    %c0_151 = arith.constant 0 : index
    %c14 = arith.constant 14 : index
    %c0_152 = arith.constant 0 : index
    %168 = vector.load %arg7[%c0_150, %c0_151, %c14, %c0_152] : memref<1x16x16x16xf32, #tpu.memory_space<vmem>>, vector<1x16x1x16xf32>
    %169 = vector.shape_cast %168 : vector<1x16x1x16xf32> to vector<16x16xf32>
    %170 = vector.shape_cast %167 : vector<16x16xf32> to vector<1x16x1x16xf32>
    tpu.vector_store %arg7[%c0_150, %c0_151, %c14, %c0_152], %170 {strides = array<i32>} : memref<1x16x16x16xf32, #tpu.memory_space<vmem>>, vector<1x16x1x16xf32>,
    %171 = vector.extract_strided_slice %110 {offsets = [0, 270], sizes = [16, 16], strides = [1, 1]} : vector<16x384xf32> to vector<16x16xf32>
    %c0_153 = arith.constant 0 : index
    %c0_154 = arith.constant 0 : index
    %c15 = arith.constant 15 : index
    %c0_155 = arith.constant 0 : index
    %172 = vector.load %arg7[%c0_153, %c0_154, %c15, %c0_155] : memref<1x16x16x16xf32, #tpu.memory_space<vmem>>, vector<1x16x1x16xf32>
    %173 = vector.shape_cast %172 : vector<1x16x1x16xf32> to vector<16x16xf32>
    %174 = vector.shape_cast %171 : vector<16x16xf32> to vector<1x16x1x16xf32>
    tpu.vector_store %arg7[%c0_153, %c0_154, %c15, %c0_155], %174 {strides = array<i32>} : memref<1x16x16x16xf32, #tpu.memory_space<vmem>>, vector<1x16x1x16xf32>,
    return
  }
  func.func @transform_0(%arg0: i32) -> (i32, i32, i32) {
    %c0_i32 = arith.constant 0 : i32
    %c0_i32_0 = arith.constant 0 : i32
    %c0_i32_1 = arith.constant 0 : i32
    return %arg0, %c0_i32, %c0_i32_0 : i32, i32, i32
  }
  func.func @transform_1(%arg0: i32) -> (i32, i32, i32) {
    %c0_i32 = arith.constant 0 : i32
    %c0_i32_0 = arith.constant 0 : i32
    %c0_i32_1 = arith.constant 0 : i32
    %c0_i32_2 = arith.constant 0 : i32
    return %c0_i32, %c0_i32_0, %c0_i32_1 : i32, i32, i32
  }
  func.func @transform_2(%arg0: i32) -> (i32, i32) {
    %c0_i32 = arith.constant 0 : i32
    %c0_i32_0 = arith.constant 0 : i32
    %c0_i32_1 = arith.constant 0 : i32
    return %c0_i32, %c0_i32_0 : i32, i32
  }
  func.func @transform_3(%arg0: i32) -> (i32, i32, i32) {
    %c0_i32 = arith.constant 0 : i32
    %c0_i32_0 = arith.constant 0 : i32
    %c0_i32_1 = arith.constant 0 : i32
    %c0_i32_2 = arith.constant 0 : i32
    return %c0_i32, %c0_i32_0, %c0_i32_1 : i32, i32, i32
  }
  func.func @transform_4(%arg0: i32) -> (i32, i32) {
    %c0_i32 = arith.constant 0 : i32
    %c0_i32_0 = arith.constant 0 : i32
    %c0_i32_1 = arith.constant 0 : i32
    return %c0_i32, %c0_i32_0 : i32, i32
  }
  func.func @transform_5(%arg0: i32) -> (i32, i32) {
    %c0_i32 = arith.constant 0 : i32
    %c0_i32_0 = arith.constant 0 : i32
    %c0_i32_1 = arith.constant 0 : i32
    return %c0_i32, %c0_i32_0 : i32, i32
  }
  func.func @transform_6(%arg0: i32) -> (i32, i32, i32, i32) {
    %c0_i32 = arith.constant 0 : i32
    %c0_i32_0 = arith.constant 0 : i32
    %c0_i32_1 = arith.constant 0 : i32
    %c0_i32_2 = arith.constant 0 : i32
    return %arg0, %c0_i32, %c0_i32_0, %c0_i32_1 : i32, i32, i32, i32
  }
}

</mosaic_0001>

<bundles_post_ra>
// kernel: up_forward_pallas.1
= control target key start
LH: loop header
LB: loop body
LE: loop exit
PB: predicated region body
PF: predicated region fallthrough
CT: control target
= control target key end

     0   :  { %11 = vsyncpa [#allocation4], 0  ;;  %s8470_s0 = inlined_call_operand.vmem [shape: f32[2,16,420], index: 0, kind: input, shape index: {}]   ;;  %s8471_s1 = inlined_call_operand.vmem [shape: f32[9,8,16], index: 1, kind: input, shape index: {}]   ;;  %s8472_s2 = inlined_call_operand.vmem [shape: f32[8,1], index: 2, kind: input, shape index: {}]   ;;  %s8473_s3 = inlined_call_operand.vmem [shape: f32[9,16,8], index: 3, kind: input, shape index: {}]   ;;  %s8474_s4 = inlined_call_operand.vmem [shape: f32[16,1], index: 4, kind: input, shape index: {}]   ;;  %s8475_s5 = inlined_call_operand.vmem [shape: f32[1,384], index: 5, kind: input, shape index: {}]   ;;  %s8476_s6 = inlined_call_operand.hbm [shape: f32[2,16,16,16], index: 6, kind: output, shape index: {}]  }
   0x1   :  { %13 = vsyncpa [#allocation4 + $0x1], 0  ;;  %s6256_s21 = smov 0   ;;  %s6258_s22 = smov 0  }
   0x2   :  { %s6260_s23 = smov 0   ;;  %s6262_s24 = smov 0  }
   0x3 LB: > { %s6277_s25 = sadd.s32 4294967295, %s6193_s24   ;;  %s5554_s26 = sadd.s32 4294967294, %s6193_s24   ;;  %s6193_s24 = sphi %s6262_s24, %s8493_s24   ;;  %s6189_s23 = sphi %s6260_s23, %s8492_s23   ;;  %s6185_s22 = sphi %s6258_s22, %s8491_s22   ;;  %s6181_s21 = sphi %s6256_s21, %s8490_s21  }
   0x4   : > { %s6281_s27 = sadd.s32 1, %s6193_s24   ;;  %s157_s28 = sadd.s32 1, %s6189_s23 }
   0x5   : > { %s154_s29 = ssub.s32 %s6193_s24, %s6281_s27  ;;  %p167_p0 = scmp.ne.s32.totalorder %s6189_s23, %s6185_s22 }
   0x6   : > { %p155_p1 = scmp.eq.s32.totalorder %s154_s29, 0  ;;  %p168_p2 = scmp.eq.s32.totalorder %s6277_s25, 1 }
   0x7   : > { %p173_p3 = scmp.ne.s32.totalorder %s6185_s22, %s6181_s21  ;;  %p174_p4 = scmp.eq.s32.totalorder %s5554_s26, 1 }
   0x8   : > { %s6292_s30 = scalar_select %p155_p1, %s6189_s23, %s157_s28  }
   0x9   : > { %p6294_p5 = por %p168_p2, %p167_p0  ;;  %p6298_p6 = por %p174_p4, %p173_p3 }
   0xa   : > { %p5557_p7 = scmp.ge.s32.totalorder %s6193_s24, 1  ;;  %p215_p8 = scmp.lt.s32.totalorder %s6193_s24, 3 }
   0xc   : > { %p216_p9 = pnand %p5557_p7, %p215_p8 }
   0xd   : > { %p245_p10 = scmp.lt.s32.totalorder (!%p216_p9), %s6277_s25, 1  ;;  %s6195_s14 = smov (!%p216_p9), 110   ;;  %v6197_v12 = vmov (!%p216_p9), 0.0|0.0   ;;  %v6198_v15 = vmov (!%p216_p9), 0.0   ;;  %vm6200_vm0 = vmmov (!%p216_p9), 0   ;;  %vm771_vm1 = vcmask (!%p216_p9), 900096  }
   0xe   : > { %219 = sbr.rel (%p216_p9) target bundleno = 1836 (0x72c), region = 44  ;;  %s6196_s15 = smov (!%p216_p9), 92   ;;  %5812 = vmatprep.subr.bf16.mxu1 (!%p216_p9), %v6197_v12  ;;  %348 = vmatprep.mubr.f32.mxu0 (!%p216_p9), %v6198_v15  ;;  %v269_v39 = vlaneseq (!%p216_p9)  ;;  %vm1283_vm2 = vcmask (!%p216_p9), 752640   ;;  %vm280_vm5 = vcmask (!%p216_p9), 130048   ;;  %vm1809_vm6 = vcmask (!%p216_p9), 154624  }
   0xf   : > { %s6199_s16 = smov (!%p216_p9), 127   ;;  %5704 = vmatprep.mubr.msk.f32.mxu1 (!%p216_p9), %vm6200_vm0, %v6198_v15  ;;  %s6201_s17 = smov (!%p216_p9), 126   ;;  %1810 = vst.msk [vmem:[#allocation2] sm:$0xff] (!%p216_p9), %vm1809_vm6, %v6198_v15  ;;  %vm1826_vm7 = vcmask (!%p216_p9), 1047704   ;;  %vm1848_vm8 = vcmask (!%p216_p9), 64512   ;;  %vm3555_vm9 = vcmask (!%p216_p9), 122880  }
  0x10   : > { %v6382_v51 = vand.u32 (!%p216_p9), 127, %v269_v39  ;;  %s6203_s28 = smov (!%p216_p9), 19   ;;  %s6206_s11 = smov (!%p216_p9), 74   ;;  %vm4314_vm10 = vcmask (!%p216_p9), 15360   ;;  %vm5203_vm11 = vcmask (!%p216_p9), 31744  }
  0x11   : > { %s6207_s12 = smov (!%p216_p9), 56   ;;  %s6211_s18 = smov (!%p216_p9), 2  }
  0x12   : > { %vm271_vm3 = vcmp.lt.s32.totalorder (!%p216_p9), %v6382_v51, 127  ;;  %vm581_vm4 = vcmp.lt.s32.totalorder (!%p216_p9), %v6382_v51, 126  ;;  %s6212_s19 = smov (!%p216_p9), 94   ;;  %s6213_s20 = smov (!%p216_p9), 76  }
  0x13   : > { %s8478_s26 = smov (!%p216_p9), 58  }
  0x15   : > { %s246_s9 = scalar_select %p245_p10, %s6277_s25, 1 }
  0x17   : > { %s5644_s10 = sshll.u32 %s246_s9, 6 }
  0x18   : > { %s249_s13 = scalar_lea.vmem %s8470_s0, %s5644_s10  ;;  %s8482_s10 = smov 114  }
  0x19   : > { %v6309_v0 = vld [vmem:[%s249_s13 + $0x30] sm:$0xff]  ;;  %v744_v1 = vld [vmem:[%s249_s13 + $0x38] sm:$0xff]  ;;  %v6311_v2 = vld [vmem:[%s249_s13 + $0x8] sm:$0xff] }
  0x1a   : > { %v6029_v3 = vpack.i.bf16 %v744_v1, %v6309_v0  ;;  %v6314_v4 = vld [vmem:[%s249_s13 + $0x10] sm:$0xff]  ;;  %v740_v5 = vld [vmem:[%s249_s13 + $0x18] sm:$0xff]  ;;  %v6316_v6 = vld [vmem:[%s249_s13 + $0x28] sm:$0xff] }
  0x1b   : > { %v6019_v7 = vpack.i.bf16 %v6314_v4, %v6311_v2  ;;  %v6320_v8 = vld [vmem:[%s249_s13] sm:$0xff]  ;;  %v6004_v11 = vpack.i.bf16 %v6316_v6, %v740_v5  ;;  %v6044_v13 = vpack.i.bf16 %v6309_v0, %v6314_v4  ;;  %v6039_v14 = vpack.i.bf16 %v6316_v6, %v6311_v2 }
  0x1c   : > { %v6322_v9 = vld [vmem:[%s249_s13 + $0x20] sm:$0xff]  ;;  %6010 = vrot.lane.b32.xlu1 %v6029_v3, %s6195_s14  ;;  %v5820_v16 = vpack.c.bf16 %v6309_v0, %v6314_v4  ;;  %v5815_v17 = vpack.c.bf16 %v6316_v6, %v6311_v2  ;;  %v5566_v4 = vld [vmem:[%s8471_s1 + $0x10] sm:$0xff]  ;;  %s8480_s13 = smov 20  }
  0x1d   : > { %v6014_v10 = vpack.i.bf16 %v6322_v9, %v6320_v8  ;;  %6000 = vrot.lane.b32.xlu0 %v6019_v7, %s6195_s14  ;;  %v5817_v18 = vpack.c.bf16 %v6322_v9, %v6320_v8 }
  0x20   : > { %6015 = vrot.lane.b32.xlu1 %v6014_v10, %s6195_s14 }
  0x21   : > { %6005 = vrot.lane.b32.xlu0 %v6004_v11, %s6195_s14 }
  0x24   : > { %6025 = vrot.lane.b32.xlu1 %v6004_v11, %s6196_s15 }
  0x25   : > { %6020 = vrot.lane.b32.xlu0 %v6019_v7, %s6196_s15 }
  0x28   : > { %6035 = vrot.lane.b32.xlu1 %v6014_v10, %s6196_s15 }
  0x29   : > { %6030 = vrot.lane.b32.xlu0 %v6029_v3, %s6196_s15 }
  0x2c   : > { %6045 = vrot.lane.b32.xlu1 %v6044_v13, %s6199_s16 }
  0x2d   : > { %6040 = vrot.lane.b32.xlu0 %v6039_v14, %s6199_s16 }
  0x30   : > { %6055 = vrot.lane.b32.xlu1 %v6039_v14, %s6201_s17 }
  0x31   : > { %6050 = vrot.lane.b32.xlu0 %v6014_v10, %s6199_s16 }
  0x34   : > { %6065 = vrot.lane.b32.xlu1 %v6014_v10, %s6201_s17 }
  0x35   : > { %6060 = vrot.lane.b32.xlu0 %v6044_v13, %s6201_s17 }
  0x8e   : > { %v6011_v19 = vpop.permute.xlu1 %6010 }
  0x8f   : > { %v6013_v20 = vunpack.i.h.bf16 %v6011_v19  ;;  %v6012_v21 = vunpack.i.l.bf16 %v6011_v19  ;;  %v6001_v22 = vpop.permute.xlu0 %6000 }
  0x90   : > { %v6003_v23 = vunpack.i.h.bf16 %v6001_v22  ;;  %v6002_v24 = vunpack.i.l.bf16 %v6001_v22 }
  0x91   : > { %v6356_v27 = vsel %vm771_vm1, %v6012_v21, %v6013_v20 }
  0x92   : > { %v6016_v25 = vpop.permute.xlu1 %6015  ;;  %v6362_v33 = vsel %vm771_vm1, %v6002_v24, %v6003_v23 }
  0x93   : > { %v6006_v26 = vpop.permute.xlu0 %6005  ;;  %v6018_v30 = vunpack.i.h.bf16 %v6016_v25  ;;  %v6017_v31 = vunpack.i.l.bf16 %v6016_v25 }
  0x94   : > { %v6008_v28 = vunpack.i.h.bf16 %v6006_v26  ;;  %v6007_v29 = vunpack.i.l.bf16 %v6006_v26 }
  0x95   : > { %v6372_v40 = vsel %vm771_vm1, %v6017_v31, %v6002_v24 }
  0x96   : > { %v6359_v32 = vsel %vm771_vm1, %v6003_v23, %v6007_v29  ;;  %v6365_v34 = vsel %vm771_vm1, %v6008_v28, %v6012_v21  ;;  %v6026_v35 = vpop.permute.xlu1 %6025  ;;  %v6375_v41 = vsel %vm771_vm1, %v6018_v30, %v6008_v28 }
  0x97   : > { %v6021_v36 = vpop.permute.xlu0 %6020  ;;  %v6074_v37 = vpack.i.bf16 %v6356_v27, %v6359_v32  ;;  %v6069_v38 = vpack.i.bf16 %v6365_v34, %v6362_v33  ;;  %v6027_v43 = vunpack.i.l.bf16 %v6026_v35  ;;  %v6028_v45 = vunpack.i.h.bf16 %v6026_v35 }
  0x98   : > { %v6023_v42 = vunpack.i.h.bf16 %v6021_v36  ;;  %v6022_v44 = vunpack.i.l.bf16 %v6021_v36  ;;  %v6079_v48 = vpack.i.bf16 %v6375_v41, %v6372_v40  ;;  %v5829_v8 = vpack.c.bf16 %v6365_v34, %v6362_v33  ;;  %v3416_v33 = vld [vmem:[%s8474_s4 + $0x8] sm:$0xff] }
  0x99   : > { %6075 = vrot.lane.b32.xlu1 %v6074_v37, %s6199_s16  ;;  %6070 = vrot.lane.b32.xlu0 %v6069_v38, %s6199_s16  ;;  %v5834_v9 = vpack.c.bf16 %v6356_v27, %v6359_v32  ;;  %v6202_v27 = vmov 0   ;;  %v5831_v32 = vpack.c.bf16 %v6375_v41, %v6372_v40 }
  0x9a   : > { %v6036_v46 = vpop.permute.xlu1 %6035  ;;  %v6387_v54 = vsel %vm1283_vm2, %v6023_v42, %v6027_v43  ;;  %v6399_v59 = vsel %vm1283_vm2, %v6022_v44, %v6023_v42  ;;  %6129 = vset.pattern.permute.xlu0 %v6202_v27  ;;  %6130 = vset.pattern.permute.xlu1 %v6202_v27 }
  0x9b   : > { %v6031_v47 = vpop.permute.xlu0 %6030  ;;  %v6038_v49 = vunpack.i.h.bf16 %v6036_v46  ;;  %v6037_v50 = vunpack.i.l.bf16 %v6036_v46 }
  0x9c   : > { %v6033_v52 = vunpack.i.h.bf16 %v6031_v47  ;;  %v6032_v53 = vunpack.i.l.bf16 %v6031_v47  ;;  %v5561_v47 = vld [vmem:[%s8471_s1 + $0x8] sm:$0xff] }
  0x9d   : > { %6085 = vrot.lane.b32.xlu1 %v6069_v38, %s6201_s17  ;;  %6080 = vrot.lane.b32.xlu0 %v6079_v48, %s6199_s16  ;;  %v6390_v55 = vsel %vm1283_vm2, %v6037_v50, %v6022_v44  ;;  %v6393_v56 = vsel %vm1283_vm2, %v6038_v49, %v6028_v45 }
  0x9e   : > { %v6046_v57 = vpop.permute.xlu1 %6045  ;;  %v6396_v58 = vsel %vm1283_vm2, %v6032_v53, %v6033_v52  ;;  %v6402_v60 = vsel %vm1283_vm2, %v6028_v45, %v6032_v53  ;;  %v5852_v61 = vpack.c.bf16 %v6393_v56, %v6390_v55  ;;  %v6114_v26 = vpack.i.bf16 %v6393_v56, %v6390_v55 }
  0x9f   : > { %v6041_v62 = vpop.permute.xlu0 %6040  ;;  %v6048_v63 = vunpack.i.h.bf16 %v6046_v57  ;;  %v6047_v1 = vunpack.i.l.bf16 %v6046_v57  ;;  %v5850_v7 = vpack.c.bf16 %v6402_v60, %v6399_v59  ;;  %v5855_v10 = vpack.c.bf16 %v6396_v58, %v6387_v54 }
  0xa0   : > { %v6043_v3 = vunpack.i.h.bf16 %v6041_v62  ;;  %v6042_v5 = vunpack.i.l.bf16 %v6041_v62  ;;  %v6104_v11 = vpack.i.bf16 %v6396_v58, %v6387_v54  ;;  %v6099_v13 = vpack.i.bf16 %v6402_v60, %v6399_v59 }
  0xa1   : > { %6095 = vrot.lane.b32.xlu1 %v6079_v48, %s6201_s17  ;;  %6090 = vrot.lane.b32.xlu0 %v6074_v37, %s6201_s17 }
  0xa2   : > { %v6056_v14 = vpop.permute.xlu1 %6055  ;;  %v272_v19 = vsel %vm271_vm3, %v6042_v5, %v6047_v1  ;;  %v273_v20 = vsel %vm271_vm3, %v6043_v3, %v6048_v63 }
  0xa3   : > { %v6051_v21 = vpop.permute.xlu0 %6050  ;;  %v5808_v22 = vpack.c.bf16 %v273_v20, %v272_v19  ;;  %v6057_v25 = vunpack.i.l.bf16 %v6056_v14  ;;  %v6058_v36 = vunpack.i.h.bf16 %v6056_v14 }
  0xa4   : > { %v6053_v23 = vunpack.i.h.bf16 %v6051_v21  ;;  %v6052_v24 = vunpack.i.l.bf16 %v6051_v21 }
  0xa5   : > { %6105 = vrot.lane.b32.xlu1 %v6104_v11, %s6199_s16  ;;  %6100 = vrot.lane.b32.xlu0 %v6099_v13, %s6199_s16 }
  0xa6   : > { %5809 = vmatprep.subr.bf16.mxu0 %v5808_v22  ;;  %v274_v28 = vsel %vm271_vm3, %v6052_v24, %v6042_v5  ;;  %v275_v29 = vsel %vm271_vm3, %v6053_v23, %v6043_v3  ;;  %v276_v30 = vsel %vm271_vm3, %v6047_v1, %v6052_v24  ;;  %v277_v31 = vsel %vm271_vm3, %v6048_v63, %v6053_v23  ;;  %v6066_v35 = vpop.permute.xlu1 %6065 }
  0xa7   : > { %v5810_v37 = vpack.c.bf16 %v275_v29, %v274_v28  ;;  %v5813_v38 = vpack.c.bf16 %v277_v31, %v276_v30  ;;  %v6061_v42 = vpop.permute.xlu0 %6060  ;;  %v6068_v43 = vunpack.i.h.bf16 %v6066_v35  ;;  %v6067_v44 = vunpack.i.l.bf16 %v6066_v35 }
  0xa8   : > { %v6063_v45 = vunpack.i.h.bf16 %v6061_v42  ;;  %v6062_v46 = vunpack.i.l.bf16 %v6061_v42  ;;  %v5572_v42 = vld [vmem:[%s8471_s1 + $0x20] sm:$0xff] }
  0xa9   : > { %6115 = vrot.lane.b32.xlu1 %v6114_v26, %s6201_s17  ;;  %6110 = vrot.lane.b32.xlu0 %v6114_v26, %s6199_s16  ;;  %v585_v2 = vsel %vm581_vm4, %v6068_v43, %v6058_v36  ;;  %v584_v6 = vsel %vm581_vm4, %v6067_v44, %v6057_v25 }
  0xaa   : > { %5811 = vmatpush1.bf16.msra.mxu0 %v5810_v37  ;;  %5814 = vmatpush3.bf16.msra.mxu1 %v5813_v38  ;;  %v582_v48 = vsel %vm581_vm4, %v6057_v25, %v6062_v46  ;;  %v583_v49 = vsel %vm581_vm4, %v6058_v36, %v6063_v45  ;;  %v587_v50 = vsel %vm581_vm4, %v6063_v45, %v6068_v43 }
  0xab   : > { %5819 = vmatprep.subr.bf16.mxu1 %v6197_v12  ;;  %5816 = vmatprep.subr.bf16.mxu0 %v5815_v17  ;;  %v586_v52 = vsel %vm581_vm4, %v6062_v46, %v6067_v44  ;;  %v5822_v53 = vpack.c.bf16 %v583_v49, %v582_v48  ;;  %v256_v17 = vld [vmem:[%s8471_s1] sm:$0xff]  ;;  %v5824_v0 = vpack.c.bf16 %v585_v2, %v584_v6 }
  0xac   : > { %v5827_v57 = vpack.c.bf16 %v587_v50, %v586_v52 }
  0xad   : > { %5562 = vmatmul.mubr.msk.f32.vlgmr.msra.gmra.mrb[0].mxu0 %vm280_vm5, %v5561_v47  ;;  %6125 = vrot.lane.b32.xlu1 %v6104_v11, %s6201_s17 }
  0xae   : > { %6120 = vrot.lane.b32.xlu0 %v6099_v13, %s6201_s17  ;;  %5705 = vmatmul.mubr.msk.f32.vlgmr.msra.gmra.mrb[0].mxu1 %vm280_vm5, %v5561_v47 }
  0xaf   : > { %5821 = vmatpush3.bf16.msra.mxu1 %v5820_v16  ;;  %5818 = vmatpush1.bf16.msra.mxu0 %v5817_v18  ;;  %v1777_v16 = vld [vmem:[%s8472_s2] sm:$0xff]  ;;  %v5569_v18 = vld [vmem:[%s8471_s1 + $0x18] sm:$0xff] }
  0xb0   : > { %5711 = vmatprep.mubr.msk.f32.mxu1 %vm6200_vm0, %v6198_v15  ;;  %5826 = vmatprep.subr.bf16.mxu1 %v6197_v12 }
  0xb1   : > { %492 = vmatprep.mubr.f32.mxu0 %v6198_v15  ;;  %5823 = vmatprep.subr.bf16.mxu0 %v5822_v53 }
  0xb2   : > { %5712 = vmatmul.mubr.msk.f32.vlgmr.msra.gmra.mrb[2].mxu1 %vm280_vm5, %v256_v17  ;;  %1780 = vperm.xlu0 %6129, %v1777_v16  }
  0xb3   : > { %5828 = vmatpush3.bf16.msra.mxu1 %v5827_v57  ;;  %5718 = vmatprep.mubr.msk.f32.mxu1 %vm6200_vm0, %v6198_v15 }
  0xb4   : > { %5833 = vmatprep.subr.bf16.mxu1 %v6197_v12 }
  0xb5   : > { %5564 = vmatmul.mubr.msk.f32.vlgmr.msra.gmra.mrb[0].mxu0 %vm280_vm5, %v256_v17 }
  0xb6   : > { %5825 = vmatpush1.bf16.msra.mxu0 %v5824_v0  ;;  %5719 = vmatmul.mubr.msk.f32.vlgmr.msra.gmra.mrb[4].mxu1 %vm280_vm5, %v5566_v4 }
  0xb7   : > { %5830 = vmatprep.subr.bf16.mxu0 %v5829_v8  ;;  %5835 = vmatpush3.bf16.msra.mxu1 %v5834_v9 }
  0xb8   : > { %657 = vmatprep.mubr.f32.mxu0 %v6198_v15  ;;  %5725 = vmatprep.mubr.msk.f32.mxu1 %vm6200_vm0, %v6198_v15 }
  0xb9   : > { %5840 = vmatprep.subr.bf16.mxu1 %v6197_v12  ;;  %3424 = vperm.xlu0 %6129, %v3416_v33   ;;  %v5578_v33 = vld [vmem:[%s8471_s1 + $0x30] sm:$0xff] }
  0xba   : > { %5726 = vmatmul.mubr.msk.f32.vlgmr.msra.gmra.mrb[6].mxu1 %vm280_vm5, %v5569_v18 }
  0xbb   : > { %5732 = vmatprep.mubr.msk.f32.mxu1 %vm6200_vm0, %v6198_v15 }
  0xbd   : > { %5567 = vmatmul.mubr.msk.f32.vlgmr.msra.gmra.mrb[0].mxu0 %vm280_vm5, %v5566_v4  ;;  %v5575_v4 = vld [vmem:[%s8471_s1 + $0x28] sm:$0xff] }
  0xbe   : > { %5832 = vmatpush1.bf16.msra.mxu0 %v5831_v32  ;;  %851 = vmatprep.mubr.f32.mxu0 %v6198_v15 }
  0xc5   : > { %5570 = vmatmul.mubr.msk.f32.vlgmr.msra.gmra.mrb[0].mxu0 %vm280_vm5, %v5569_v18 }
  0xc6   : > { %1018 = vmatprep.mubr.f32.mxu0 %v6198_v15 }
 0x10b   : > { %v6076_v34 = vpop.permute.xlu1 %6075  ;;  %v6071_v62 = vpop.permute.xlu0 %6070 }
 0x10c   : > { %v6078_v63 = vunpack.i.h.bf16 %v6076_v34  ;;  %v6077_v1 = vunpack.i.l.bf16 %v6076_v34  ;;  %v6073_v3 = vunpack.i.h.bf16 %v6071_v62  ;;  %v6072_v40 = vunpack.i.l.bf16 %v6071_v62 }
 0x10e   : > { %v943_v41 = vsel %vm271_vm3, %v6072_v40, %v6077_v1  ;;  %v944_v5 = vsel %vm271_vm3, %v6073_v3, %v6078_v63 }
 0x10f   : > { %v6086_v11 = vpop.permute.xlu1 %6085  ;;  %v6081_v13 = vpop.permute.xlu0 %6080  ;;  %v5836_v14 = vpack.c.bf16 %v944_v5, %v943_v41  ;;  %v5581_v41 = vld [vmem:[%s8471_s1 + $0x38] sm:$0xff] }
 0x110   : > { %v6083_v19 = vunpack.i.h.bf16 %v6081_v13  ;;  %v6082_v20 = vunpack.i.l.bf16 %v6081_v13  ;;  %v6088_v25 = vunpack.i.h.bf16 %v6086_v11  ;;  %v6087_v26 = vunpack.i.l.bf16 %v6086_v11 }
 0x111   : > { %5837 = vmatprep.subr.bf16.mxu0 %v5836_v14 }
 0x112   : > { %v948_v21 = vsel %vm271_vm3, %v6078_v63, %v6083_v19  ;;  %v945_v22 = vsel %vm271_vm3, %v6082_v20, %v6072_v40  ;;  %v946_v23 = vsel %vm271_vm3, %v6083_v19, %v6073_v3  ;;  %v947_v24 = vsel %vm271_vm3, %v6077_v1, %v6082_v20 }
 0x113   : > { %v6096_v28 = vpop.permute.xlu1 %6095  ;;  %v6091_v29 = vpop.permute.xlu0 %6090  ;;  %v5838_v30 = vpack.c.bf16 %v946_v23, %v945_v22  ;;  %v5841_v31 = vpack.c.bf16 %v948_v21, %v947_v24  ;;  %v3415_v24 = vld [vmem:[%s8474_s4] sm:$0xff] }
 0x114   : > { %v6098_v35 = vunpack.i.h.bf16 %v6096_v28  ;;  %v6097_v36 = vunpack.i.l.bf16 %v6096_v28  ;;  %v6093_v37 = vunpack.i.h.bf16 %v6091_v29  ;;  %v6092_v38 = vunpack.i.l.bf16 %v6091_v29  ;;  %3419 = vperm.xlu1 %6130, %v3415_v24  }
 0x115   : > { %5839 = vmatpush1.bf16.msra.mxu0 %v5838_v30  ;;  %5842 = vmatpush3.bf16.msra.mxu1 %v5841_v31 }
 0x116   : > { %v1112_v43 = vsel %vm581_vm4, %v6097_v36, %v6087_v26  ;;  %v1113_v44 = vsel %vm581_vm4, %v6098_v35, %v6088_v25  ;;  %v1115_v45 = vsel %vm581_vm4, %v6093_v37, %v6098_v35  ;;  %v1114_v46 = vsel %vm581_vm4, %v6092_v38, %v6097_v36  ;;  %5847 = vmatprep.subr.bf16.mxu1 %v6197_v12 }
 0x117   : > { %v6106_v47 = vpop.permute.xlu1 %6105  ;;  %v6101_v48 = vpop.permute.xlu0 %6100  ;;  %v1110_v49 = vsel %vm581_vm4, %v6087_v26, %v6092_v38  ;;  %v1111_v50 = vsel %vm581_vm4, %v6088_v25, %v6093_v37  ;;  %v5848_v52 = vpack.c.bf16 %v1115_v45, %v1114_v46  ;;  %v5845_v6 = vpack.c.bf16 %v1113_v44, %v1112_v43 }
 0x118   : > { %v6103_v53 = vunpack.i.h.bf16 %v6101_v48  ;;  %v6102_v2 = vunpack.i.l.bf16 %v6101_v48  ;;  %5573 = vmatmul.mubr.msk.f32.vlgmr.msra.gmra.mrb[0].mxu0 %vm280_vm5, %v5572_v42  ;;  %5733 = vmatmul.mubr.msk.f32.vlgmr.msra.gmra.mrb[8].mxu1 %vm280_vm5, %v5572_v42  ;;  %v6108_v17 = vunpack.i.h.bf16 %v6106_v47  ;;  %v6107_v57 = vunpack.i.l.bf16 %v6106_v47 }
 0x119   : > { %v5843_v0 = vpack.c.bf16 %v1111_v50, %v1110_v49  ;;  %5849 = vmatpush3.bf16.msra.mxu1 %v5848_v52  ;;  %5739 = vmatprep.mubr.msk.f32.mxu1 %vm6200_vm0, %v6198_v15 }
 0x11a   : > { %5854 = vmatprep.subr.bf16.mxu1 %v6197_v12  ;;  %1185 = vmatprep.mubr.f32.mxu0 %v6198_v15  ;;  %v1455_v16 = vsel %vm271_vm3, %v6102_v2, %v6107_v57  ;;  %v1456_v18 = vsel %vm271_vm3, %v6103_v53, %v6108_v17 }
 0x11b   : > { %5844 = vmatprep.subr.bf16.mxu0 %v5843_v0  ;;  %v6116_v8 = vpop.permute.xlu1 %6115  ;;  %v6111_v9 = vpop.permute.xlu0 %6110  ;;  %v5857_v63 = vpack.c.bf16 %v1456_v18, %v1455_v16 }
 0x11c   : > { %5846 = vmatpush1.bf16.msra.mxu0 %v5845_v6  ;;  %v6113_v27 = vunpack.i.h.bf16 %v6111_v9  ;;  %v6112_v32 = vunpack.i.l.bf16 %v6111_v9  ;;  %5740 = vmatmul.mubr.msk.f32.vlgmr.msra.gmra.mrb[10].mxu1 %vm280_vm5, %v5575_v4  ;;  %v6118_v54 = vunpack.i.h.bf16 %v6116_v8  ;;  %v6117_v58 = vunpack.i.l.bf16 %v6116_v8  ;;  %v1789_v8 = vld [vmem:[%s8475_s5] sm:$0x7] }
 0x11d   : > { %5851 = vmatprep.subr.bf16.mxu0 %v5850_v7  ;;  %5856 = vmatpush3.bf16.msra.mxu1 %v5855_v10 }
 0x11e   : > { %v1460_v34 = vsel %vm271_vm3, %v6108_v17, %v6113_v27  ;;  %v1459_v62 = vsel %vm271_vm3, %v6107_v57, %v6112_v32  ;;  %5746 = vmatprep.mubr.msk.f32.mxu1 %vm6200_vm0, %v6198_v15  ;;  %5861 = vmatprep.subr.bf16.mxu1 %v6197_v12  ;;  %v1457_v55 = vsel %vm271_vm3, %v6112_v32, %v6102_v2 }
 0x11f   : > { %v6126_v59 = vpop.permute.xlu1 %6125  ;;  %v5862_v60 = vpack.c.bf16 %v1460_v34, %v1459_v62  ;;  %v1458_v56 = vsel %vm271_vm3, %v6113_v27, %v6103_v53  ;;  %v6613_v53 = vshrl.u32 %v269_v39, 7 }
 0x120   : > { %v6128_v7 = vunpack.i.h.bf16 %v6126_v59  ;;  %v6127_v10 = vunpack.i.l.bf16 %v6126_v59  ;;  %v6121_v1 = vpop.permute.xlu0 %6120  ;;  %5576 = vmatmul.mubr.msk.f32.vlgmr.msra.gmra.mrb[0].mxu0 %vm280_vm5, %v5575_v4  ;;  %5747 = vmatmul.mubr.msk.f32.vlgmr.msra.gmra.mrb[12].mxu1 %vm280_vm5, %v5578_v33  ;;  %v5859_v19 = vpack.c.bf16 %v1458_v56, %v1457_v55 }
 0x121   : > { %v6123_v3 = vunpack.i.h.bf16 %v6121_v1  ;;  %v6122_v40 = vunpack.i.l.bf16 %v6121_v1  ;;  %5853 = vmatpush1.bf16.msra.mxu0 %v5852_v61  ;;  %5863 = vmatpush3.bf16.msra.mxu1 %v5862_v60  ;;  %v5584_v61 = vld [vmem:[%s8471_s1 + $0x40] sm:$0xff]  ;;  %v1801_v57 = vsub.s32 2, %v6613_v53  ;;  %v6620_v39 = vsub.s32 0, %v6613_v53 }
 0x122   : > { %v1626_v5 = vsel %vm581_vm4, %v6127_v10, %v6117_v58  ;;  %v1627_v11 = vsel %vm581_vm4, %v6128_v7, %v6118_v54  ;;  %5858 = vmatprep.subr.bf16.mxu0 %v5857_v63  ;;  %5753 = vmatprep.mubr.msk.f32.mxu1 %vm6200_vm0, %v6198_v15  ;;  %v6623_v62 = vsub.s32 1, %v6613_v53 }
 0x123   : > { %5868 = vmatprep.subr.bf16.mxu1 %v6197_v12  ;;  %v5869_v13 = vpack.c.bf16 %v1627_v11, %v1626_v5  ;;  %1363 = vmatprep.mubr.f32.mxu0 %v6198_v15  ;;  %v1622_v12 = vsel %vm581_vm4, %v6122_v40, %v6127_v10  ;;  %v1623_v14 = vsel %vm581_vm4, %v6123_v3, %v6128_v7 }
 0x124   : > { %5754 = vmatmul.mubr.msk.f32.vlgmr.msra.gmra.mrb[14].mxu1 %vm280_vm5, %v5581_v41  ;;  %v5864_v20 = vpack.c.bf16 %v1623_v14, %v1622_v12  ;;  %v1625_v21 = vsel %vm581_vm4, %v6118_v54, %v6123_v3  ;;  %v1624_v22 = vsel %vm581_vm4, %v6117_v58, %v6122_v40  ;;  %v1802_v27 = vrot.slane %v1789_v8, %v1801_v57 }
 0x125   : > { %5870 = vmatpush3.bf16.msra.mxu1 %v5869_v13  ;;  %5760 = vmatprep.mubr.msk.f32.mxu1 %vm6200_vm0, %v6198_v15  ;;  %v5866_v23 = vpack.c.bf16 %v1625_v21, %v1624_v22  ;;  %v1794_v59 = vrot.slane %v1789_v8, %v6620_v39  ;;  %v1798_v1 = vrot.slane %v1789_v8, %v6623_v62  ;;  %v5604_v8 = vld [vmem:[%s8473_s3 + $0x38] sm:$0xff] }
 0x128   : > { %5579 = vmatmul.mubr.msk.f32.vlgmr.msra.gmra.mrb[0].mxu0 %vm280_vm5, %v5578_v33  ;;  %5761 = vmatmul.mubr.msk.f32.vlgmr.msra.gmra.mrb[16].mxu1 %vm280_vm5, %v5584_v61 }
 0x129   : > { %5860 = vmatpush1.bf16.msra.mxu0 %v5859_v19  ;;  %1530 = vmatprep.mubr.f32.mxu0 %v6198_v15 }
 0x12a   : > { %5865 = vmatprep.subr.bf16.mxu0 %v5864_v20  ;;  %1919 = vmatprep.mubr.f32.mxu1 %v6198_v15 }
 0x130   : > { %5582 = vmatmul.mubr.msk.f32.vlgmr.msra.gmra.mrb[0].mxu0 %vm280_vm5, %v5581_v41 }
 0x131   : > { %5867 = vmatpush1.bf16.msra.mxu0 %v5866_v23  ;;  %1697 = vmatprep.mubr.f32.mxu0 %v6198_v15  ;;  %v1781_v4 = vpop.permute.xlu0 %1780 }
 0x138   : > { %5585 = vmatmul.mubr.msk.f32.vlgmr.msra.gmra.mrb[0].mxu0 %vm280_vm5, %v5584_v61  ;;  %v6627_v40 = vpop.permute.xlu0 %3424 }
 0x139   : > { %2247 = vmatprep.mubr.f32.mxu0 %v6198_v15 }
 0x181   : > { %v421_v25 = vpop.f32.mrb[0].mxu1 }
 0x182   : > { %v5706_v26 = vpop.f32.mrb[1].mxu1 }
 0x185   : > { %v565_v28 = vpop.f32.mrb[2].mxu1 }
 0x186   : > { %v566_v29 = vadd.f32 %v565_v28, %v421_v25  ;;  %v5713_v30 = vpop.f32.mrb[3].mxu1 }
 0x189   : > { %v730_v31 = vpop.f32.mrb[4].mxu1 }
 0x18a   : > { %v736_v35 = vadd.f32 %v730_v31, %v566_v29  ;;  %v5720_v36 = vpop.f32.mrb[5].mxu1  ;;  %v5587_v31 = vld [vmem:[%s8473_s3 + $0x10] sm:$0xff] }
 0x18d   : > { %v924_v37 = vpop.f32.mrb[6].mxu1 }
 0x18e   : > { %v930_v38 = vadd.f32 %v924_v37, %v736_v35  ;;  %v5727_v42 = vpop.f32.mrb[7].mxu1 }
 0x193   : > { %v6630_v11 = vpop.permute.xlu1 %3419 }
 0x1eb   : > { %v1091_v43 = vpop.f32.mrb[8].mxu1 }
 0x1ec   : > { %v1097_v44 = vadd.f32 %v1091_v43, %v930_v38  ;;  %v5734_v45 = vpop.f32.mrb[9].mxu1  ;;  %v5588_v43 = vld [vmem:[%s8473_s3 + $0x18] sm:$0xff] }
 0x1ef   : > { %v1258_v46 = vpop.f32.mrb[10].mxu1 }
 0x1f0   : > { %v1264_v47 = vadd.f32 %v1258_v46, %v1097_v44  ;;  %v5741_v48 = vpop.f32.mrb[11].mxu1  ;;  %v5597_v44 = vld [vmem:[%s8473_s3 + $0x20] sm:$0xff] }
 0x1f1   : > { %v1834_v48 = vld [vmem:[%s8473_s3] sm:$0xff] }
 0x1f3   : > { %v1436_v49 = vpop.f32.mrb[12].mxu1 }
 0x1f4   : > { %v1442_v50 = vadd.f32 %v1436_v49, %v1264_v47  ;;  %v5748_v52 = vpop.f32.mrb[13].mxu1 }
 0x1f5   : > { %v5603_v52 = vld [vmem:[%s8473_s3 + $0x30] sm:$0xff] }
 0x1f7   : > { %v1603_v2 = vpop.f32.mrb[14].mxu1 }
 0x1f8   : > { %v1609_v6 = vadd.f32 %v1603_v2, %v1442_v50  ;;  %v5755_v17 = vpop.f32.mrb[15].mxu1  ;;  %v5598_v50 = vld [vmem:[%s8473_s3 + $0x28] sm:$0xff] }
 0x1f9   : > { %v1835_v17 = vld [vmem:[%s8473_s3 + $0x8] sm:$0xff] }
 0x1fb   : > { %v1770_v0 = vpop.f32.mrb[16].mxu1 }
 0x1fc   : > { %v1776_v9 = vadd.f32 %v1770_v0, %v1609_v6  ;;  %v5762_v16 = vpop.f32.mrb[17].mxu1 }
 0x1fe   : > { %v1785_v18 = vadd.f32 %v1781_v4, %v1776_v9  ;;  %v5609_v9 = vld [vmem:[%s8473_s3 + $0x40] sm:$0xff] }
 0x200   : > { %v1788_v32 = vmax.f32 %v1785_v18, 0.0 }
 0x202   : > { %v1808_v33 = vmul.f32 %v1802_v27, %v1788_v32 }
 0x204   : > { %1818 = vrot.lane.b32.xlu0 %v1808_v33, %s6203_s28 }
 0x20b   : > { %v1699_v34 = vpop.f32.mrb[0].mxu0 }
 0x20c   : > { %v1783_v63 = vadd.f32 %v1781_v4, %v1699_v34  ;;  %v1701_v60 = vpop.f32.mrb[1].mxu0 }
 0x20d   : > { %v1784_v54 = vadd.f32 %v1781_v4, %v1701_v60 }
 0x20e   : > { %v1786_v58 = vmax.f32 %v1783_v63, 0.0  ;;  %v5610_v63 = vld [vmem:[%s8473_s3 + $0x48] sm:$0xff] }
 0x20f   : > { %v1787_v10 = vmax.f32 %v1784_v54, 0.0 }
 0x210   : > { %v1806_v7 = vmul.f32 %v1794_v59, %v1786_v58  ;;  %v5615_v59 = vld [vmem:[%s8473_s3 + $0x50] sm:$0xff] }
 0x211   : > { %v1807_v3 = vmul.f32 %v1798_v1, %v1787_v10 }
 0x212   : > { %1814 = vrot.lane.b32.xlu1 %v1806_v7, %s6203_s28 }
 0x216   : > { %1816 = vrot.lane.b32.xlu1 %v1807_v3, %s6203_s28  ;;  %v5616_v3 = vld [vmem:[%s8473_s3 + $0x58] sm:$0xff]  ;;  %s8477_s28 = sand.u32 1, %s6185_s22  }
 0x217   : > { %s5558_s29 = sshll.u32 %s8477_s28, 8  ;;  %s6216_s28 = smov 22  }
 0x218   : > { %s6883_s9 = scalar_lea.vmem [#allocation3], %s5558_s29  ;;  %s6215_s29 = smov 40  }
 0x276   : > { %v1819_v41 = vpop.permute.xlu0 %1818 }
 0x277   : > { %1830 = vst.msk [vmem:[#allocation2 + $0x18] sm:$0xff] %vm1809_vm6, %v1819_v41 }
 0x27e   : > { %v2344_v5 = vld [vmem:[#allocation2 + $0x18] sm:$0xff] }
 0x27f   : > { %2358 = vrot.lane.b32.xlu0 %v2344_v5, %s6195_s14 }
 0x283   : > { %2891 = vrot.lane.b32.xlu0 %v2344_v5, %s6196_s15 }
 0x284   : > { %v1815_v13 = vpop.permute.xlu1 %1814 }
 0x285   : > { %1827 = vst.msk [vmem:[#allocation2] sm:$0xff] %vm1826_vm7, %v1815_v13 }
 0x288   : > { %v1817_v55 = vpop.permute.xlu1 %1816 }
 0x289   : > { %v1820_v56 = vsel %vm1809_vm6, %v1815_v13, %v1817_v55  ;;  %v6636_v61 = vsel %vm1809_vm6, %v1817_v55, %v1819_v41 }
 0x28c   : > { %v1831_v12 = vld [vmem:[#allocation2] sm:$0xff] }
 0x28d   : > { %2165 = vrot.lane.b32.xlu0 %v1831_v12, %s6201_s17  ;;  %1836 = vrot.lane.b32.xlu1 %v1831_v12, %s6199_s16 }
 0x291   : > { %2352 = vrot.lane.b32.xlu1 %v1831_v12, %s6195_s14  ;;  %1838 = vrot.lane.b32.xlu0 %v1820_v56, %s6199_s16 }
 0x295   : > { %2885 = vrot.lane.b32.xlu1 %v1831_v12, %s6196_s15  ;;  %2169 = vrot.lane.b32.xlu0 %v6636_v61, %s6201_s17 }
 0x299   : > { %1840 = vrot.lane.b32.xlu1 %v6636_v61, %s6199_s16  ;;  %2354 = vrot.lane.b32.xlu0 %v1820_v56, %s6195_s14 }
 0x29d   : > { %2167 = vrot.lane.b32.xlu1 %v1820_v56, %s6201_s17  ;;  %2887 = vrot.lane.b32.xlu0 %v1820_v56, %s6196_s15 }
 0x2a1   : > { %2356 = vrot.lane.b32.xlu1 %v6636_v61, %s6195_s14 }
 0x2a5   : > { %2889 = vrot.lane.b32.xlu1 %v6636_v61, %s6196_s15 }
 0x2f1   : > { %v2359_v14 = vpop.permute.xlu0 %2358 }
 0x2f5   : > { %v6654_v19 = vpop.permute.xlu0 %2891 }
 0x2ff   : > { %v2166_v20 = vpop.permute.xlu0 %2165  ;;  %v1837_v21 = vpop.permute.xlu1 %1836 }
 0x303   : > { %v2353_v22 = vpop.permute.xlu1 %2352  ;;  %v1839_v23 = vpop.permute.xlu0 %1838 }
 0x304   : > { %v1843_v35 = vsel %vm271_vm3, %v1837_v21, %v1839_v23 }
 0x307   : > { %v2886_v24 = vpop.permute.xlu1 %2885  ;;  %v2170_v25 = vpop.permute.xlu0 %2169 }
 0x308   : > { %v2173_v2 = vsel %vm581_vm4, %v2170_v25, %v2166_v20 }
 0x30b   : > { %v1841_v26 = vpop.permute.xlu1 %1840  ;;  %v2355_v28 = vpop.permute.xlu0 %2354 }
 0x30c   : > { %v1842_v29 = vsel %vm271_vm3, %v1839_v23, %v1841_v26  ;;  %v2360_v30 = vsel %vm771_vm1, %v2353_v22, %v2355_v28  ;;  %v1844_v36 = vsel %vm271_vm3, %v1841_v26, %v1837_v21  ;;  %v5633_v26 = vld [vmem:[%s8473_s3 + $0x80] sm:$0xff] }
 0x30d   : > { %1855 = vmatprep.subr.mxu1 %v1842_v29  ;;  %2530 = vrot.lane.b32.xlu1 %v2360_v30, %s6199_s16  ;;  %v5634_v29 = vld [vmem:[%s8473_s3 + $0x88] sm:$0xff] }
 0x30e   : > { %1856 = vmatpush1.msra.mxu1 %v1843_v35 }
 0x30f   : > { %5589 = vmatmul.mubr.msk.f32.vlgmr.msra.gmra.mrb[18].mxu1 %vm1848_vm8, %v5587_v31  ;;  %5763 = vmatprep.subr.mxu1 %v1844_v36  ;;  %v2168_v37 = vpop.permute.xlu1 %2167  ;;  %v2888_v49 = vpop.permute.xlu0 %2887 }
 0x310   : > { %5764 = vmatpush3.msra.mxu1 %v1844_v36  ;;  %v2171_v38 = vsel %vm581_vm4, %v2168_v37, %v2170_v25  ;;  %1925 = vmatprep.mubr.f32.mxu1 %v6198_v15  ;;  %v2172_v42 = vsel %vm581_vm4, %v2166_v20, %v2168_v37  ;;  %v6708_v6 = vsel %vm1283_vm2, %v2886_v24, %v2888_v49  ;;  %v5627_v24 = vld [vmem:[%s8473_s3 + $0x70] sm:$0xff]  ;;  %v5628_v25 = vld [vmem:[%s8473_s3 + $0x78] sm:$0xff]  ;;  %v6204_v36 = vmov 1966171168  }
 0x311   : > { %2013 = vmatprep.subr.mxu1 %v1820_v56  ;;  %2183 = vmatprep.subr.mxu0 %v2171_v38  ;;  %v3443_v37 = vunpack.c.l.s4 %v6204_v36 }
 0x312   : > { %2184 = vmatpush1.msra.mxu0 %v2172_v42 }
 0x313   : > { %5590 = vmatmul.mubr.msk.f32.gmra.mrb[20].mxu1 %vm1848_vm8, %v5588_v43  ;;  %v2357_v45 = vpop.permute.xlu1 %2356  ;;  %5599 = vmatmul.mubr.msk.f32.vlgmr.msra.gmra.mrb[2].mxu0 %vm1848_vm8, %v5597_v44  ;;  %v3444_v38 = vunpack.c.0.s8 %v3443_v37 }
 0x314   : > { %v2362_v46 = vsel %vm771_vm1, %v2357_v45, %v2359_v14  ;;  %v2361_v47 = vsel %vm771_vm1, %v2355_v28, %v2357_v45  ;;  %5765 = vmatprep.mubr.msk.f32.mxu1 %vm1848_vm8, %v5587_v31  ;;  %2253 = vmatprep.mubr.f32.mxu0 %v6198_v15  ;;  %v5622_v14 = vld [vmem:[%s8473_s3 + $0x68] sm:$0xff] }
 0x315   : > { %2534 = vrot.lane.b32.xlu1 %v2362_v46, %s6199_s16  ;;  %2532 = vrot.lane.b32.xlu0 %v2361_v47, %s6199_s16 }
 0x316   : > { %2372 = vmatprep.subr.mxu0 %v2361_v47 }
 0x317   : > { %2373 = vmatpush1.msra.mxu0 %v2360_v30  ;;  %5766 = vmatmul.mubr.msk.f32.vlgmr.msra.gmra.mrb[22].mxu1 %vm1848_vm8, %v5588_v43  ;;  %v2890_v57 = vpop.permute.xlu1 %2889  ;;  %v6825_v43 = vsub.s32 %v3444_v38, %v6613_v53 }
 0x318   : > { %2014 = vmatpush1.msra.mxu1 %v1831_v12  ;;  %2077 = vmatprep.mubr.f32.mxu1 %v6198_v15  ;;  %v2895_v0 = vsel %vm1283_vm2, %v2890_v57, %v6654_v19  ;;  %v2894_v4 = vsel %vm1283_vm2, %v2888_v49, %v2890_v57 }
 0x319   : > { %5768 = vmatprep.subr.mxu1 %v6636_v61  ;;  %2708 = vrot.lane.b32.xlu1 %v2361_v47, %s6201_s17 }
 0x31a   : > { %2706 = vrot.lane.b32.xlu0 %v2360_v30, %s6201_s17  ;;  %5600 = vmatmul.mubr.msk.f32.gmra.mrb[4].mxu0 %vm1848_vm8, %v5598_v50 }
 0x31b   : > { %5593 = vmatmul.mubr.msk.f32.vlgmr.msra.gmra.mrb[18].mxu1 %vm1848_vm8, %v1834_v48  ;;  %2436 = vmatprep.mubr.f32.mxu0 %v6198_v15 }
 0x31c   : > { %5769 = vmatpush3.msra.mxu1 %v6636_v61  ;;  %2083 = vmatprep.mubr.f32.mxu1 %v6198_v15  ;;  %v5621_v61 = vld [vmem:[%s8473_s3 + $0x60] sm:$0xff] }
 0x31d   : > { %5773 = vmatprep.subr.mxu1 %v2173_v2  ;;  %3063 = vrot.lane.b32.xlu1 %v6708_v6, %s6199_s16 }
 0x31e   : > { %2710 = vrot.lane.b32.xlu0 %v2362_v46, %s6201_s17  ;;  %5605 = vmatmul.mubr.msk.f32.vlgmr.msra.gmra.mrb[2].mxu0 %vm1848_vm8, %v5603_v52 }
 0x31f   : > { %5594 = vmatmul.mubr.msk.f32.gmra.mrb[20].mxu1 %vm1848_vm8, %v1835_v17  ;;  %2442 = vmatprep.mubr.f32.mxu0 %v6198_v15 }
 0x320   : > { %5770 = vmatprep.mubr.msk.f32.mxu1 %vm1848_vm8, %v1834_v48 }
 0x321   : > { %3067 = vrot.lane.b32.xlu1 %v2895_v0, %s6199_s16 }
 0x322   : > { %3065 = vrot.lane.b32.xlu0 %v2894_v4, %s6199_s16  ;;  %5606 = vmatmul.mubr.msk.f32.gmra.mrb[4].mxu0 %vm1848_vm8, %v5604_v8  ;;  %s6208_s16 = smov 38  }
 0x323   : > { %5771 = vmatmul.mubr.msk.f32.vlgmr.msra.gmra.mrb[22].mxu1 %vm1848_vm8, %v1835_v17  ;;  %2612 = vmatprep.mubr.f32.mxu0 %v6198_v15 }
 0x324   : > { %5774 = vmatpush3.msra.mxu1 %v2173_v2  ;;  %5775 = vmatprep.mubr.msk.f32.mxu1 %vm1848_vm8, %v5597_v44 }
 0x325   : > { %5778 = vmatprep.subr.mxu1 %v2362_v46  ;;  %3241 = vrot.lane.b32.xlu1 %v2894_v4, %s6201_s17 }
 0x326   : > { %3239 = vrot.lane.b32.xlu0 %v6708_v6, %s6201_s17 }
 0x32a   : > { %3243 = vrot.lane.b32.xlu0 %v2895_v0, %s6201_s17  ;;  %s6210_s17 = smov 112  }
 0x32b   : > { %5776 = vmatmul.mubr.msk.f32.vlgmr.msra.gmra.mrb[22].mxu1 %vm1848_vm8, %v5598_v50 }
 0x32c   : > { %5779 = vmatpush3.msra.mxu1 %v2362_v46  ;;  %5780 = vmatprep.mubr.msk.f32.mxu1 %vm1848_vm8, %v5603_v52 }
 0x333   : > { %5781 = vmatmul.mubr.msk.f32.vlgmr.msra.gmra.mrb[22].mxu1 %vm1848_vm8, %v5604_v8 }
 0x334   : > { %5785 = vmatprep.mubr.msk.f32.mxu1 %vm1848_vm8, %v5609_v9 }
 0x37f   : > { %v2531_v16 = vpop.permute.xlu1 %2530 }
 0x387   : > { %v2533_v18 = vpop.permute.xlu0 %2532  ;;  %v2535_v27 = vpop.permute.xlu1 %2534 }
 0x388   : > { %v2536_v32 = vsel %vm271_vm3, %v2533_v18, %v2535_v27  ;;  %v2538_v33 = vsel %vm271_vm3, %v2535_v27, %v2531_v16  ;;  %v2537_v34 = vsel %vm271_vm3, %v2531_v16, %v2533_v18 }
 0x389   : > { %2548 = vmatprep.subr.mxu0 %v2536_v32  ;;  %5783 = vmatprep.subr.mxu1 %v2538_v33 }
 0x38a   : > { %2549 = vmatpush1.msra.mxu0 %v2537_v34  ;;  %5784 = vmatpush3.msra.mxu1 %v2538_v33 }
 0x38b   : > { %5611 = vmatmul.mubr.msk.f32.vlgmr.msra.gmra.mrb[2].mxu0 %vm1848_vm8, %v5609_v9  ;;  %5786 = vmatmul.mubr.msk.f32.vlgmr.msra.gmra.mrb[22].mxu1 %vm1848_vm8, %v5610_v63  ;;  %v2709_v60 = vpop.permute.xlu1 %2708 }
 0x38c   : > { %v2707_v54 = vpop.permute.xlu0 %2706  ;;  %2618 = vmatprep.mubr.f32.mxu0 %v6198_v15  ;;  %5790 = vmatprep.mubr.msk.f32.mxu1 %vm1848_vm8, %v5615_v59 }
 0x38d   : > { %v2713_v41 = vsel %vm581_vm4, %v2707_v54, %v2709_v60 }
 0x38f   : > { %5612 = vmatmul.mubr.msk.f32.gmra.mrb[4].mxu0 %vm1848_vm8, %v5610_v63  ;;  %v3064_v58 = vpop.permute.xlu1 %3063 }
 0x390   : > { %v2711_v7 = vpop.permute.xlu0 %2710  ;;  %2788 = vmatprep.mubr.f32.mxu0 %v6198_v15 }
 0x391   : > { %v2712_v10 = vsel %vm581_vm4, %v2709_v60, %v2711_v7  ;;  %v2714_v1 = vsel %vm581_vm4, %v2711_v7, %v2707_v54 }
 0x392   : > { %2724 = vmatprep.subr.mxu0 %v2712_v10  ;;  %5788 = vmatprep.subr.mxu1 %v2714_v1 }
 0x393   : > { %2725 = vmatpush1.msra.mxu0 %v2713_v41  ;;  %5789 = vmatpush3.msra.mxu1 %v2714_v1  ;;  %v3068_v5 = vpop.permute.xlu1 %3067 }
 0x394   : > { %v3066_v13 = vpop.permute.xlu0 %3065  ;;  %5617 = vmatmul.mubr.msk.f32.vlgmr.msra.gmra.mrb[2].mxu0 %vm1848_vm8, %v5615_v59  ;;  %5791 = vmatmul.mubr.msk.f32.vlgmr.msra.gmra.mrb[22].mxu1 %vm1848_vm8, %v5616_v3  ;;  %v3071_v55 = vsel %vm271_vm3, %v3068_v5, %v3064_v58 }
 0x395   : > { %2905 = vmatprep.subr.mxu0 %v2894_v4  ;;  %5793 = vmatprep.subr.mxu1 %v2895_v0  ;;  %v3069_v56 = vsel %vm271_vm3, %v3066_v13, %v3068_v5  ;;  %v3070_v21 = vsel %vm271_vm3, %v3064_v58, %v3066_v13 }
 0x396   : > { %2906 = vmatpush1.msra.mxu0 %v6708_v6  ;;  %5794 = vmatpush3.msra.mxu1 %v2895_v0 }
 0x397   : > { %3081 = vmatprep.subr.mxu0 %v3069_v56  ;;  %5798 = vmatprep.subr.mxu1 %v3071_v55  ;;  %v3242_v19 = vpop.permute.xlu1 %3241 }
 0x398   : > { %2794 = vmatprep.mubr.f32.mxu0 %v6198_v15  ;;  %v3240_v12 = vpop.permute.xlu0 %3239  ;;  %5795 = vmatprep.mubr.msk.f32.mxu1 %vm1848_vm8, %v5621_v61 }
 0x399   : > { %5618 = vmatmul.mubr.msk.f32.gmra.mrb[4].mxu0 %vm1848_vm8, %v5616_v3  ;;  %v3246_v28 = vsel %vm581_vm4, %v3240_v12, %v3242_v19 }
 0x39a   : > { %2969 = vmatprep.mubr.f32.mxu0 %v6198_v15 }
 0x39c   : > { %v3244_v20 = vpop.permute.xlu0 %3243  ;;  %5796 = vmatmul.mubr.msk.f32.vlgmr.msra.gmra.mrb[22].mxu1 %vm1848_vm8, %v5622_v14 }
 0x39d   : > { %5623 = vmatmul.mubr.msk.f32.vlgmr.msra.gmra.mrb[2].mxu0 %vm1848_vm8, %v5621_v61  ;;  %5799 = vmatpush3.msra.mxu1 %v3071_v55  ;;  %v3245_v22 = vsel %vm581_vm4, %v3242_v19, %v3244_v20  ;;  %v3247_v23 = vsel %vm581_vm4, %v3244_v20, %v3240_v12 }
 0x39e   : > { %3082 = vmatpush1.msra.mxu0 %v3070_v21  ;;  %5803 = vmatprep.subr.mxu1 %v3247_v23 }
 0x39f   : > { %3257 = vmatprep.subr.mxu0 %v3245_v22  ;;  %2975 = vmatprep.mubr.f32.mxu0 %v6198_v15 }
 0x3a0   : > { %5800 = vmatprep.mubr.msk.f32.mxu1 %vm1848_vm8, %v5627_v24 }
 0x3a1   : > { %5624 = vmatmul.mubr.msk.f32.gmra.mrb[4].mxu0 %vm1848_vm8, %v5622_v14 }
 0x3a2   : > { %3145 = vmatprep.mubr.f32.mxu0 %v6198_v15 }
 0x3a4   : > { %5801 = vmatmul.mubr.msk.f32.vlgmr.msra.gmra.mrb[22].mxu1 %vm1848_vm8, %v5628_v25 }
 0x3a5   : > { %5629 = vmatmul.mubr.msk.f32.vlgmr.msra.gmra.mrb[2].mxu0 %vm1848_vm8, %v5627_v24  ;;  %5804 = vmatpush3.msra.mxu1 %v3247_v23 }
 0x3a6   : > { %3258 = vmatpush1.msra.mxu0 %v3246_v28  ;;  %3151 = vmatprep.mubr.f32.mxu0 %v6198_v15 }
 0x3a7   : > { %5805 = vmatprep.mubr.msk.f32.mxu1 %vm1848_vm8, %v5633_v26 }
 0x3a9   : > { %5630 = vmatmul.mubr.msk.f32.gmra.mrb[4].mxu0 %vm1848_vm8, %v5628_v25 }
 0x3aa   : > { %3321 = vmatprep.mubr.f32.mxu0 %v6198_v15 }
 0x3ac   : > { %5806 = vmatmul.mubr.msk.f32.vlgmr.msra.gmra.mrb[22].mxu1 %vm1848_vm8, %v5634_v29 }
 0x3ad   : > { %5635 = vmatmul.mubr.msk.f32.vlgmr.msra.gmra.mrb[2].mxu0 %vm1848_vm8, %v5633_v26 }
 0x3ae   : > { %3327 = vmatprep.mubr.f32.mxu0 %v6198_v15 }
 0x3b1   : > { %5636 = vmatmul.mubr.msk.f32.gmra.mrb[4].mxu0 %vm1848_vm8, %v5634_v29 }
 0x3ee   : > { %v2079_v51 = vpop.f32.mrb[18].mxu1 }
 0x3ef   : > { %v2081_v30 = vpop.f32.mrb[19].mxu1 }
 0x3f2   : > { %v2085_v31 = vpop.f32.mrb[20].mxu1 }
 0x3f3   : > { %v2087_v35 = vpop.f32.mrb[21].mxu1 }
 0x47f   : > { %v5807_v42 = vpop.f32.mrb[22].mxu1 }
 0x480   : > { %v3323_v44 = vpop.f32.mrb[2].mxu0  ;;  %v3432_v45 = vadd.f32 %v5807_v42, %v6627_v40  ;;  %v3400_v46 = vpop.f32.mrb[23].mxu1 }
 0x481   : > { %v5871_v15 = vadd.f32 %v3323_v44, %v2079_v51  ;;  %v3325_v47 = vpop.f32.mrb[3].mxu0  ;;  %v3429_v48 = vadd.f32 %v6630_v11, %v3400_v46 }
 0x482   : > { %v6830_v49 = vmax.f32 %v3432_v45, 0.0  ;;  %v5872_v50 = vadd.f32 %v3325_v47, %v2081_v30 }
 0x483   : > { %v3427_v52 = vadd.f32 %v5871_v15, %v6630_v11  ;;  %v6833_v2 = vmax.f32 %v3429_v48, 0.0 }
 0x484   : > { %v3428_v6 = vadd.f32 %v5872_v50, %v6630_v11  ;;  %v3329_v53 = vpop.f32.mrb[4].mxu0  ;;  %v5308_v17 = vrot.slane %v6830_v49, %v6825_v43  ;;  %v5301_v20 = vcombine.high %v6830_v49, %v6830_v49 }
 0x485   : > { %v6840_v57 = vmax.f32 %v3427_v52, 0.0  ;;  %v5873_v0 = vadd.f32 %v3329_v53, %v2085_v31  ;;  %v3331_v4 = vpop.f32.mrb[5].mxu0  ;;  %v5259_v8 = vrot.slane %v6833_v2, %v6825_v43  ;;  %v5252_v26 = vcombine.high %v6833_v2, %v6833_v2 }
 0x486   : > { %v6844_v9 = vmax.f32 %v3428_v6, 0.0  ;;  %v5874_v16 = vadd.f32 %v3331_v4, %v2087_v35  ;;  %v6847_v18 = vrot.slane %v5308_v17, %v6825_v43  ;;  %v5316_v11 = vcombine.high %v5308_v17, %v5308_v17 }
 0x487   : > { %v3441_v27 = vcombine.high %v6840_v57, %v6840_v57  ;;  %v3448_v32 = vrot.slane %v6840_v57, %v6825_v43  ;;  %v3430_v33 = vadd.f32 %v5873_v0, %v6627_v40  ;;  %v6855_v34 = vrot.slane %v5259_v8, %v6825_v43 }
 0x488   : > { %v6859_v63 = vrot.slane %v6844_v9, %v6825_v43  ;;  %v4911_v59 = vcombine.low %v6844_v9, %v6833_v2  ;;  %v4912_v60 = vcombine.high %v6844_v9, %v6833_v2  ;;  %v3431_v1 = vadd.f32 %v5874_v16, %v6627_v40 }
 0x489   : > { %v3455_v54 = vrot.slane %v3441_v27, %v6825_v43  ;;  %v3456_v58 = vcombine.high %v3448_v32, %v3448_v32  ;;  %v3464_v7 = vrot.slane %v3448_v32, %v6825_v43  ;;  %v6867_v10 = vmax.f32 %v3430_v33, 0.0 }
 0x48a   : > { %v5385_v3 = vrot.slane %v6847_v18, %v6620_v39  ;;  %v6873_v41 = vrot.slane %v5316_v11, %v6825_v43  ;;  %v6891_v12 = vmax.f32 %v3431_v1, 0.0  ;;  %v5267_v21 = vcombine.high %v5259_v8, %v5259_v8 }
 0x48b   : > { %v3457_v5 = vcombine.high %v3455_v54, %v3455_v54  ;;  %v6876_v13 = vrot.slane %v3455_v54, %v6825_v43  ;;  %v6879_v55 = vrot.slane %v3456_v58, %v6825_v43  ;;  %v6881_v56 = vcombine.high %v3464_v7, %v3464_v7  ;;  %3556 = vst.msk [vmem:[%s6883_s9] sm:$0x1] %vm3555_vm9, %v3464_v7 }
 0x48c   : > { %v3490_v40 = vcombine.high %v6867_v10, %v6867_v10  ;;  %v3497_v61 = vrot.slane %v6867_v10, %v6825_v43  ;;  %5430 = vrot.lane.b32.xlu1 %v5385_v3, %s8482_s10  ;;  %v5389_v14 = vrot.slane %v6873_v41, %v6620_v39  ;;  %v5353_v25 = vrot.slane %v6855_v34, %v6620_v39 }
 0x48d   : > { %v6897_v19 = vrot.slane %v3457_v5, %v6825_v43  ;;  %3557 = vst.msk [vmem:[%s6883_s9 + $0x10] sm:$0x1] %vm3555_vm9, %v6879_v55  ;;  %3558 = vst.msk [vmem:[%s6883_s9 + $0x20] sm:$0x1] %vm3555_vm9, %v6881_v56  ;;  %v6924_v28 = vrot.slane %v6891_v12, %v6825_v43  ;;  %v6927_v29 = vrot.slane %v5267_v21, %v6825_v43 }
 0x48e   : > { %3560 = vst.msk [vmem:[%s6883_s9 + $0x40] sm:$0x1] %vm3555_vm9, %v6876_v13  ;;  %v3504_v22 = vrot.slane %v3490_v40, %v6825_v43  ;;  %v3505_v23 = vcombine.high %v3497_v61, %v3497_v61  ;;  %v6912_v24 = vrot.slane %v3497_v61, %v6825_v43  ;;  %5432 = vrot.lane.b32.xlu0 %v5389_v14, %s8482_s10 }
 0x48f   : > { %3561 = vst.msk [vmem:[%s6883_s9 + $0x50] sm:$0x1] %vm3555_vm9, %v6897_v19  ;;  %v5357_v36 = vrot.slane %v6927_v29, %v6620_v39  ;;  %v3575_v37 = vrot.slane %v3464_v7, %v6620_v39  ;;  %v5315_v42 = vrot.slane %v5301_v20, %v6825_v43  ;;  %v6961_v44 = vrot.slane %v6859_v63, %v6825_v43 }
 0x490   : > { %v3506_v51 = vcombine.high %v3504_v22, %v3504_v22  ;;  %v6930_v30 = vrot.slane %v3504_v22, %v6825_v43  ;;  %v6933_v31 = vrot.slane %v3505_v23, %v6825_v43  ;;  %v6937_v35 = vcombine.high %v6912_v24, %v6912_v24  ;;  %3564 = vst.msk [vmem:[%s6883_s9 + $0x80] sm:$0x1] %vm3555_vm9, %v6912_v24 }
 0x491   : > { %5414 = vrot.lane.b32.xlu1 %v5353_v25, %s8482_s10  ;;  %v4022_v45 = vcombine.low %v6840_v57, %v6844_v9  ;;  %v4023_v46 = vcombine.high %v6840_v57, %v6844_v9  ;;  %v4378_v15 = vcombine.high %v6859_v63, %v6859_v63  ;;  %v5266_v47 = vrot.slane %v5252_v26, %v6825_v43 }
 0x492   : > { %v6947_v38 = vrot.slane %v3506_v51, %v6825_v43  ;;  %3565 = vst.msk [vmem:[%s6883_s9 + $0x90] sm:$0x1] %vm3555_vm9, %v6933_v31  ;;  %3566 = vst.msk [vmem:[%s6883_s9 + $0xa0] sm:$0x1] %vm3555_vm9, %v6937_v35  ;;  %5416 = vrot.lane.b32.xlu0 %v5357_v36, %s8482_s10  ;;  %v6976_v48 = vrot.slane %v5315_v42, %v6825_v43  ;;  %v5317_v50 = vcombine.high %v5315_v42, %v5315_v42 }
 0x493   : > { %3568 = vst.msk [vmem:[%s6883_s9 + $0xc0] sm:$0x1] %vm3555_vm9, %v6930_v30  ;;  %v4030_v52 = vrot.slane %v4022_v45, %v6825_v43  ;;  %v3579_v6 = vrot.slane %v6879_v55, %v6620_v39  ;;  %v4037_v53 = vrot.slane %v4023_v46, %v6825_v43  ;;  %v6983_v17 = vrot.slane %v4378_v15, %v6825_v43 }
 0x494   : > { %3569 = vst.msk [vmem:[%s6883_s9 + $0xd0] sm:$0x1] %vm3555_vm9, %v6947_v38  ;;  %v6986_v57 = vrot.slane %v5317_v50, %v6825_v43  ;;  %v5268_v8 = vcombine.high %v5266_v47, %v5266_v47  ;;  %v6997_v16 = vrot.slane %v5266_v47, %v6825_v43  ;;  %v4919_v11 = vrot.slane %v4911_v59, %v6825_v43 }
 0x495   : > { %3636 = vrot.lane.b32.xlu1 %v3575_v37, %s6195_s14  ;;  %v6989_v0 = vrot.slane %v4030_v52, %v6825_v43  ;;  %v6993_v4 = vrot.slane %v4037_v53, %v6825_v43  ;;  %v4363_v27 = vcombine.high %v6844_v9, %v6844_v9  ;;  %v4038_v32 = vcombine.high %v4030_v52, %v4030_v52 }
 0x496   : > { %3638 = vrot.lane.b32.xlu0 %v3579_v6, %s6195_s14  ;;  %v4926_v33 = vrot.slane %v4912_v60, %v6825_v43  ;;  %v4039_v63 = vcombine.high %v4037_v53, %v4037_v53  ;;  %v7011_v54 = vrot.slane %v4919_v11, %v6825_v43  ;;  %v7014_v58 = vrot.slane %v5268_v8, %v6825_v43 }
 0x497   : > { %v7018_v59 = vcombine.high %v6879_v55, %v6879_v55  ;;  %v4377_v2 = vrot.slane %v4363_v27, %v6825_v43  ;;  %v7029_v9 = vrot.slane %v4038_v32, %v6825_v43  ;;  %v4927_v60 = vcombine.high %v4919_v11, %v4919_v11 }
 0x498   : > { %v7022_v7 = vrot.slane %v4926_v33, %v6825_v43  ;;  %v7033_v1 = vrot.slane %v4039_v63, %v6825_v43  ;;  %v4928_v3 = vcombine.high %v4926_v33, %v4926_v33  ;;  %v7045_v61 = vcombine.high %v6876_v13, %v6876_v13 }
 0x499   : > { %3700 = vrot.lane.b32.xlu1 %v3575_v37, %s6196_s15  ;;  %3559 = vst.msk [vmem:[%s6883_s9 + $0x30] sm:$0x1] %vm3555_vm9, %v7018_v59  ;;  %v7037_v5 = vrot.slane %v4377_v2, %v6825_v43  ;;  %v4379_v55 = vcombine.high %v4377_v2, %v4377_v2  ;;  %v7048_v14 = vrot.slane %v4927_v60, %v6825_v43 }
 0x49a   : > { %3702 = vrot.lane.b32.xlu0 %v3579_v6, %s6196_s15  ;;  %v7052_v20 = vrot.slane %v4928_v3, %v6825_v43  ;;  %3562 = vst.msk [vmem:[%s6883_s9 + $0x60] sm:$0x1] %vm3555_vm9, %v7045_v61  ;;  %v7059_v21 = vcombine.high %v6897_v19, %v6897_v19  ;;  %v5346_v22 = vcombine.high %v6847_v18, %v6847_v18 }
 0x49b   : > { %v7040_v40 = vrot.slane %v4379_v55, %v6825_v43  ;;  %v7070_v23 = vrot.slane %v6924_v28, %v6825_v43  ;;  %v5348_v25 = vcombine.high %v6873_v41, %v6873_v41  ;;  %v4072_v26 = vcombine.low %v6867_v10, %v6891_v12 }
 0x49c   : > { %3563 = vst.msk [vmem:[%s6883_s9 + $0x70] sm:$0x1] %vm3555_vm9, %v7059_v21  ;;  %v4073_v18 = vcombine.high %v6867_v10, %v6891_v12  ;;  %v5393_v51 = vrot.slane %v5346_v22, %v6620_v39  ;;  %v4427_v36 = vcombine.high %v6924_v28, %v6924_v28  ;;  %v5401_v28 = vrot.slane %v6976_v48, %v6620_v39 }
 0x49d   : > { %3764 = vrot.lane.b32.xlu1 %v3575_v37, %s6206_s11  ;;  %v5397_v45 = vrot.slane %v5348_v25, %v6620_v39  ;;  %v4412_v15 = vcombine.high %v6891_v12, %v6891_v12  ;;  %v4961_v47 = vcombine.low %v6891_v12, %v6830_v49  ;;  %v4962_v50 = vcombine.high %v6891_v12, %v6830_v49 }
 0x49e   : > { %3766 = vrot.lane.b32.xlu0 %v3579_v6, %s6206_s11  ;;  %v4087_v42 = vrot.slane %v4073_v18, %v6825_v43  ;;  %v7086_v41 = vrot.slane %v4427_v36, %v6825_v43  ;;  %v7107_v52 = vcombine.high %v6933_v31, %v6933_v31  ;;  %v4464_v8 = vrot.slane %v6961_v44, %v6620_v39 }
 0x49f   : > { %v4969_v53 = vrot.slane %v4961_v47, %v6825_v43  ;;  %v4976_v11 = vrot.slane %v4962_v50, %v6825_v43  ;;  %v4426_v12 = vrot.slane %v4412_v15, %v6825_v43  ;;  %v4129_v63 = vrot.slane %v6989_v0, %v6623_v62 }
 0x4a0   : > { %v7093_v46 = vrot.slane %v4087_v42, %v6825_v43  ;;  %3567 = vst.msk [vmem:[%s6883_s9 + $0xb0] sm:$0x1] %vm3555_vm9, %v7107_v52  ;;  %v4089_v33 = vcombine.high %v4087_v42, %v4087_v42  ;;  %v4161_v22 = vrot.slane %v6993_v4, %v6623_v62  ;;  %v4468_v42 = vrot.slane %v6983_v17, %v6620_v39 }
 0x4a1   : > { %3828 = vrot.lane.b32.xlu1 %v3575_v37, %s6207_s12  ;;  %v7120_v49 = vrot.slane %v4969_v53, %v6825_v43  ;;  %v7125_v32 = vrot.slane %v4976_v11, %v6825_v43  ;;  %v7130_v2 = vrot.slane %v4426_v12, %v6825_v43  ;;  %v4428_v55 = vcombine.high %v4426_v12, %v4426_v12 }
 0x4a2   : > { %3830 = vrot.lane.b32.xlu0 %v3579_v6, %s6207_s12  ;;  %v7136_v3 = vrot.slane %v4089_v33, %v6825_v43  ;;  %v4977_v18 = vcombine.high %v4969_v53, %v4969_v53  ;;  %v5369_v15 = vrot.slane %v6997_v16, %v6620_v39  ;;  %v5018_v47 = vrot.slane %v7011_v54, %v6623_v62 }
 0x4a3   : > { %v7143_v25 = vrot.slane %v4428_v55, %v6825_v43  ;;  %v3591_v50 = vrot.slane %v6876_v13, %v6620_v39  ;;  %v5373_v13 = vrot.slane %v7014_v58, %v6620_v39  ;;  %v4125_v12 = vrot.slane %v6989_v0, %v6620_v39 }
 0x4a4   : > { %v7155_v36 = vrot.slane %v4977_v18, %v6825_v43  ;;  %v4408_v55 = vcombine.high %v6961_v44, %v6961_v44 }
 0x4a5   : > { %3892 = vrot.lane.b32.xlu1 %v3575_v37, %s6208_s16 }
 0x4a6   : > { %3894 = vrot.lane.b32.xlu0 %v3579_v6, %s6208_s16 }
 0x4a9   : > { %3956 = vrot.lane.b32.xlu1 %v3575_v37, %s8480_s13  ;;  %v4080_v37 = vrot.slane %v4072_v26, %v6825_v43  ;;  %v7147_v26 = vcombine.high %v6930_v30, %v6930_v30 }
 0x4aa   : > { %3958 = vrot.lane.b32.xlu0 %v3579_v6, %s8480_s13  ;;  %v5405_v6 = vrot.slane %v6986_v57, %v6620_v39 }
 0x4ab   : > { %v7090_v10 = vrot.slane %v4080_v37, %v6825_v43  ;;  %v4088_v27 = vcombine.high %v4080_v37, %v4080_v37  ;;  %3570 = vst.msk [vmem:[%s6883_s9 + $0xe0] sm:$0x1] %vm3555_vm9, %v7147_v26 }
 0x4ad   : > { %5434 = vrot.lane.b32.xlu1 %v5393_v51, %s8482_s10  ;;  %v7133_v60 = vrot.slane %v4088_v27, %v6825_v43  ;;  %v4978_v51 = vcombine.high %v4976_v11, %v4976_v11 }
 0x4ae   : > { %5436 = vrot.lane.b32.xlu0 %v5397_v45, %s8482_s10  ;;  %v7164_v45 = vcombine.high %v6947_v38, %v6947_v38 }
 0x4af   : > { %v7158_v37 = vrot.slane %v4978_v51, %v6825_v43  ;;  %v5297_v43 = vcombine.high %v6855_v34, %v6855_v34  ;;  %v3583_v34 = vrot.slane %v6881_v56, %v6620_v39  ;;  %v5050_v56 = vrot.slane %v7022_v7, %v6623_v62 }
 0x4b0   : > { %3571 = vst.msk [vmem:[%s6883_s9 + $0xf0] sm:$0x1] %vm3555_vm9, %v7164_v45  ;;  %v7248_v51 = vrot.slane %v4408_v55, %v6620_v39  ;;  %v7334_v55 = vrot.slane %v7040_v40, %v6620_v39 }
 0x4b1   : > { %5438 = vrot.lane.b32.xlu1 %v5401_v28, %s8482_s10  ;;  %v5361_v28 = vrot.slane %v5297_v43, %v6620_v39  ;;  %v7259_v43 = vrot.slane %v7037_v5, %v6620_v39 }
 0x4b2   : > { %5440 = vrot.lane.b32.xlu0 %v5405_v6, %s8482_s10  ;;  %v5299_v6 = vcombine.high %v6927_v29, %v6927_v29  ;;  %v3587_v29 = vrot.slane %v7018_v59, %v6620_v39 }
 0x4b4   : > { %v5365_v53 = vrot.slane %v5299_v6, %v6620_v39 }
 0x4b5   : > { %4525 = vrot.lane.b32.xlu1 %v4464_v8, %s6210_s17 }
 0x4b6   : > { %4252 = vrot.lane.b32.xlu0 %v4129_v63, %s6211_s18  ;;  %v4157_v63 = vrot.slane %v6993_v4, %v6620_v39 }
 0x4b9   : > { %4589 = vrot.lane.b32.xlu1 %v4464_v8, %s6212_s19 }
 0x4ba   : > { %4268 = vrot.lane.b32.xlu0 %v4161_v22, %s6211_s18 }
 0x4bd   : > { %4653 = vrot.lane.b32.xlu1 %v4464_v8, %s6213_s20 }
 0x4be   : > { %4527 = vrot.lane.b32.xlu0 %v4468_v42, %s6210_s17 }
 0x4c1   : > { %4717 = vrot.lane.b32.xlu1 %v4464_v8, %s8478_s26 }
 0x4c2   : > { %4591 = vrot.lane.b32.xlu0 %v4468_v42, %s6212_s19 }
 0x4c5   : > { %4781 = vrot.lane.b32.xlu1 %v4464_v8, %s6215_s29 }
 0x4c6   : > { %4655 = vrot.lane.b32.xlu0 %v4468_v42, %s6213_s20 }
 0x4c9   : > { %4845 = vrot.lane.b32.xlu1 %v4464_v8, %s6216_s28  ;;  %v3595_v8 = vrot.slane %v6897_v19, %v6620_v39 }
 0x4ca   : > { %4719 = vrot.lane.b32.xlu0 %v4468_v42, %s8478_s26  ;;  %s6217_s26 = smov 4  }
 0x4cd   : > { %5418 = vrot.lane.b32.xlu1 %v5361_v28, %s8482_s10 }
 0x4ce   : > { %4783 = vrot.lane.b32.xlu0 %v4468_v42, %s6215_s29 }
 0x4d1   : > { %5422 = vrot.lane.b32.xlu1 %v5369_v15, %s8482_s10 }
 0x4d2   : > { %4847 = vrot.lane.b32.xlu0 %v4468_v42, %s6216_s28 }
 0x4d5   : > { %3640 = vrot.lane.b32.xlu1 %v3583_v34, %s6195_s14 }
 0x4d6   : > { %5141 = vrot.lane.b32.xlu0 %v5018_v47, %s6217_s26  ;;  %v4137_v47 = vrot.slane %v7029_v9, %v6623_v62 }
 0x4d9   : > { %3644 = vrot.lane.b32.xlu1 %v3591_v50, %s6195_s14 }
 0x4da   : > { %5157 = vrot.lane.b32.xlu0 %v5050_v56, %s6217_s26 }
 0x4dd   : > { %3704 = vrot.lane.b32.xlu1 %v3583_v34, %s6196_s15 }
 0x4de   : > { %5420 = vrot.lane.b32.xlu0 %v5365_v53, %s8482_s10 }
 0x4e1   : > { %3708 = vrot.lane.b32.xlu1 %v3591_v50, %s6196_s15 }
 0x4e2   : > { %5424 = vrot.lane.b32.xlu0 %v5373_v13, %s8482_s10 }
 0x4e5   : > { %3768 = vrot.lane.b32.xlu1 %v3583_v34, %s6206_s11 }
 0x4e6   : > { %3642 = vrot.lane.b32.xlu0 %v3587_v29, %s6195_s14 }
 0x4e9   : > { %3772 = vrot.lane.b32.xlu1 %v3591_v50, %s6206_s11 }
 0x4ea   : > { %3646 = vrot.lane.b32.xlu0 %v3595_v8, %s6195_s14 }
 0x4ed   : > { %3832 = vrot.lane.b32.xlu1 %v3583_v34, %s6207_s12 }
 0x4ee   : > { %3706 = vrot.lane.b32.xlu0 %v3587_v29, %s6196_s15 }
 0x4f1   : > { %3836 = vrot.lane.b32.xlu1 %v3591_v50, %s6207_s12 }
 0x4f2   : > { %3710 = vrot.lane.b32.xlu0 %v3595_v8, %s6196_s15 }
 0x4f5   : > { %3896 = vrot.lane.b32.xlu1 %v3583_v34, %s6208_s16 }
 0x4f6   : > { %3770 = vrot.lane.b32.xlu0 %v3587_v29, %s6206_s11 }
 0x4f9   : > { %3900 = vrot.lane.b32.xlu1 %v3591_v50, %s6208_s16 }
 0x4fa   : > { %3774 = vrot.lane.b32.xlu0 %v3595_v8, %s6206_s11 }
 0x4fd   : > { %3960 = vrot.lane.b32.xlu1 %v3583_v34, %s8480_s13 }
 0x4fe   : > { %v5431_v19 = vpop.permute.xlu1 %5430  ;;  %3834 = vrot.lane.b32.xlu0 %v3587_v29, %s6207_s12 }
 0x4ff   : > { %5470 = vst.msk [vmem:[%s6883_s9 + $0x8f] sm:$0x1] %vm3555_vm9, %v5431_v19 }
 0x500   : > { %v5433_v59 = vpop.permute.xlu0 %5432 }
 0x501   : > { %3964 = vrot.lane.b32.xlu1 %v3591_v50, %s8480_s13  ;;  %5471 = vst.msk [vmem:[%s6883_s9 + $0x9f] sm:$0x1] %vm3555_vm9, %v5433_v59  ;;  %v7277_v50 = vcombine.high %v6989_v0, %v6989_v0 }
 0x502   : > { %3838 = vrot.lane.b32.xlu0 %v3595_v8, %s6207_s12 }
 0x503   : > { %v5415_v11 = vpop.permute.xlu1 %5414  ;;  %v4145_v53 = vrot.slane %v7277_v50, %v6623_v62 }
 0x504   : > { %5462 = vst.msk [vmem:[%s6883_s9 + $0xf] sm:$0x1] %vm3555_vm9, %v5415_v11  ;;  %v5417_v27 = vpop.permute.xlu0 %5416 }
 0x505   : > { %4250 = vrot.lane.b32.xlu1 %v4125_v12, %s6211_s18  ;;  %5463 = vst.msk [vmem:[%s6883_s9 + $0x1f] sm:$0x1] %vm3555_vm9, %v5417_v27 }
 0x506   : > { %3898 = vrot.lane.b32.xlu0 %v3587_v29, %s6208_s16 }
 0x507   : > { %v3637_v33 = vpop.permute.xlu1 %3636 }
 0x508   : > { %3684 = vst.msk [vmem:[%s6883_s9 + $0x1] sm:$0x1] %vm3555_vm9, %v3637_v33  ;;  %v3639_v22 = vpop.permute.xlu0 %3638 }
 0x509   : > { %4266 = vrot.lane.b32.xlu1 %v4157_v63, %s6211_s18  ;;  %3685 = vst.msk [vmem:[%s6883_s9 + $0x11] sm:$0x1] %vm3555_vm9, %v3639_v22 }
 0x50a   : > { %3902 = vrot.lane.b32.xlu0 %v3595_v8, %s6208_s16 }
 0x50b   : > { %v3701_v18 = vpop.permute.xlu1 %3700 }
 0x50c   : > { %3748 = vst.msk [vmem:[%s6883_s9 + $0x2] sm:$0x1] %vm3555_vm9, %v3701_v18  ;;  %v3703_v44 = vpop.permute.xlu0 %3702 }
 0x50d   : > { %4529 = vrot.lane.b32.xlu1 %v7248_v51, %s6210_s17  ;;  %3749 = vst.msk [vmem:[%s6883_s9 + $0x12] sm:$0x1] %vm3555_vm9, %v3703_v44 }
 0x50e   : > { %3962 = vrot.lane.b32.xlu0 %v3587_v29, %s8480_s13  ;;  %v4169_v29 = vrot.slane %v7033_v1, %v6623_v62 }
 0x50f   : > { %v3765_v42 = vpop.permute.xlu1 %3764 }
 0x510   : > { %3812 = vst.msk [vmem:[%s6883_s9 + $0x3] sm:$0x1] %vm3555_vm9, %v3765_v42  ;;  %v3767_v28 = vpop.permute.xlu0 %3766 }
 0x511   : > { %4533 = vrot.lane.b32.xlu1 %v7259_v43, %s6210_s17  ;;  %3813 = vst.msk [vmem:[%s6883_s9 + $0x13] sm:$0x1] %vm3555_vm9, %v3767_v28 }
 0x512   : > { %3966 = vrot.lane.b32.xlu0 %v3595_v8, %s8480_s13  ;;  %v7299_v8 = vcombine.high %v6993_v4, %v6993_v4  ;;  %v4410_v4 = vcombine.high %v6983_v17, %v6983_v17  ;;  %s8486_s13 = smov 58  }
 0x513   : > { %v3829_v15 = vpop.permute.xlu1 %3828 }
 0x514   : > { %3876 = vst.msk [vmem:[%s6883_s9 + $0x4] sm:$0x1] %vm3555_vm9, %v3829_v15  ;;  %v3831_v34 = vpop.permute.xlu0 %3830  ;;  %v4177_v11 = vrot.slane %v7299_v8, %v6623_v62  ;;  %v7320_v33 = vrot.slane %v4410_v4, %v6620_v39 }
 0x515   : > { %4593 = vrot.lane.b32.xlu1 %v7248_v51, %s6212_s19  ;;  %3877 = vst.msk [vmem:[%s6883_s9 + $0x14] sm:$0x1] %vm3555_vm9, %v3831_v34 }
 0x516   : > { %4256 = vrot.lane.b32.xlu0 %v4137_v47, %s6211_s18 }
 0x517   : > { %v3893_v6 = vpop.permute.xlu1 %3892 }
 0x518   : > { %3940 = vst.msk [vmem:[%s6883_s9 + $0x5] sm:$0x1] %vm3555_vm9, %v3893_v6  ;;  %v3895_v56 = vpop.permute.xlu0 %3894 }
 0x519   : > { %4597 = vrot.lane.b32.xlu1 %v7259_v43, %s6212_s19  ;;  %3941 = vst.msk [vmem:[%s6883_s9 + $0x15] sm:$0x1] %vm3555_vm9, %v3895_v56 }
 0x51a   : > { %4260 = vrot.lane.b32.xlu0 %v4145_v53, %s6211_s18 }
 0x51b   : > { %v3957_v0 = vpop.permute.xlu1 %3956 }
 0x51c   : > { %4004 = vst.msk [vmem:[%s6883_s9 + $0x6] sm:$0x1] %vm3555_vm9, %v3957_v0  ;;  %v3959_v13 = vpop.permute.xlu0 %3958  ;;  %v5046_v0 = vrot.slane %v7022_v7, %v6620_v39 }
 0x51d   : > { %4657 = vrot.lane.b32.xlu1 %v7248_v51, %s6213_s20  ;;  %4005 = vst.msk [vmem:[%s6883_s9 + $0x16] sm:$0x1] %vm3555_vm9, %v3959_v13 }
 0x51e   : > { %4272 = vrot.lane.b32.xlu0 %v4169_v29, %s6211_s18 }
 0x51f   : > { %v5435_v19 = vpop.permute.xlu1 %5434 }
 0x520   : > { %5472 = vst.msk [vmem:[%s6883_s9 + $0xaf] sm:$0x1] %vm3555_vm9, %v5435_v19  ;;  %v5437_v59 = vpop.permute.xlu0 %5436 }
 0x521   : > { %4661 = vrot.lane.b32.xlu1 %v7259_v43, %s6213_s20  ;;  %5473 = vst.msk [vmem:[%s6883_s9 + $0xbf] sm:$0x1] %vm3555_vm9, %v5437_v59 }
 0x522   : > { %4276 = vrot.lane.b32.xlu0 %v4177_v11, %s6211_s18  ;;  %v7398_v11 = vrot.slane %v7045_v61, %v6620_v39 }
 0x523   : > { %v5439_v12 = vpop.permute.xlu1 %5438 }
 0x524   : > { %5474 = vst.msk [vmem:[%s6883_s9 + $0xcf] sm:$0x1] %vm3555_vm9, %v5439_v12  ;;  %v5441_v27 = vpop.permute.xlu0 %5440 }
 0x525   : > { %4721 = vrot.lane.b32.xlu1 %v7248_v51, %s8486_s13  ;;  %5475 = vst.msk [vmem:[%s6883_s9 + $0xdf] sm:$0x1] %vm3555_vm9, %v5441_v27  ;;  %v7410_v27 = vrot.slane %v6912_v24, %v6620_v39 }
 0x526   : > { %4531 = vrot.lane.b32.xlu0 %v7320_v33, %s6210_s17 }
 0x527   : > { %v4526_v63 = vpop.permute.xlu1 %4525 }
 0x528   : > { %4573 = vst.msk [vmem:[%s6883_s9 + $0x8] sm:$0x1] %vm3555_vm9, %v4526_v63  ;;  %v7330_v17 = vpop.permute.xlu0 %4252 }
 0x529   : > { %4725 = vrot.lane.b32.xlu1 %v7259_v43, %s8486_s13 }
 0x52a   : > { %4535 = vrot.lane.b32.xlu0 %v7334_v55, %s6210_s17 }
 0x52b   : > { %v4590_v22 = vpop.permute.xlu1 %4589 }
 0x52c   : > { %4637 = vst.msk [vmem:[%s6883_s9 + $0x9] sm:$0x1] %vm3555_vm9, %v4590_v22  ;;  %v7342_v18 = vpop.permute.xlu0 %4268 }
 0x52d   : > { %4785 = vrot.lane.b32.xlu1 %v7248_v51, %s6215_s29 }
 0x52e   : > { %4595 = vrot.lane.b32.xlu0 %v7320_v33, %s6212_s19 }
 0x52f   : > { %v4654_v44 = vpop.permute.xlu1 %4653 }
 0x530   : > { %4701 = vst.msk [vmem:[%s6883_s9 + $0xa] sm:$0x1] %vm3555_vm9, %v4654_v44  ;;  %v4528_v42 = vpop.permute.xlu0 %4527  ;;  %v5026_v44 = vrot.slane %v7048_v14, %v6623_v62 }
 0x531   : > { %4789 = vrot.lane.b32.xlu1 %v7259_v43, %s6215_s29  ;;  %4574 = vst.msk [vmem:[%s6883_s9 + $0x18] sm:$0x1] %vm3555_vm9, %v4528_v42  ;;  %v7438_v42 = vcombine.high %v7011_v54, %v7011_v54 }
 0x532   : > { %4599 = vrot.lane.b32.xlu0 %v7334_v55, %s6212_s19 }
 0x533   : > { %v4718_v28 = vpop.permute.xlu1 %4717 }
 0x534   : > { %4765 = vst.msk [vmem:[%s6883_s9 + $0xb] sm:$0x1] %vm3555_vm9, %v4718_v28  ;;  %v4592_v15 = vpop.permute.xlu0 %4591 }
 0x535   : > { %4849 = vrot.lane.b32.xlu1 %v7248_v51, %s6216_s28  ;;  %4638 = vst.msk [vmem:[%s6883_s9 + $0x19] sm:$0x1] %vm3555_vm9, %v4592_v15  ;;  %v5014_v51 = vrot.slane %v7011_v54, %v6620_v39  ;;  %v5034_v15 = vrot.slane %v7438_v42, %v6623_v62 }
 0x536   : > { %4659 = vrot.lane.b32.xlu0 %v7320_v33, %s6213_s20 }
 0x537   : > { %v4782_v34 = vpop.permute.xlu1 %4781 }
 0x538   : > { %4829 = vst.msk [vmem:[%s6883_s9 + $0xc] sm:$0x1] %vm3555_vm9, %v4782_v34  ;;  %v4656_v47 = vpop.permute.xlu0 %4655 }
 0x539   : > { %4853 = vrot.lane.b32.xlu1 %v7259_v43, %s6216_s28  ;;  %4702 = vst.msk [vmem:[%s6883_s9 + $0x1a] sm:$0x1] %vm3555_vm9, %v4656_v47  ;;  %v5298_v43 = vcombine.high %v6997_v16, %v6997_v16  ;;  %v5058_v47 = vrot.slane %v7052_v20, %v6623_v62 }
 0x53a   : > { %4663 = vrot.lane.b32.xlu0 %v7334_v55, %s6213_s20 }
 0x53b   : > { %v4846_v6 = vpop.permute.xlu1 %4845  ;;  %v5377_v16 = vrot.slane %v5298_v43, %v6620_v39 }
 0x53c   : > { %4893 = vst.msk [vmem:[%s6883_s9 + $0xd] sm:$0x1] %vm3555_vm9, %v4846_v6  ;;  %v4720_v56 = vpop.permute.xlu0 %4719  ;;  %v7460_v6 = vcombine.high %v7022_v7, %v7022_v7  ;;  %v5300_v7 = vcombine.high %v7014_v58, %v7014_v58 }
 0x53d   : > { %5139 = vrot.lane.b32.xlu1 %v5014_v51, %s6217_s26  ;;  %4766 = vst.msk [vmem:[%s6883_s9 + $0x1b] sm:$0x1] %vm3555_vm9, %v4720_v56 }
 0x53e   : > { %4723 = vrot.lane.b32.xlu0 %v7320_v33, %s8486_s13  ;;  %v5066_v43 = vrot.slane %v7460_v6, %v6623_v62 }
 0x53f   : > { %v5419_v53 = vpop.permute.xlu1 %5418 }
 0x540   : > { %5464 = vst.msk [vmem:[%s6883_s9 + $0x2f] sm:$0x1] %vm3555_vm9, %v5419_v53  ;;  %v4784_v13 = vpop.permute.xlu0 %4783 }
 0x541   : > { %5155 = vrot.lane.b32.xlu1 %v5046_v0, %s6217_s26  ;;  %4830 = vst.msk [vmem:[%s6883_s9 + $0x1c] sm:$0x1] %vm3555_vm9, %v4784_v13  ;;  %v5381_v13 = vrot.slane %v5300_v7, %v6620_v39  ;;  %v7577_v7 = vrot.slane %v7070_v23, %v6620_v39 }
 0x542   : > { %4727 = vrot.lane.b32.xlu0 %v7334_v55, %s8486_s13 }
 0x543   : > { %v5423_v29 = vpop.permute.xlu1 %5422 }
 0x544   : > { %5466 = vst.msk [vmem:[%s6883_s9 + $0x4f] sm:$0x1] %vm3555_vm9, %v5423_v29  ;;  %v4848_v19 = vpop.permute.xlu0 %4847 }
 0x545   : > { %5426 = vrot.lane.b32.xlu1 %v5377_v16, %s8482_s10  ;;  %4894 = vst.msk [vmem:[%s6883_s9 + $0x1d] sm:$0x1] %vm3555_vm9, %v4848_v19  ;;  %v7490_v16 = vrot.slane %v7059_v21, %v6620_v39 }
 0x546   : > { %4787 = vrot.lane.b32.xlu0 %v7320_v33, %s6215_s29 }
 0x547   : > { %v3641_v59 = vpop.permute.xlu1 %3640 }
 0x548   : > { %3686 = vst.msk [vmem:[%s6883_s9 + $0x21] sm:$0x1] %vm3555_vm9, %v3641_v59  ;;  %v7406_v4 = vpop.permute.xlu0 %5141 }
 0x549   : > { %3648 = vrot.lane.b32.xlu1 %v7398_v11, %s6195_s14 }
 0x54a   : > { %4791 = vrot.lane.b32.xlu0 %v7334_v55, %s6215_s29 }
 0x54b   : > { %v3645_v12 = vpop.permute.xlu1 %3644 }
 0x54c   : > { %3688 = vst.msk [vmem:[%s6883_s9 + $0x41] sm:$0x1] %vm3555_vm9, %v3645_v12  ;;  %v7418_v61 = vpop.permute.xlu0 %5157  ;;  %v7502_v12 = vrot.slane %v6933_v31, %v6620_v39 }
 0x54d   : > { %3652 = vrot.lane.b32.xlu1 %v7410_v27, %s6195_s14 }
 0x54e   : > { %4851 = vrot.lane.b32.xlu0 %v7320_v33, %s6216_s28 }
 0x54f   : > { %v3705_v63 = vpop.permute.xlu1 %3704 }
 0x550   : > { %3750 = vst.msk [vmem:[%s6883_s9 + $0x22] sm:$0x1] %vm3555_vm9, %v3705_v63  ;;  %v5421_v24 = vpop.permute.xlu0 %5420 }
 0x551   : > { %3712 = vrot.lane.b32.xlu1 %v7398_v11, %s6196_s15  ;;  %5465 = vst.msk [vmem:[%s6883_s9 + $0x3f] sm:$0x1] %vm3555_vm9, %v5421_v24 }
 0x552   : > { %4855 = vrot.lane.b32.xlu0 %v7334_v55, %s6216_s28 }
 0x553   : > { %v3709_v22 = vpop.permute.xlu1 %3708 }
 0x554   : > { %3752 = vst.msk [vmem:[%s6883_s9 + $0x42] sm:$0x1] %vm3555_vm9, %v3709_v22  ;;  %v5425_v33 = vpop.permute.xlu0 %5424  ;;  %v4133_v22 = vrot.slane %v7029_v9, %v6620_v39 }
 0x555   : > { %3716 = vrot.lane.b32.xlu1 %v7410_v27, %s6196_s15  ;;  %5467 = vst.msk [vmem:[%s6883_s9 + $0x5f] sm:$0x1] %vm3555_vm9, %v5425_v33 }
 0x556   : > { %5145 = vrot.lane.b32.xlu0 %v5026_v44, %s6217_s26 }
 0x557   : > { %v3769_v28 = vpop.permute.xlu1 %3768 }
 0x558   : > { %3814 = vst.msk [vmem:[%s6883_s9 + $0x23] sm:$0x1] %vm3555_vm9, %v3769_v28  ;;  %v3643_v55 = vpop.permute.xlu0 %3642  ;;  %v4141_v28 = vrot.slane %v7277_v50, %v6620_v39 }
 0x559   : > { %3776 = vrot.lane.b32.xlu1 %v7398_v11, %s6206_s11  ;;  %3687 = vst.msk [vmem:[%s6883_s9 + $0x31] sm:$0x1] %vm3555_vm9, %v3643_v55 }
 0x55a   : > { %5149 = vrot.lane.b32.xlu0 %v5034_v15, %s6217_s26 }
 0x55b   : > { %v3773_v54 = vpop.permute.xlu1 %3772 }
 0x55c   : > { %3816 = vst.msk [vmem:[%s6883_s9 + $0x43] sm:$0x1] %vm3555_vm9, %v3773_v54  ;;  %v3647_v34 = vpop.permute.xlu0 %3646  ;;  %v4165_v54 = vrot.slane %v7033_v1, %v6620_v39 }
 0x55d   : > { %3780 = vrot.lane.b32.xlu1 %v7410_v27, %s6206_s11  ;;  %3689 = vst.msk [vmem:[%s6883_s9 + $0x51] sm:$0x1] %vm3555_vm9, %v3647_v34  ;;  %v4173_v34 = vrot.slane %v7299_v8, %v6620_v39 }
 0x55e   : > { %5161 = vrot.lane.b32.xlu0 %v5058_v47, %s6217_s26  ;;  %v4409_v47 = vcombine.high %v7037_v5, %v7037_v5 }
 0x55f   : > { %v3833_v51 = vpop.permute.xlu1 %3832 }
 0x560   : > { %3878 = vst.msk [vmem:[%s6883_s9 + $0x24] sm:$0x1] %vm3555_vm9, %v3833_v51  ;;  %v3707_v56 = vpop.permute.xlu0 %3706 }
 0x561   : > { %3840 = vrot.lane.b32.xlu1 %v7398_v11, %s6207_s12  ;;  %3751 = vst.msk [vmem:[%s6883_s9 + $0x32] sm:$0x1] %vm3555_vm9, %v3707_v56 }
 0x562   : > { %5165 = vrot.lane.b32.xlu0 %v5066_v43, %s6217_s26  ;;  %v7565_v43 = vrot.slane %v4409_v47, %v6620_v39 }
 0x563   : > { %v3837_v53 = vpop.permute.xlu1 %3836 }
 0x564   : > { %3880 = vst.msk [vmem:[%s6883_s9 + $0x44] sm:$0x1] %vm3555_vm9, %v3837_v53  ;;  %v3711_v0 = vpop.permute.xlu0 %3710 }
 0x565   : > { %3844 = vrot.lane.b32.xlu1 %v7410_v27, %s6207_s12  ;;  %3753 = vst.msk [vmem:[%s6883_s9 + $0x52] sm:$0x1] %vm3555_vm9, %v3711_v0 }
 0x566   : > { %5428 = vrot.lane.b32.xlu0 %v5381_v13, %s8482_s10  ;;  %s8487_s10 = smov 20  }
 0x567   : > { %v3897_v29 = vpop.permute.xlu1 %3896 }
 0x568   : > { %3942 = vst.msk [vmem:[%s6883_s9 + $0x25] sm:$0x1] %vm3555_vm9, %v3897_v29  ;;  %v3771_v58 = vpop.permute.xlu0 %3770 }
 0x569   : > { %3904 = vrot.lane.b32.xlu1 %v7398_v11, %s6208_s16  ;;  %3815 = vst.msk [vmem:[%s6883_s9 + $0x33] sm:$0x1] %vm3555_vm9, %v3771_v58 }
 0x56a   : > { %3650 = vrot.lane.b32.xlu0 %v7490_v16, %s6195_s14 }
 0x56b   : > { %v3901_v19 = vpop.permute.xlu1 %3900 }
 0x56c   : > { %3944 = vst.msk [vmem:[%s6883_s9 + $0x45] sm:$0x1] %vm3555_vm9, %v3901_v19  ;;  %v3775_v59 = vpop.permute.xlu0 %3774  ;;  %v7605_v19 = vcombine.high %v7029_v9, %v7029_v9 }
 0x56d   : > { %3908 = vrot.lane.b32.xlu1 %v7410_v27, %s6208_s16  ;;  %3817 = vst.msk [vmem:[%s6883_s9 + $0x53] sm:$0x1] %vm3555_vm9, %v3775_v59 }
 0x56e   : > { %3654 = vrot.lane.b32.xlu0 %v7502_v12, %s6195_s14 }
 0x56f   : > { %v3961_v21 = vpop.permute.xlu1 %3960 }
 0x570   : > { %4006 = vst.msk [vmem:[%s6883_s9 + $0x26] sm:$0x1] %vm3555_vm9, %v3961_v21  ;;  %v3835_v63 = vpop.permute.xlu0 %3834  ;;  %v4153_v21 = vrot.slane %v7605_v19, %v6623_v62 }
 0x571   : > { %3968 = vrot.lane.b32.xlu1 %v7398_v11, %s8487_s10  ;;  %3879 = vst.msk [vmem:[%s6883_s9 + $0x34] sm:$0x1] %vm3555_vm9, %v3835_v63  ;;  %v7617_v63 = vcombine.high %v7033_v1, %v7033_v1 }
 0x572   : > { %3714 = vrot.lane.b32.xlu0 %v7490_v16, %s6196_s15 }
 0x573   : > { %v3965_v24 = vpop.permute.xlu1 %3964 }
 0x574   : > { %4008 = vst.msk [vmem:[%s6883_s9 + $0x46] sm:$0x1] %vm3555_vm9, %v3965_v24  ;;  %v3839_v31 = vpop.permute.xlu0 %3838  ;;  %v4185_v24 = vrot.slane %v7617_v63, %v6623_v62 }
 0x575   : > { %3972 = vrot.lane.b32.xlu1 %v7410_v27, %s8487_s10  ;;  %3881 = vst.msk [vmem:[%s6883_s9 + $0x54] sm:$0x1] %vm3555_vm9, %v3839_v31 }
 0x576   : > { %3718 = vrot.lane.b32.xlu0 %v7502_v12, %s6196_s15 }
 0x577   : > { %v4251_v11 = vpop.permute.xlu1 %4250 }
 0x578   : > { %v4315_v33 = vsel %vm4314_vm10, %v4251_v11, %v7330_v17  ;;  %v3899_v27 = vpop.permute.xlu0 %3898  ;;  %v4193_v11 = vrot.slane %v7090_v10, %v6623_v62 }
 0x579   : > { %4347 = vst.msk [vmem:[%s6883_s9 + $0x7] sm:$0x1] %vm3555_vm9, %v4315_v33  ;;  %4254 = vrot.lane.b32.xlu1 %v4133_v22, %s6211_s18  ;;  %3943 = vst.msk [vmem:[%s6883_s9 + $0x35] sm:$0x1] %vm3555_vm9, %v3899_v27  ;;  %v4225_v27 = vrot.slane %v7093_v46, %v6623_v62 }
 0x57a   : > { %3778 = vrot.lane.b32.xlu0 %v7490_v16, %s6206_s11 }
 0x57b   : > { %v4267_v44 = vpop.permute.xlu1 %4266 }
 0x57c   : > { %v4319_v55 = vsel %vm4314_vm10, %v4267_v44, %v7342_v18  ;;  %v3903_v17 = vpop.permute.xlu0 %3902  ;;  %v4411_v44 = vcombine.high %v7040_v40, %v7040_v40 }
 0x57d   : > { %4351 = vst.msk [vmem:[%s6883_s9 + $0x47] sm:$0x1] %vm3555_vm9, %v4319_v55  ;;  %4258 = vrot.lane.b32.xlu1 %v4141_v28, %s6211_s18  ;;  %3945 = vst.msk [vmem:[%s6883_s9 + $0x55] sm:$0x1] %vm3555_vm9, %v3903_v17 }
 0x57e   : > { %3782 = vrot.lane.b32.xlu0 %v7502_v12, %s6206_s11  ;;  %v7656_v17 = vrot.slane %v4411_v44, %v6620_v39 }
 0x57f   : > { %v4530_v15 = vpop.permute.xlu1 %4529 }
 0x580   : > { %4575 = vst.msk [vmem:[%s6883_s9 + $0x28] sm:$0x1] %vm3555_vm9, %v4530_v15  ;;  %v3963_v50 = vpop.permute.xlu0 %3962 }
 0x581   : > { %4270 = vrot.lane.b32.xlu1 %v4165_v54, %s6211_s18  ;;  %4007 = vst.msk [vmem:[%s6883_s9 + $0x36] sm:$0x1] %vm3555_vm9, %v3963_v50  ;;  %v7668_v54 = vrot.slane %v7086_v41, %v6620_v39 }
 0x582   : > { %3842 = vrot.lane.b32.xlu0 %v7490_v16, %s6207_s12 }
 0x583   : > { %v4534_v18 = vpop.permute.xlu1 %4533 }
 0x584   : > { %4577 = vst.msk [vmem:[%s6883_s9 + $0x48] sm:$0x1] %vm3555_vm9, %v4534_v18  ;;  %v3967_v51 = vpop.permute.xlu0 %3966 }
 0x585   : > { %4274 = vrot.lane.b32.xlu1 %v4173_v34, %s6211_s18  ;;  %4009 = vst.msk [vmem:[%s6883_s9 + $0x56] sm:$0x1] %vm3555_vm9, %v3967_v51 }
 0x586   : > { %3846 = vrot.lane.b32.xlu0 %v7502_v12, %s6207_s12 }
 0x587   : > { %v4594_v56 = vpop.permute.xlu1 %4593 }
 0x588   : > { %4639 = vst.msk [vmem:[%s6883_s9 + $0x29] sm:$0x1] %vm3555_vm9, %v4594_v56  ;;  %v7573_v5 = vpop.permute.xlu0 %4256 }
 0x589   : > { %4537 = vrot.lane.b32.xlu1 %v7565_v43, %s6210_s17 }
 0x58a   : > { %3906 = vrot.lane.b32.xlu0 %v7490_v16, %s6208_s16 }
 0x58b   : > { %v4598_v8 = vpop.permute.xlu1 %4597 }
 0x58c   : > { %4641 = vst.msk [vmem:[%s6883_s9 + $0x49] sm:$0x1] %vm3555_vm9, %v4598_v8  ;;  %v7585_v53 = vpop.permute.xlu0 %4260 }
 0x58d   : > { %4541 = vrot.lane.b32.xlu1 %v7577_v7, %s6210_s17 }
 0x58e   : > { %3910 = vrot.lane.b32.xlu0 %v7502_v12, %s6208_s16 }
 0x58f   : > { %v4658_v0 = vpop.permute.xlu1 %4657 }
 0x590   : > { %4703 = vst.msk [vmem:[%s6883_s9 + $0x2a] sm:$0x1] %vm3555_vm9, %v4658_v0  ;;  %v7593_v13 = vpop.permute.xlu0 %4272 }
 0x591   : > { %4601 = vrot.lane.b32.xlu1 %v7565_v43, %s6212_s19 }
 0x592   : > { %3970 = vrot.lane.b32.xlu0 %v7490_v16, %s8487_s10 }
 0x593   : > { %v4662_v29 = vpop.permute.xlu1 %4661 }
 0x594   : > { %4705 = vst.msk [vmem:[%s6883_s9 + $0x4a] sm:$0x1] %vm3555_vm9, %v4662_v29  ;;  %v7601_v58 = vpop.permute.xlu0 %4276 }
 0x595   : > { %4605 = vrot.lane.b32.xlu1 %v7577_v7, %s6212_s19 }
 0x596   : > { %3974 = vrot.lane.b32.xlu0 %v7502_v12, %s8487_s10 }
 0x597   : > { %v4722_v59 = vpop.permute.xlu1 %4721 }
 0x598   : > { %4767 = vst.msk [vmem:[%s6883_s9 + $0x2b] sm:$0x1] %vm3555_vm9, %v4722_v59  ;;  %v4532_v16 = vpop.permute.xlu0 %4531  ;;  %v5054_v59 = vrot.slane %v7052_v20, %v6620_v39 }
 0x599   : > { %4665 = vrot.lane.b32.xlu1 %v7565_v43, %s6213_s20  ;;  %4576 = vst.msk [vmem:[%s6883_s9 + $0x38] sm:$0x1] %vm3555_vm9, %v4532_v16 }
 0x59a   : > { %4264 = vrot.lane.b32.xlu0 %v4153_v21, %s6211_s18  ;;  %v5062_v21 = vrot.slane %v7460_v6, %v6620_v39 }
 0x59b   : > { %v4726_v9 = vpop.permute.xlu1 %4725 }
 0x59c   : > { %4769 = vst.msk [vmem:[%s6883_s9 + $0x4b] sm:$0x1] %vm3555_vm9, %v4726_v9  ;;  %v4536_v12 = vpop.permute.xlu0 %4535 }
 0x59d   : > { %4669 = vrot.lane.b32.xlu1 %v7577_v7, %s6213_s20  ;;  %4578 = vst.msk [vmem:[%s6883_s9 + $0x58] sm:$0x1] %vm3555_vm9, %v4536_v12 }
 0x59e   : > { %4280 = vrot.lane.b32.xlu0 %v4185_v24, %s6211_s18  ;;  %v7730_v24 = vrot.slane %v6937_v35, %v6620_v39 }
 0x59f   : > { %v4786_v1 = vpop.permute.xlu1 %4785 }
 0x5a0   : > { %4831 = vst.msk [vmem:[%s6883_s9 + $0x2c] sm:$0x1] %vm3555_vm9, %v4786_v1  ;;  %v4596_v31 = vpop.permute.xlu0 %4595 }
 0x5a1   : > { %4729 = vrot.lane.b32.xlu1 %v7565_v43, %s8486_s13  ;;  %4640 = vst.msk [vmem:[%s6883_s9 + $0x39] sm:$0x1] %vm3555_vm9, %v4596_v31  ;;  %v7742_v31 = vrot.slane %v6930_v30, %v6620_v39 }
 0x5a2   : > { %4284 = vrot.lane.b32.xlu0 %v4193_v11, %s6211_s18 }
 0x5a3   : > { %v4790_v22 = vpop.permute.xlu1 %4789 }
 0x5a4   : > { %4833 = vst.msk [vmem:[%s6883_s9 + $0x4c] sm:$0x1] %vm3555_vm9, %v4790_v22  ;;  %v4600_v33 = vpop.permute.xlu0 %4599 }
 0x5a5   : > { %4733 = vrot.lane.b32.xlu1 %v7577_v7, %s8486_s13  ;;  %4642 = vst.msk [vmem:[%s6883_s9 + $0x59] sm:$0x1] %vm3555_vm9, %v4600_v33 }
 0x5a6   : > { %4300 = vrot.lane.b32.xlu0 %v4225_v27, %s6211_s18  ;;  %v7770_v27 = vcombine.high %v7048_v14, %v7048_v14 }
 0x5a7   : > { %v4850_v28 = vpop.permute.xlu1 %4849 }
 0x5a8   : > { %4895 = vst.msk [vmem:[%s6883_s9 + $0x2d] sm:$0x1] %vm3555_vm9, %v4850_v28  ;;  %v4660_v55 = vpop.permute.xlu0 %4659 }
 0x5a9   : > { %4793 = vrot.lane.b32.xlu1 %v7565_v43, %s6215_s29  ;;  %4704 = vst.msk [vmem:[%s6883_s9 + $0x3a] sm:$0x1] %vm3555_vm9, %v4660_v55  ;;  %v5042_v55 = vrot.slane %v7770_v27, %v6623_v62 }
 0x5aa   : > { %4539 = vrot.lane.b32.xlu0 %v7656_v17, %s6210_s17 }
 0x5ab   : > { %v4854_v40 = vpop.permute.xlu1 %4853 }
 0x5ac   : > { %4897 = vst.msk [vmem:[%s6883_s9 + $0x4d] sm:$0x1] %vm3555_vm9, %v4854_v40  ;;  %v4664_v15 = vpop.permute.xlu0 %4663 }
 0x5ad   : > { %4797 = vrot.lane.b32.xlu1 %v7577_v7, %s6215_s29  ;;  %4706 = vst.msk [vmem:[%s6883_s9 + $0x5a] sm:$0x1] %vm3555_vm9, %v4664_v15 }
 0x5ae   : > { %4543 = vrot.lane.b32.xlu0 %v7668_v54, %s6210_s17 }
 0x5af   : > { %v5140_v50 = vpop.permute.xlu1 %5139 }
 0x5b0   : > { %v5204_v18 = vsel %vm5203_vm11, %v5140_v50, %v7406_v4  ;;  %v4724_v34 = vpop.permute.xlu0 %4723  ;;  %v5082_v50 = vrot.slane %v7120_v49, %v6623_v62 }
 0x5b1   : > { %5236 = vst.msk [vmem:[%s6883_s9 + $0xe] sm:$0x1] %vm3555_vm9, %v5204_v18  ;;  %4857 = vrot.lane.b32.xlu1 %v7565_v43, %s6216_s28  ;;  %4768 = vst.msk [vmem:[%s6883_s9 + $0x3b] sm:$0x1] %vm3555_vm9, %v4724_v34  ;;  %v5022_v43 = vrot.slane %v7048_v14, %v6620_v39 }
 0x5b2   : > { %4603 = vrot.lane.b32.xlu0 %v7656_v17, %s6212_s19 }
 0x5b3   : > { %v5156_v47 = vpop.permute.xlu1 %5155 }
 0x5b4   : > { %v5208_v51 = vsel %vm5203_vm11, %v5156_v47, %v7418_v61  ;;  %v4728_v4 = vpop.permute.xlu0 %4727  ;;  %v5114_v47 = vrot.slane %v7125_v32, %v6623_v62 }
 0x5b5   : > { %5240 = vst.msk [vmem:[%s6883_s9 + $0x4e] sm:$0x1] %vm3555_vm9, %v5208_v51  ;;  %4861 = vrot.lane.b32.xlu1 %v7577_v7, %s6216_s28  ;;  %4770 = vst.msk [vmem:[%s6883_s9 + $0x5b] sm:$0x1] %vm3555_vm9, %v4728_v4  ;;  %v5030_v7 = vrot.slane %v7438_v42, %v6620_v39 }
 0x5b6   : > { %4607 = vrot.lane.b32.xlu0 %v7668_v54, %s6212_s19 }
 0x5b7   : > { %v5427_v56 = vpop.permute.xlu1 %5426 }
 0x5b8   : > { %5468 = vst.msk [vmem:[%s6883_s9 + $0x6f] sm:$0x1] %vm3555_vm9, %v5427_v56  ;;  %v4788_v61 = vpop.permute.xlu0 %4787  ;;  %v7820_v56 = vrot.slane %v7107_v52, %v6620_v39  ;;  %v7834_v52 = vrot.slane %v6947_v38, %v6620_v39 }
 0x5b9   : > { %5143 = vrot.lane.b32.xlu1 %v5022_v43, %s6217_s26  ;;  %4832 = vst.msk [vmem:[%s6883_s9 + $0x3c] sm:$0x1] %vm3555_vm9, %v4788_v61 }
 0x5ba   : > { %4667 = vrot.lane.b32.xlu0 %v7656_v17, %s6213_s20 }
 0x5bb   : > { %v3649_v8 = vpop.permute.xlu1 %3648 }
 0x5bc   : > { %3690 = vst.msk [vmem:[%s6883_s9 + $0x61] sm:$0x1] %vm3555_vm9, %v3649_v8  ;;  %v4792_v0 = vpop.permute.xlu0 %4791 }
 0x5bd   : > { %5147 = vrot.lane.b32.xlu1 %v5030_v7, %s6217_s26  ;;  %4834 = vst.msk [vmem:[%s6883_s9 + $0x5c] sm:$0x1] %vm3555_vm9, %v4792_v0 }
 0x5be   : > { %4671 = vrot.lane.b32.xlu0 %v7668_v54, %s6213_s20 }
 0x5bf   : > { %v3653_v29 = vpop.permute.xlu1 %3652 }
 0x5c0   : > { %3692 = vst.msk [vmem:[%s6883_s9 + $0x81] sm:$0x1] %vm3555_vm9, %v3653_v29  ;;  %v4852_v42 = vpop.permute.xlu0 %4851 }
 0x5c1   : > { %5159 = vrot.lane.b32.xlu1 %v5054_v59, %s6217_s26  ;;  %4896 = vst.msk [vmem:[%s6883_s9 + $0x3d] sm:$0x1] %vm3555_vm9, %v4852_v42  ;;  %v4149_v42 = vrot.slane %v7605_v19, %v6620_v39 }
 0x5c2   : > { %4731 = vrot.lane.b32.xlu0 %v7656_v17, %s8486_s13 }
 0x5c3   : > { %v3713_v16 = vpop.permute.xlu1 %3712 }
 0x5c4   : > { %3754 = vst.msk [vmem:[%s6883_s9 + $0x62] sm:$0x1] %vm3555_vm9, %v3713_v16  ;;  %v4856_v9 = vpop.permute.xlu0 %4855 }
 0x5c5   : > { %5163 = vrot.lane.b32.xlu1 %v5062_v21, %s6217_s26  ;;  %4898 = vst.msk [vmem:[%s6883_s9 + $0x5d] sm:$0x1] %vm3555_vm9, %v4856_v9  ;;  %v4181_v9 = vrot.slane %v7617_v63, %v6620_v39 }
 0x5c6   : > { %4735 = vrot.lane.b32.xlu0 %v7668_v54, %s8486_s13 }
 0x5c7   : > { %v3717_v12 = vpop.permute.xlu1 %3716 }
 0x5c8   : > { %3756 = vst.msk [vmem:[%s6883_s9 + $0x82] sm:$0x1] %vm3555_vm9, %v3717_v12  ;;  %v7738_v6 = vpop.permute.xlu0 %5145  ;;  %v4189_v12 = vrot.slane %v7090_v10, %v6620_v39 }
 0x5c9   : > { %3656 = vrot.lane.b32.xlu1 %v7730_v24, %s6195_s14 }
 0x5ca   : > { %4795 = vrot.lane.b32.xlu0 %v7656_v17, %s6215_s29 }
 0x5cb   : > { %v3777_v1 = vpop.permute.xlu1 %3776 }
 0x5cc   : > { %3818 = vst.msk [vmem:[%s6883_s9 + $0x63] sm:$0x1] %vm3555_vm9, %v3777_v1  ;;  %v7750_v35 = vpop.permute.xlu0 %5149  ;;  %v4221_v1 = vrot.slane %v7093_v46, %v6620_v39 }
 0x5cd   : > { %3660 = vrot.lane.b32.xlu1 %v7742_v31, %s6195_s14 }
 0x5ce   : > { %4799 = vrot.lane.b32.xlu0 %v7668_v54, %s6215_s29 }
 0x5cf   : > { %v3781_v11 = vpop.permute.xlu1 %3780 }
 0x5d0   : > { %3820 = vst.msk [vmem:[%s6883_s9 + $0x83] sm:$0x1] %vm3555_vm9, %v3781_v11  ;;  %v7758_v30 = vpop.permute.xlu0 %5161 }
 0x5d1   : > { %3720 = vrot.lane.b32.xlu1 %v7730_v24, %s6196_s15 }
 0x5d2   : > { %4859 = vrot.lane.b32.xlu0 %v7656_v17, %s6216_s28  ;;  %v7782_v17 = vcombine.high %v7052_v20, %v7052_v20 }
 0x5d3   : > { %v3841_v22 = vpop.permute.xlu1 %3840 }
 0x5d4   : > { %3882 = vst.msk [vmem:[%s6883_s9 + $0x64] sm:$0x1] %vm3555_vm9, %v3841_v22  ;;  %v7766_v33 = vpop.permute.xlu0 %5165  ;;  %v5074_v15 = vrot.slane %v7782_v17, %v6623_v62 }
 0x5d5   : > { %3724 = vrot.lane.b32.xlu1 %v7742_v31, %s6196_s15 }
 0x5d6   : > { %4863 = vrot.lane.b32.xlu0 %v7668_v54, %s6216_s28 }
 0x5d7   : > { %v3845_v44 = vpop.permute.xlu1 %3844 }
 0x5d8   : > { %3884 = vst.msk [vmem:[%s6883_s9 + $0x84] sm:$0x1] %vm3555_vm9, %v3845_v44  ;;  %v5429_v28 = vpop.permute.xlu0 %5428 }
 0x5d9   : > { %3784 = vrot.lane.b32.xlu1 %v7730_v24, %s6206_s11  ;;  %5469 = vst.msk [vmem:[%s6883_s9 + $0x7f] sm:$0x1] %vm3555_vm9, %v5429_v28 }
 0x5da   : > { %5153 = vrot.lane.b32.xlu0 %v5042_v55, %s6217_s26  ;;  %v7911_v55 = vrot.slane %v7130_v2, %v6620_v39 }
 0x5db   : > { %v3905_v14 = vpop.permute.xlu1 %3904 }
 0x5dc   : > { %3946 = vst.msk [vmem:[%s6883_s9 + $0x65] sm:$0x1] %vm3555_vm9, %v3905_v14  ;;  %v3651_v40 = vpop.permute.xlu0 %3650 }
 0x5dd   : > { %3788 = vrot.lane.b32.xlu1 %v7742_v31, %s6206_s11  ;;  %3691 = vst.msk [vmem:[%s6883_s9 + $0x71] sm:$0x1] %vm3555_vm9, %v3651_v40 }
 0x5de   : > { %5169 = vrot.lane.b32.xlu0 %v5074_v15, %s6217_s26 }
 0x5df   : > { %v3909_v20 = vpop.permute.xlu1 %3908 }
 0x5e0   : > { %3948 = vst.msk [vmem:[%s6883_s9 + $0x85] sm:$0x1] %vm3555_vm9, %v3909_v20  ;;  %v3655_v54 = vpop.permute.xlu0 %3654 }
 0x5e1   : > { %3848 = vrot.lane.b32.xlu1 %v7730_v24, %s6207_s12  ;;  %3693 = vst.msk [vmem:[%s6883_s9 + $0x91] sm:$0x1] %vm3555_vm9, %v3655_v54 }
 0x5e2   : > { %5173 = vrot.lane.b32.xlu0 %v5082_v50, %s6217_s26 }
 0x5e3   : > { %v3969_v18 = vpop.permute.xlu1 %3968 }
 0x5e4   : > { %4010 = vst.msk [vmem:[%s6883_s9 + $0x66] sm:$0x1] %vm3555_vm9, %v3969_v18  ;;  %v3715_v34 = vpop.permute.xlu0 %3714 }
 0x5e5   : > { %3852 = vrot.lane.b32.xlu1 %v7742_v31, %s6207_s12  ;;  %3755 = vst.msk [vmem:[%s6883_s9 + $0x72] sm:$0x1] %vm3555_vm9, %v3715_v34  ;;  %v4201_v34 = vrot.slane %v7133_v60, %v6623_v62 }
 0x5e6   : > { %5189 = vrot.lane.b32.xlu0 %v5114_v47, %s6217_s26  ;;  %v7949_v47 = vcombine.high %v7090_v10, %v7090_v10 }
 0x5e7   : > { %v3973_v51 = vpop.permute.xlu1 %3972 }
 0x5e8   : > { %4012 = vst.msk [vmem:[%s6883_s9 + $0x86] sm:$0x1] %vm3555_vm9, %v3973_v51  ;;  %v3719_v4 = vpop.permute.xlu0 %3718 }
 0x5e9   : > { %3912 = vrot.lane.b32.xlu1 %v7730_v24, %s6208_s16  ;;  %3757 = vst.msk [vmem:[%s6883_s9 + $0x92] sm:$0x1] %vm3555_vm9, %v3719_v4 }
 0x5ea   : > { %3658 = vrot.lane.b32.xlu0 %v7820_v56, %s6195_s14 }
 0x5eb   : > { %v4255_v43 = vpop.permute.xlu1 %4254 }
 0x5ec   : > { %v4316_v61 = vsel %vm4314_vm10, %v4255_v43, %v7573_v5  ;;  %v3779_v8 = vpop.permute.xlu0 %3778 }
 0x5ed   : > { %4348 = vst.msk [vmem:[%s6883_s9 + $0x17] sm:$0x1] %vm3555_vm9, %v4316_v61  ;;  %3916 = vrot.lane.b32.xlu1 %v7742_v31, %s6208_s16  ;;  %3819 = vst.msk [vmem:[%s6883_s9 + $0x73] sm:$0x1] %vm3555_vm9, %v3779_v8  ;;  %v4233_v61 = vrot.slane %v7136_v3, %v6623_v62  ;;  %v7969_v8 = vcombine.high %v7093_v46, %v7093_v46  ;;  %v4459_v46 = vcombine.high %v7086_v41, %v7086_v41 }
 0x5ee   : > { %3662 = vrot.lane.b32.xlu0 %v7834_v52, %s6195_s14 }
 0x5ef   : > { %v4259_v7 = vpop.permute.xlu1 %4258 }
 0x5f0   : > { %v4317_v5 = vsel %vm4314_vm10, %v4259_v7, %v7585_v53  ;;  %v3783_v0 = vpop.permute.xlu0 %3782 }
 0x5f1   : > { %4349 = vst.msk [vmem:[%s6883_s9 + $0x27] sm:$0x1] %vm3555_vm9, %v4317_v5  ;;  %3976 = vrot.lane.b32.xlu1 %v7730_v24, %s8487_s10  ;;  %3821 = vst.msk [vmem:[%s6883_s9 + $0x93] sm:$0x1] %vm3555_vm9, %v3783_v0  ;;  %v4241_v5 = vrot.slane %v7969_v8, %v6623_v62 }
 0x5f2   : > { %3722 = vrot.lane.b32.xlu0 %v7820_v56, %s6196_s15 }
 0x5f3   : > { %v4271_v38 = vpop.permute.xlu1 %4270 }
 0x5f4   : > { %v4320_v29 = vsel %vm4314_vm10, %v4271_v38, %v7593_v13  ;;  %v3843_v53 = vpop.permute.xlu0 %3842 }
 0x5f5   : > { %4352 = vst.msk [vmem:[%s6883_s9 + $0x57] sm:$0x1] %vm3555_vm9, %v4320_v29  ;;  %3980 = vrot.lane.b32.xlu1 %v7742_v31, %s8487_s10  ;;  %3883 = vst.msk [vmem:[%s6883_s9 + $0x74] sm:$0x1] %vm3555_vm9, %v3843_v53  ;;  %v4457_v31 = vcombine.high %v7070_v23, %v7070_v23  ;;  %v7990_v29 = vrot.slane %v4459_v46, %v6620_v39  ;;  %v5122_v46 = vrot.slane %v7158_v37, %v6623_v62 }
 0x5f6   : > { %3726 = vrot.lane.b32.xlu0 %v7834_v52, %s6196_s15 }
 0x5f7   : > { %v4275_v59 = vpop.permute.xlu1 %4274  ;;  %v7899_v44 = vrot.slane %v4457_v31, %v6620_v39 }
 0x5f8   : > { %v4321_v13 = vsel %vm4314_vm10, %v4275_v59, %v7601_v58  ;;  %v3847_v16 = vpop.permute.xlu0 %3846 }
 0x5f9   : > { %4353 = vst.msk [vmem:[%s6883_s9 + $0x67] sm:$0x1] %vm3555_vm9, %v4321_v13  ;;  %4262 = vrot.lane.b32.xlu1 %v4149_v42, %s6211_s18  ;;  %3885 = vst.msk [vmem:[%s6883_s9 + $0x94] sm:$0x1] %vm3555_vm9, %v3847_v16  ;;  %v8004_v42 = vrot.slane %v7143_v25, %v6620_v39 }
 0x5fa   : > { %3786 = vrot.lane.b32.xlu0 %v7820_v56, %s6206_s11 }
 0x5fb   : > { %v4538_v21 = vpop.permute.xlu1 %4537 }
 0x5fc   : > { %4579 = vst.msk [vmem:[%s6883_s9 + $0x68] sm:$0x1] %vm3555_vm9, %v4538_v21  ;;  %v3907_v58 = vpop.permute.xlu0 %3906 }
 0x5fd   : > { %4278 = vrot.lane.b32.xlu1 %v4181_v9, %s6211_s18  ;;  %3947 = vst.msk [vmem:[%s6883_s9 + $0x75] sm:$0x1] %vm3555_vm9, %v3907_v58 }
 0x5fe   : > { %3790 = vrot.lane.b32.xlu0 %v7834_v52, %s6206_s11 }
 0x5ff   : > { %v4542_v19 = vpop.permute.xlu1 %4541 }
 0x600   : > { %4581 = vst.msk [vmem:[%s6883_s9 + $0x88] sm:$0x1] %vm3555_vm9, %v4542_v19  ;;  %v3911_v63 = vpop.permute.xlu0 %3910  ;;  %v5038_v19 = vrot.slane %v7770_v27, %v6620_v39 }
 0x601   : > { %4282 = vrot.lane.b32.xlu1 %v4189_v12, %s6211_s18  ;;  %3949 = vst.msk [vmem:[%s6883_s9 + $0x95] sm:$0x1] %vm3555_vm9, %v3911_v63 }
 0x602   : > { %3850 = vrot.lane.b32.xlu0 %v7820_v56, %s6207_s12 }
 0x603   : > { %v4602_v24 = vpop.permute.xlu1 %4601 }
 0x604   : > { %4643 = vst.msk [vmem:[%s6883_s9 + $0x69] sm:$0x1] %vm3555_vm9, %v4602_v24  ;;  %v3971_v11 = vpop.permute.xlu0 %3970  ;;  %v5070_v24 = vrot.slane %v7782_v17, %v6620_v39 }
 0x605   : > { %4298 = vrot.lane.b32.xlu1 %v4221_v1, %s6211_s18  ;;  %4011 = vst.msk [vmem:[%s6883_s9 + $0x76] sm:$0x1] %vm3555_vm9, %v3971_v11  ;;  %v5078_v1 = vrot.slane %v7120_v49, %v6620_v39  ;;  %v5110_v11 = vrot.slane %v7125_v32, %v6620_v39 }
 0x606   : > { %3854 = vrot.lane.b32.xlu0 %v7834_v52, %s6207_s12 }
 0x607   : > { %v4606_v22 = vpop.permute.xlu1 %4605 }
 0x608   : > { %4645 = vst.msk [vmem:[%s6883_s9 + $0x89] sm:$0x1] %vm3555_vm9, %v4606_v22  ;;  %v3975_v23 = vpop.permute.xlu0 %3974 }
 0x609   : > { %4545 = vrot.lane.b32.xlu1 %v7899_v44, %s6210_s17  ;;  %4013 = vst.msk [vmem:[%s6883_s9 + $0x96] sm:$0x1] %vm3555_vm9, %v3975_v23  ;;  %v3631_v23 = vrot.slane %v7147_v26, %v6620_v39 }
 0x60a   : > { %3914 = vrot.lane.b32.xlu0 %v7820_v56, %s6208_s16 }
 0x60b   : > { %v4666_v28 = vpop.permute.xlu1 %4665 }
 0x60c   : > { %4707 = vst.msk [vmem:[%s6883_s9 + $0x6a] sm:$0x1] %vm3555_vm9, %v4666_v28  ;;  %v7919_v14 = vpop.permute.xlu0 %4264 }
 0x60d   : > { %4549 = vrot.lane.b32.xlu1 %v7911_v55, %s6210_s17 }
 0x60e   : > { %3918 = vrot.lane.b32.xlu0 %v7834_v52, %s6208_s16 }
 0x60f   : > { %v4670_v40 = vpop.permute.xlu1 %4669 }
 0x610   : > { %4709 = vst.msk [vmem:[%s6883_s9 + $0x8a] sm:$0x1] %vm3555_vm9, %v4670_v40  ;;  %v7927_v15 = vpop.permute.xlu0 %4280 }
 0x611   : > { %4609 = vrot.lane.b32.xlu1 %v7899_v44, %s6212_s19 }
 0x612   : > { %3978 = vrot.lane.b32.xlu0 %v7820_v56, %s8487_s10  ;;  %v4209_v56 = vrot.slane %v7949_v47, %v6623_v62 }
 0x613   : > { %v4730_v20 = vpop.permute.xlu1 %4729 }
 0x614   : > { %4771 = vst.msk [vmem:[%s6883_s9 + $0x6b] sm:$0x1] %vm3555_vm9, %v4730_v20  ;;  %v7935_v54 = vpop.permute.xlu0 %4284 }
 0x615   : > { %4613 = vrot.lane.b32.xlu1 %v7911_v55, %s6212_s19 }
 0x616   : > { %3982 = vrot.lane.b32.xlu0 %v7834_v52, %s8487_s10 }
 0x617   : > { %v4734_v50 = vpop.permute.xlu1 %4733 }
 0x618   : > { %4773 = vst.msk [vmem:[%s6883_s9 + $0x8b] sm:$0x1] %vm3555_vm9, %v4734_v50  ;;  %v7943_v18 = vpop.permute.xlu0 %4300 }
 0x619   : > { %4673 = vrot.lane.b32.xlu1 %v7899_v44, %s6213_s20 }
 0x61a   : > { %4288 = vrot.lane.b32.xlu0 %v4201_v34, %s6211_s18 }
 0x61b   : > { %v4794_v51 = vpop.permute.xlu1 %4793 }
 0x61c   : > { %4835 = vst.msk [vmem:[%s6883_s9 + $0x6c] sm:$0x1] %vm3555_vm9, %v4794_v51  ;;  %v4540_v4 = vpop.permute.xlu0 %4539 }
 0x61d   : > { %4677 = vrot.lane.b32.xlu1 %v7911_v55, %s6213_s20  ;;  %4580 = vst.msk [vmem:[%s6883_s9 + $0x78] sm:$0x1] %vm3555_vm9, %v4540_v4 }
 0x61e   : > { %4292 = vrot.lane.b32.xlu0 %v4209_v56, %s6211_s18  ;;  %v5090_v56 = vrot.slane %v7155_v36, %v6623_v62 }
 0x61f   : > { %v4798_v43 = vpop.permute.xlu1 %4797 }
 0x620   : > { %4837 = vst.msk [vmem:[%s6883_s9 + $0x8c] sm:$0x1] %vm3555_vm9, %v4798_v43  ;;  %v4544_v10 = vpop.permute.xlu0 %4543  ;;  %v8107_v43 = vcombine.high %v7120_v49, %v7120_v49  ;;  %v4197_v49 = vrot.slane %v7133_v60, %v6620_v39 }
 0x621   : > { %4737 = vrot.lane.b32.xlu1 %v7899_v44, %s8486_s13  ;;  %4582 = vst.msk [vmem:[%s6883_s9 + $0x98] sm:$0x1] %vm3555_vm9, %v4544_v10 }
 0x622   : > { %4304 = vrot.lane.b32.xlu0 %v4233_v61, %s6211_s18 }
 0x623   : > { %v4858_v52 = vpop.permute.xlu1 %4857 }
 0x624   : > { %4899 = vst.msk [vmem:[%s6883_s9 + $0x6d] sm:$0x1] %vm3555_vm9, %v4858_v52  ;;  %v4604_v7 = vpop.permute.xlu0 %4603  ;;  %v5098_v52 = vrot.slane %v8107_v43, %v6623_v62 }
 0x625   : > { %4741 = vrot.lane.b32.xlu1 %v7911_v55, %s8486_s13  ;;  %4644 = vst.msk [vmem:[%s6883_s9 + $0x79] sm:$0x1] %vm3555_vm9, %v4604_v7 }
 0x626   : > { %4308 = vrot.lane.b32.xlu0 %v4241_v5, %s6211_s18 }
 0x627   : > { %v4862_v0 = vpop.permute.xlu1 %4861 }
 0x628   : > { %4901 = vst.msk [vmem:[%s6883_s9 + $0x8d] sm:$0x1] %vm3555_vm9, %v4862_v0  ;;  %v4608_v38 = vpop.permute.xlu0 %4607  ;;  %v8127_v0 = vcombine.high %v7125_v32, %v7125_v32 }
 0x629   : > { %4801 = vrot.lane.b32.xlu1 %v7899_v44, %s6215_s29  ;;  %4646 = vst.msk [vmem:[%s6883_s9 + $0x99] sm:$0x1] %vm3555_vm9, %v4608_v38 }
 0x62a   : > { %4547 = vrot.lane.b32.xlu0 %v7990_v29, %s6210_s17 }
 0x62b   : > { %v5144_v41 = vpop.permute.xlu1 %5143 }
 0x62c   : > { %v5205_v53 = vsel %vm5203_vm11, %v5144_v41, %v7738_v6  ;;  %v4668_v59 = vpop.permute.xlu0 %4667 }
 0x62d   : > { %5237 = vst.msk [vmem:[%s6883_s9 + $0x1e] sm:$0x1] %vm3555_vm9, %v5205_v53  ;;  %4805 = vrot.lane.b32.xlu1 %v7911_v55, %s6215_s29  ;;  %4708 = vst.msk [vmem:[%s6883_s9 + $0x7a] sm:$0x1] %vm3555_vm9, %v4668_v59  ;;  %v5130_v53 = vrot.slane %v8127_v0, %v6623_v62  ;;  %v4229_v59 = vrot.slane %v7136_v3, %v6620_v39 }
 0x62e   : > { %4551 = vrot.lane.b32.xlu0 %v8004_v42, %s6210_s17 }
 0x62f   : > { %v5148_v13 = vpop.permute.xlu1 %5147 }
 0x630   : > { %v5206_v6 = vsel %vm5203_vm11, %v5148_v13, %v7750_v35  ;;  %v4672_v16 = vpop.permute.xlu0 %4671 }
 0x631   : > { %5238 = vst.msk [vmem:[%s6883_s9 + $0x2e] sm:$0x1] %vm3555_vm9, %v5206_v6  ;;  %4865 = vrot.lane.b32.xlu1 %v7899_v44, %s6216_s28  ;;  %4710 = vst.msk [vmem:[%s6883_s9 + $0x9a] sm:$0x1] %vm3555_vm9, %v4672_v16  ;;  %v4237_v6 = vrot.slane %v7969_v8, %v6620_v39  ;;  %v4458_v16 = vcombine.high %v7130_v2, %v7130_v2 }
 0x632   : > { %4611 = vrot.lane.b32.xlu0 %v7990_v29, %s6212_s19 }
 0x633   : > { %v5160_v21 = vpop.permute.xlu1 %5159  ;;  %v4520_v8 = vrot.slane %v4458_v16, %v6620_v39 }
 0x634   : > { %v5209_v9 = vsel %vm5203_vm11, %v5160_v21, %v7758_v30  ;;  %v4732_v35 = vpop.permute.xlu0 %4731 }
 0x635   : > { %5241 = vst.msk [vmem:[%s6883_s9 + $0x5e] sm:$0x1] %vm3555_vm9, %v5209_v9  ;;  %4869 = vrot.lane.b32.xlu1 %v7911_v55, %s6216_s28  ;;  %4772 = vst.msk [vmem:[%s6883_s9 + $0x7b] sm:$0x1] %vm3555_vm9, %v4732_v35 }
 0x636   : > { %4615 = vrot.lane.b32.xlu0 %v8004_v42, %s6212_s19 }
 0x637   : > { %v5164_v58 = vpop.permute.xlu1 %5163 }
 0x638   : > { %v5210_v30 = vsel %vm5203_vm11, %v5164_v58, %v7766_v33  ;;  %v4736_v12 = vpop.permute.xlu0 %4735 }
 0x639   : > { %5242 = vst.msk [vmem:[%s6883_s9 + $0x6e] sm:$0x1] %vm3555_vm9, %v5210_v30  ;;  %5151 = vrot.lane.b32.xlu1 %v5038_v19, %s6217_s26  ;;  %4774 = vst.msk [vmem:[%s6883_s9 + $0x9b] sm:$0x1] %vm3555_vm9, %v4736_v12 }
 0x63a   : > { %4675 = vrot.lane.b32.xlu0 %v7990_v29, %s6213_s20 }
 0x63b   : > { %v3657_v63 = vpop.permute.xlu1 %3656 }
 0x63c   : > { %3694 = vst.msk [vmem:[%s6883_s9 + $0xa1] sm:$0x1] %vm3555_vm9, %v3657_v63  ;;  %v4796_v33 = vpop.permute.xlu0 %4795 }
 0x63d   : > { %5167 = vrot.lane.b32.xlu1 %v5070_v24, %s6217_s26  ;;  %4836 = vst.msk [vmem:[%s6883_s9 + $0x7c] sm:$0x1] %vm3555_vm9, %v4796_v33 }
 0x63e   : > { %4679 = vrot.lane.b32.xlu0 %v8004_v42, %s6213_s20 }
 0x63f   : > { %v3661_v27 = vpop.permute.xlu1 %3660 }
 0x640   : > { %3696 = vst.msk [vmem:[%s6883_s9 + $0xc1] sm:$0x1] %vm3555_vm9, %v3661_v27  ;;  %v4800_v17 = vpop.permute.xlu0 %4799 }
 0x641   : > { %5171 = vrot.lane.b32.xlu1 %v5078_v1, %s6217_s26  ;;  %4838 = vst.msk [vmem:[%s6883_s9 + $0x9c] sm:$0x1] %vm3555_vm9, %v4800_v17  ;;  %v4121_v1 = vcombine.high %v7136_v3, %v7136_v3 }
 0x642   : > { %4739 = vrot.lane.b32.xlu0 %v7990_v29, %s8486_s13 }
 0x643   : > { %v3721_v31 = vpop.permute.xlu1 %3720 }
 0x644   : > { %3758 = vst.msk [vmem:[%s6883_s9 + $0xa2] sm:$0x1] %vm3555_vm9, %v3721_v31  ;;  %v4860_v22 = vpop.permute.xlu0 %4859  ;;  %v4249_v31 = vrot.slane %v4121_v1, %v6623_v62 }
 0x645   : > { %5187 = vrot.lane.b32.xlu1 %v5110_v11, %s6217_s26  ;;  %4900 = vst.msk [vmem:[%s6883_s9 + $0x7d] sm:$0x1] %vm3555_vm9, %v4860_v22  ;;  %v4460_v11 = vcombine.high %v7143_v25, %v7143_v25  ;;  %v5086_v22 = vrot.slane %v7155_v36, %v6620_v39 }
 0x646   : > { %4743 = vrot.lane.b32.xlu0 %v8004_v42, %s8486_s13 }
 0x647   : > { %v3725_v44 = vpop.permute.xlu1 %3724 }
 0x648   : > { %3760 = vst.msk [vmem:[%s6883_s9 + $0xc2] sm:$0x1] %vm3555_vm9, %v3725_v44  ;;  %v4864_v28 = vpop.permute.xlu0 %4863 }
 0x649   : > { %3664 = vrot.lane.b32.xlu1 %v3631_v23, %s6195_s14  ;;  %4902 = vst.msk [vmem:[%s6883_s9 + $0x9d] sm:$0x1] %vm3555_vm9, %v4864_v28  ;;  %v5094_v28 = vrot.slane %v8107_v43, %v6620_v39  ;;  %v5126_v43 = vrot.slane %v8127_v0, %v6620_v39 }
 0x64a   : > { %4803 = vrot.lane.b32.xlu0 %v7990_v29, %s6215_s29 }
 0x64b   : > { %v3785_v55 = vpop.permute.xlu1 %3784 }
 0x64c   : > { %3822 = vst.msk [vmem:[%s6883_s9 + $0xa3] sm:$0x1] %vm3555_vm9, %v3785_v55  ;;  %v8080_v26 = vpop.permute.xlu0 %5153 }
 0x64d   : > { %3728 = vrot.lane.b32.xlu1 %v3631_v23, %s6196_s15 }
 0x64e   : > { %4807 = vrot.lane.b32.xlu0 %v8004_v42, %s6215_s29 }
 0x64f   : > { %v3789_v40 = vpop.permute.xlu1 %3788 }
 0x650   : > { %3824 = vst.msk [vmem:[%s6883_s9 + $0xc3] sm:$0x1] %vm3555_vm9, %v3789_v40  ;;  %v8087_v20 = vpop.permute.xlu0 %5169 }
 0x651   : > { %3792 = vrot.lane.b32.xlu1 %v3631_v23, %s6206_s11 }
 0x652   : > { %4867 = vrot.lane.b32.xlu0 %v7990_v29, %s6216_s28  ;;  %v4205_v29 = vrot.slane %v7949_v47, %v6620_v39 }
 0x653   : > { %v3849_v50 = vpop.permute.xlu1 %3848 }
 0x654   : > { %3886 = vst.msk [vmem:[%s6883_s9 + $0xa4] sm:$0x1] %vm3555_vm9, %v3849_v50  ;;  %v8094_v34 = vpop.permute.xlu0 %5173  ;;  %v5118_v50 = vrot.slane %v7158_v37, %v6620_v39 }
 0x655   : > { %3856 = vrot.lane.b32.xlu1 %v3631_v23, %s6207_s12 }
 0x656   : > { %4871 = vrot.lane.b32.xlu0 %v8004_v42, %s6216_s28  ;;  %v3635_v42 = vrot.slane %v7164_v45, %v6620_v39 }
 0x657   : > { %v3853_v51 = vpop.permute.xlu1 %3852 }
 0x658   : > { %3888 = vst.msk [vmem:[%s6883_s9 + $0xc4] sm:$0x1] %vm3555_vm9, %v3853_v51  ;;  %v8101_v4 = vpop.permute.xlu0 %5189 }
 0x659   : > { %3920 = vrot.lane.b32.xlu1 %v3631_v23, %s6208_s16 }
 0x65a   : > { %5177 = vrot.lane.b32.xlu0 %v5090_v56, %s6217_s26 }
 0x65b   : > { %v3913_v10 = vpop.permute.xlu1 %3912 }
 0x65c   : > { %3950 = vst.msk [vmem:[%s6883_s9 + $0xa5] sm:$0x1] %vm3555_vm9, %v3913_v10  ;;  %v3659_v61 = vpop.permute.xlu0 %3658 }
 0x65d   : > { %3984 = vrot.lane.b32.xlu1 %v3631_v23, %s8487_s10  ;;  %3695 = vst.msk [vmem:[%s6883_s9 + $0xb1] sm:$0x1] %vm3555_vm9, %v3659_v61  ;;  %v4524_v23 = vrot.slane %v4460_v11, %v6620_v39 }
 0x65e   : > { %5181 = vrot.lane.b32.xlu0 %v5098_v52, %s6217_s26 }
 0x65f   : > { %v3917_v7 = vpop.permute.xlu1 %3916 }
 0x660   : > { %3952 = vst.msk [vmem:[%s6883_s9 + $0xc5] sm:$0x1] %vm3555_vm9, %v3917_v7  ;;  %v3663_v5 = vpop.permute.xlu0 %3662 }
 0x661   : > { %4286 = vrot.lane.b32.xlu1 %v4197_v49, %s6211_s18  ;;  %3697 = vst.msk [vmem:[%s6883_s9 + $0xd1] sm:$0x1] %vm3555_vm9, %v3663_v5  ;;  %v4245_v5 = vrot.slane %v4121_v1, %v6620_v39 }
 0x662   : > { %5193 = vrot.lane.b32.xlu0 %v5122_v46, %s6217_s26  ;;  %v5009_v46 = vcombine.high %v7155_v36, %v7155_v36 }
 0x663   : > { %v3977_v38 = vpop.permute.xlu1 %3976 }
 0x664   : > { %4014 = vst.msk [vmem:[%s6883_s9 + $0xa6] sm:$0x1] %vm3555_vm9, %v3977_v38  ;;  %v3723_v41 = vpop.permute.xlu0 %3722 }
 0x665   : > { %4290 = vrot.lane.b32.xlu1 %v4205_v29, %s6211_s18  ;;  %3759 = vst.msk [vmem:[%s6883_s9 + $0xb2] sm:$0x1] %vm3555_vm9, %v3723_v41  ;;  %v5102_v29 = vrot.slane %v5009_v46, %v6620_v39  ;;  %v5010_v41 = vcombine.high %v7158_v37, %v7158_v37 }
 0x666   : > { %5197 = vrot.lane.b32.xlu0 %v5130_v53, %s6217_s26  ;;  %v5106_v53 = vrot.slane %v5009_v46, %v6623_v62 }
 0x667   : > { %v3981_v32 = vpop.permute.xlu1 %3980  ;;  %v5134_v37 = vrot.slane %v5010_v41, %v6620_v39 }
 0x668   : > { %4016 = vst.msk [vmem:[%s6883_s9 + $0xc6] sm:$0x1] %vm3555_vm9, %v3981_v32  ;;  %v3727_v47 = vpop.permute.xlu0 %3726  ;;  %v5347_v32 = vcombine.high %v6976_v48, %v6976_v48  ;;  %v5138_v48 = vrot.slane %v5010_v41, %v6623_v62 }
 0x669   : > { %4302 = vrot.lane.b32.xlu1 %v4229_v59, %s6211_s18  ;;  %3761 = vst.msk [vmem:[%s6883_s9 + $0xd2] sm:$0x1] %vm3555_vm9, %v3727_v47  ;;  %v5349_v47 = vcombine.high %v6986_v57, %v6986_v57 }
 0x66a   : > { %3666 = vrot.lane.b32.xlu0 %v3635_v42, %s6195_s14  ;;  %s8488_s14 = smov 114  }
 0x66b   : > { %v4263_v13 = vpop.permute.xlu1 %4262  ;;  %v5413_v57 = vrot.slane %v5349_v47, %v6620_v39 }
 0x66c   : > { %v4318_v21 = vsel %vm4314_vm10, %v4263_v13, %v7919_v14  ;;  %v3787_v45 = vpop.permute.xlu0 %3786 }
 0x66d   : > { %4350 = vst.msk [vmem:[%s6883_s9 + $0x37] sm:$0x1] %vm3555_vm9, %v4318_v21  ;;  %4306 = vrot.lane.b32.xlu1 %v4237_v6, %s6211_s18  ;;  %3823 = vst.msk [vmem:[%s6883_s9 + $0xb3] sm:$0x1] %vm3555_vm9, %v3787_v45  ;;  %v5409_v6 = vrot.slane %v5347_v32, %v6620_v39 }
 0x66e   : > { %3730 = vrot.lane.b32.xlu0 %v3635_v42, %s6196_s15  ;;  %s5645_s15 = sshll.u32 %s6277_s25, 12  ;;  %s8489_s25 = sand.u32 1, %s6185_s22  }
 0x66f   : > { %v4279_v9 = vpop.permute.xlu1 %4278 }
 0x670   : > { %v4322_v2 = vsel %vm4314_vm10, %v4279_v9, %v7927_v15  ;;  %v3791_v14 = vpop.permute.xlu0 %3790 }
 0x671   : > { %4354 = vst.msk [vmem:[%s6883_s9 + $0x77] sm:$0x1] %vm3555_vm9, %v4322_v2  ;;  %4553 = vrot.lane.b32.xlu1 %v4520_v8, %s6210_s17  ;;  %3825 = vst.msk [vmem:[%s6883_s9 + $0xd3] sm:$0x1] %vm3555_vm9, %v3791_v14 }
 0x672   : > { %3794 = vrot.lane.b32.xlu0 %v3635_v42, %s6206_s11 }
 0x673   : > { %v4283_v35 = vpop.permute.xlu1 %4282 }
 0x674   : > { %v4323_v58 = vsel %vm4314_vm10, %v4283_v35, %v7935_v54  ;;  %v3851_v15 = vpop.permute.xlu0 %3850 }
 0x675   : > { %4355 = vst.msk [vmem:[%s6883_s9 + $0x87] sm:$0x1] %vm3555_vm9, %v4323_v58  ;;  %4617 = vrot.lane.b32.xlu1 %v4520_v8, %s6212_s19  ;;  %3887 = vst.msk [vmem:[%s6883_s9 + $0xb4] sm:$0x1] %vm3555_vm9, %v3851_v15 }
 0x676   : > { %3858 = vrot.lane.b32.xlu0 %v3635_v42, %s6207_s12  ;;  %s8421_s12 = scalar_lea.hbm %s8476_s6, %s5645_s15 }
 0x677   : > { %v4299_v19 = vpop.permute.xlu1 %4298 }
 0x678   : > { %v4327_v30 = vsel %vm4314_vm10, %v4299_v19, %v7943_v18  ;;  %v3855_v54 = vpop.permute.xlu0 %3854  ;;  %v4120_v18 = vcombine.high %v7133_v60, %v7133_v60 }
 0x679   : > { %4359 = vst.msk [vmem:[%s6883_s9 + $0xc7] sm:$0x1] %vm3555_vm9, %v4327_v30  ;;  %4681 = vrot.lane.b32.xlu1 %v4520_v8, %s6213_s20  ;;  %3889 = vst.msk [vmem:[%s6883_s9 + $0xd4] sm:$0x1] %vm3555_vm9, %v3855_v54 }
 0x67a   : > { %3922 = vrot.lane.b32.xlu0 %v3635_v42, %s6208_s16  ;;  %v4217_v27 = vrot.slane %v4120_v18, %v6623_v62  ;;  %v4213_v52 = vrot.slane %v4120_v18, %v6620_v39  ;;  %s8429_s16 = scalar_lea.sflag [#allocation4], %s8489_s25 }
 0x67b   : > { %v4546_v12 = vpop.permute.xlu1 %4545 }
 0x67c   : > { %4583 = vst.msk [vmem:[%s6883_s9 + $0xa8] sm:$0x1] %vm3555_vm9, %v4546_v12  ;;  %v3915_v63 = vpop.permute.xlu0 %3914 }
 0x67d   : > { %4745 = vrot.lane.b32.xlu1 %v4520_v8, %s8486_s13  ;;  %3951 = vst.msk [vmem:[%s6883_s9 + $0xb5] sm:$0x1] %vm3555_vm9, %v3915_v63 }
 0x67e   : > { %3986 = vrot.lane.b32.xlu0 %v3635_v42, %s8487_s10 }
 0x67f   : > { %v4550_v24 = vpop.permute.xlu1 %4549 }
 0x680   : > { %4585 = vst.msk [vmem:[%s6883_s9 + $0xc8] sm:$0x1] %vm3555_vm9, %v4550_v24  ;;  %v3919_v33 = vpop.permute.xlu0 %3918 }
 0x681   : > { %4809 = vrot.lane.b32.xlu1 %v4520_v8, %s6215_s29  ;;  %3953 = vst.msk [vmem:[%s6883_s9 + $0xd5] sm:$0x1] %vm3555_vm9, %v3919_v33 }
 0x682   : > { %4296 = vrot.lane.b32.xlu0 %v4217_v27, %s6211_s18 }
 0x683   : > { %v4610_v60 = vpop.permute.xlu1 %4609 }
 0x684   : > { %4647 = vst.msk [vmem:[%s6883_s9 + $0xa9] sm:$0x1] %vm3555_vm9, %v4610_v60  ;;  %v3979_v17 = vpop.permute.xlu0 %3978 }
 0x685   : > { %4873 = vrot.lane.b32.xlu1 %v4520_v8, %s6216_s28  ;;  %4015 = vst.msk [vmem:[%s6883_s9 + $0xb6] sm:$0x1] %vm3555_vm9, %v3979_v17 }
 0x686   : > { %4312 = vrot.lane.b32.xlu0 %v4249_v31, %s6211_s18 }
 0x687   : > { %v4614_v3 = vpop.permute.xlu1 %4613 }
 0x688   : > { %4649 = vst.msk [vmem:[%s6883_s9 + $0xc9] sm:$0x1] %vm3555_vm9, %v4614_v3  ;;  %v3983_v44 = vpop.permute.xlu0 %3982 }
 0x689   : > { %5175 = vrot.lane.b32.xlu1 %v5086_v22, %s6217_s26  ;;  %4017 = vst.msk [vmem:[%s6883_s9 + $0xd6] sm:$0x1] %vm3555_vm9, %v3983_v44 }
 0x68a   : > { %4555 = vrot.lane.b32.xlu0 %v4524_v23, %s6210_s17  ;;  %s6218_s17 = smov [#allocation3]  }
 0x68b   : > { %v4674_v25 = vpop.permute.xlu1 %4673 }
 0x68c   : > { %4711 = vst.msk [vmem:[%s6883_s9 + $0xaa] sm:$0x1] %vm3555_vm9, %v4674_v25  ;;  %v8229_v55 = vpop.permute.xlu0 %4288 }
 0x68d   : > { %5179 = vrot.lane.b32.xlu1 %v5094_v28, %s6217_s26 }
 0x68e   : > { %4619 = vrot.lane.b32.xlu0 %v4524_v23, %s6212_s19 }
 0x68f   : > { %v4678_v40 = vpop.permute.xlu1 %4677 }
 0x690   : > { %4713 = vst.msk [vmem:[%s6883_s9 + $0xca] sm:$0x1] %vm3555_vm9, %v4678_v40  ;;  %v8237_v51 = vpop.permute.xlu0 %4292 }
 0x691   : > { %5191 = vrot.lane.b32.xlu1 %v5118_v50, %s6217_s26 }
 0x692   : > { %4683 = vrot.lane.b32.xlu0 %v4524_v23, %s6213_s20 }
 0x693   : > { %v4738_v56 = vpop.permute.xlu1 %4737 }
 0x694   : > { %4775 = vst.msk [vmem:[%s6883_s9 + $0xab] sm:$0x1] %vm3555_vm9, %v4738_v56  ;;  %v8245_v10 = vpop.permute.xlu0 %4304 }
 0x695   : > { %5195 = vrot.lane.b32.xlu1 %v5126_v43, %s6217_s26 }
 0x696   : > { %4747 = vrot.lane.b32.xlu0 %v4524_v23, %s8486_s13 }
 0x697   : > { %v4742_v61 = vpop.permute.xlu1 %4741 }
 0x698   : > { %4777 = vst.msk [vmem:[%s6883_s9 + $0xcb] sm:$0x1] %vm3555_vm9, %v4742_v61  ;;  %v8252_v7 = vpop.permute.xlu0 %4308 }
 0x699   : > { %4294 = vrot.lane.b32.xlu1 %v4213_v52, %s6211_s18 }
 0x69a   : > { %4811 = vrot.lane.b32.xlu0 %v4524_v23, %s6215_s29 }
 0x69b   : > { %v4802_v49 = vpop.permute.xlu1 %4801 }
 0x69c   : > { %4839 = vst.msk [vmem:[%s6883_s9 + $0xac] sm:$0x1] %vm3555_vm9, %v4802_v49  ;;  %v4548_v0 = vpop.permute.xlu0 %4547 }
 0x69d   : > { %4310 = vrot.lane.b32.xlu1 %v4245_v5, %s6211_s18  ;;  %4584 = vst.msk [vmem:[%s6883_s9 + $0xb8] sm:$0x1] %vm3555_vm9, %v4548_v0  ;;  %s6135_s18 = sshll.u32 %s6218_s17, 4  ;;  %s6136_s18 = int_to_ptr.vmem [resolvable:$false] %s6135_s18 }
 0x69e   : > { %4875 = vrot.lane.b32.xlu0 %v4524_v23, %s6216_s28  ;;  %s5492_s28 = sshll.u32 %s6883_s9, 4  ;;  %s6137_s19 = scalar_lea.vmem %s6136_s18, 8192  ;;  %s8423_s28 = int_to_ptr.vmem [resolvable:$true] %s5492_s28 }
 0x69f   : > { %v4806_v38 = vpop.permute.xlu1 %4805  ;;  %s6131_s13 = scalar_lea.vmem %s8423_s28, 4096  ;;  %p6138_p0 = scmp.lt.s32.totalorder %s8423_s28, %s6136_s18 }
 0x6a0   : > { %4841 = vst.msk [vmem:[%s6883_s9 + $0xcc] sm:$0x1] %vm3555_vm9, %v4806_v38  ;;  %v4552_v36 = vpop.permute.xlu0 %4551  ;;  %p6132_p11 = scmp.ne.s32.totalorder %s8423_s28, %s6131_s13  ;;  %p6139_p1 = scmp.lt.s32.totalorder %s6137_s19, %s6131_s13 }
 0x6a1   : > { %5183 = vrot.lane.b32.xlu1 %v5102_v29, %s6217_s26  ;;  %4586 = vst.msk [vmem:[%s6883_s9 + $0xd8] sm:$0x1] %vm3555_vm9, %v4552_v36 }
 0x6a2   : > { %5185 = vrot.lane.b32.xlu0 %v5106_v53, %s6217_s26  ;;  %p6133_p12 = pnand %p6132_p11, %p6294_p5  ;;  %p6140_p2 = por %p6139_p1, %p6138_p0 }
 0x6a3   : > { %v4866_v59 = vpop.permute.xlu1 %4865 }
 0x6a4   : > { %4903 = vst.msk [vmem:[%s6883_s9 + $0xad] sm:$0x1] %vm3555_vm9, %v4866_v59  ;;  %v4612_v42 = vpop.permute.xlu0 %4611  ;;  %p6134_p13 = pneg %p6133_p12 }
 0x6a5   : > { %5199 = vrot.lane.b32.xlu1 %v5134_v37, %s6217_s26  ;;  %4648 = vst.msk [vmem:[%s6883_s9 + $0xb9] sm:$0x1] %vm3555_vm9, %v4612_v42 }
 0x6a6   : > { %5201 = vrot.lane.b32.xlu0 %v5138_v48, %s6217_s26  ;;  %p6141_p3 = pnand %p6140_p2, %p6134_p13 }
 0x6a7   : > { %v4870_v13 = vpop.permute.xlu1 %4869 }
 0x6a8   : > { %4905 = vst.msk [vmem:[%s6883_s9 + $0xcd] sm:$0x1] %vm3555_vm9, %v4870_v13  ;;  %v4616_v16 = vpop.permute.xlu0 %4615 }
 0x6a9   : > { %5442 = vrot.lane.b32.xlu1 %v5409_v6, %s8488_s14  ;;  %4650 = vst.msk [vmem:[%s6883_s9 + $0xd9] sm:$0x1] %vm3555_vm9, %v4616_v16 }
 0x6aa   : > { %5444 = vrot.lane.b32.xlu0 %v5413_v57, %s8488_s14 }
 0x6ab   : > { %v5152_v62 = vpop.permute.xlu1 %5151 }
 0x6ac   : > { %v5207_v21 = vsel %vm5203_vm11, %v5152_v62, %v8080_v26  ;;  %v4676_v45 = vpop.permute.xlu0 %4675 }
 0x6ad   : > { %5239 = vst.msk [vmem:[%s6883_s9 + $0x3e] sm:$0x1] %vm3555_vm9, %v5207_v21  ;;  %4712 = vst.msk [vmem:[%s6883_s9 + $0xba] sm:$0x1] %vm3555_vm9, %v4676_v45 }
 0x6af   : > { %v5168_v9 = vpop.permute.xlu1 %5167 }
 0x6b0   : > { %v5211_v39 = vsel %vm5203_vm11, %v5168_v9, %v8087_v20  ;;  %v4680_v8 = vpop.permute.xlu0 %4679 }
 0x6b1   : > { %5243 = vst.msk [vmem:[%s6883_s9 + $0x7e] sm:$0x1] %vm3555_vm9, %v5211_v39  ;;  %4714 = vst.msk [vmem:[%s6883_s9 + $0xda] sm:$0x1] %vm3555_vm9, %v4680_v8 }
 0x6b3   : > { %v5172_v26 = vpop.permute.xlu1 %5171 }
 0x6b4   : > { %v5212_v2 = vsel %vm5203_vm11, %v5172_v26, %v8094_v34  ;;  %v4740_v14 = vpop.permute.xlu0 %4739 }
 0x6b5   : > { %5244 = vst.msk [vmem:[%s6883_s9 + $0x8e] sm:$0x1] %vm3555_vm9, %v5212_v2  ;;  %4776 = vst.msk [vmem:[%s6883_s9 + $0xbb] sm:$0x1] %vm3555_vm9, %v4740_v14 }
 0x6b7   : > { %v5188_v35 = vpop.permute.xlu1 %5187 }
 0x6b8   : > { %v5216_v20 = vsel %vm5203_vm11, %v5188_v35, %v8101_v4  ;;  %v4744_v58 = vpop.permute.xlu0 %4743 }
 0x6b9   : > { %5248 = vst.msk [vmem:[%s6883_s9 + $0xce] sm:$0x1] %vm3555_vm9, %v5216_v20  ;;  %4778 = vst.msk [vmem:[%s6883_s9 + $0xdb] sm:$0x1] %vm3555_vm9, %v4744_v58 }
 0x6bb   : > { %v3665_v34 = vpop.permute.xlu1 %3664 }
 0x6bc   : > { %3698 = vst.msk [vmem:[%s6883_s9 + $0xe1] sm:$0x1] %vm3555_vm9, %v3665_v34  ;;  %v4804_v15 = vpop.permute.xlu0 %4803 }
 0x6bd   : > { %4840 = vst.msk [vmem:[%s6883_s9 + $0xbc] sm:$0x1] %vm3555_vm9, %v4804_v15 }
 0x6bf   : > { %v3729_v19 = vpop.permute.xlu1 %3728 }
 0x6c0   : > { %3762 = vst.msk [vmem:[%s6883_s9 + $0xe2] sm:$0x1] %vm3555_vm9, %v3729_v19  ;;  %v4808_v30 = vpop.permute.xlu0 %4807 }
 0x6c1   : > { %4842 = vst.msk [vmem:[%s6883_s9 + $0xdc] sm:$0x1] %vm3555_vm9, %v4808_v30 }
 0x6c3   : > { %v3793_v4 = vpop.permute.xlu1 %3792 }
 0x6c4   : > { %3826 = vst.msk [vmem:[%s6883_s9 + $0xe3] sm:$0x1] %vm3555_vm9, %v3793_v4  ;;  %v4868_v54 = vpop.permute.xlu0 %4867 }
 0x6c5   : > { %4904 = vst.msk [vmem:[%s6883_s9 + $0xbd] sm:$0x1] %vm3555_vm9, %v4868_v54 }
 0x6c7   : > { %v3857_v12 = vpop.permute.xlu1 %3856 }
 0x6c8   : > { %3890 = vst.msk [vmem:[%s6883_s9 + $0xe4] sm:$0x1] %vm3555_vm9, %v3857_v12  ;;  %v4872_v63 = vpop.permute.xlu0 %4871 }
 0x6c9   : > { %4906 = vst.msk [vmem:[%s6883_s9 + $0xdd] sm:$0x1] %vm3555_vm9, %v4872_v63 }
 0x6cb   : > { %v3921_v18 = vpop.permute.xlu1 %3920 }
 0x6cc   : > { %3954 = vst.msk [vmem:[%s6883_s9 + $0xe5] sm:$0x1] %vm3555_vm9, %v3921_v18  ;;  %v5178_v24 = vpop.permute.xlu0 %5177 }
 0x6cf   : > { %v3985_v33 = vpop.permute.xlu1 %3984 }
 0x6d0   : > { %4018 = vst.msk [vmem:[%s6883_s9 + $0xe6] sm:$0x1] %vm3555_vm9, %v3985_v33  ;;  %v5182_v27 = vpop.permute.xlu0 %5181 }
 0x6d3   : > { %v4287_v1 = vpop.permute.xlu1 %4286 }
 0x6d4   : > { %v4324_v60 = vsel %vm4314_vm10, %v4287_v1, %v8229_v55  ;;  %v5194_v17 = vpop.permute.xlu0 %5193 }
 0x6d5   : > { %4356 = vst.msk [vmem:[%s6883_s9 + $0x97] sm:$0x1] %vm3555_vm9, %v4324_v60 }
 0x6d7   : > { %v4291_v31 = vpop.permute.xlu1 %4290 }
 0x6d8   : > { %v4325_v11 = vsel %vm4314_vm10, %v4291_v31, %v8237_v51  ;;  %v5198_v3 = vpop.permute.xlu0 %5197 }
 0x6d9   : > { %4357 = vst.msk [vmem:[%s6883_s9 + $0xa7] sm:$0x1] %vm3555_vm9, %v4325_v11 }
 0x6db   : > { %v4303_v22 = vpop.permute.xlu1 %4302 }
 0x6dc   : > { %v4328_v44 = vsel %vm4314_vm10, %v4303_v22, %v8245_v10  ;;  %v3667_v23 = vpop.permute.xlu0 %3666 }
 0x6dd   : > { %4360 = vst.msk [vmem:[%s6883_s9 + $0xd7] sm:$0x1] %vm3555_vm9, %v4328_v44  ;;  %3699 = vst.msk [vmem:[%s6883_s9 + $0xf1] sm:$0x1] %vm3555_vm9, %v3667_v23 }
 0x6df   : > { %v4307_v25 = vpop.permute.xlu1 %4306 }
 0x6e0   : > { %v4329_v28 = vsel %vm4314_vm10, %v4307_v25, %v8252_v7  ;;  %v3731_v55 = vpop.permute.xlu0 %3730 }
 0x6e1   : > { %4361 = vst.msk [vmem:[%s6883_s9 + $0xe7] sm:$0x1] %vm3555_vm9, %v4329_v28  ;;  %3763 = vst.msk [vmem:[%s6883_s9 + $0xf2] sm:$0x1] %vm3555_vm9, %v3731_v55 }
 0x6e3   : > { %v4554_v40 = vpop.permute.xlu1 %4553 }
 0x6e4   : > { %4587 = vst.msk [vmem:[%s6883_s9 + $0xe8] sm:$0x1] %vm3555_vm9, %v4554_v40  ;;  %v3795_v50 = vpop.permute.xlu0 %3794 }
 0x6e5   : > { %3827 = vst.msk [vmem:[%s6883_s9 + $0xf3] sm:$0x1] %vm3555_vm9, %v3795_v50 }
 0x6e7   : > { %v4618_v51 = vpop.permute.xlu1 %4617 }
 0x6e8   : > { %4651 = vst.msk [vmem:[%s6883_s9 + $0xe9] sm:$0x1] %vm3555_vm9, %v4618_v51  ;;  %v3859_v56 = vpop.permute.xlu0 %3858 }
 0x6e9   : > { %3891 = vst.msk [vmem:[%s6883_s9 + $0xf4] sm:$0x1] %vm3555_vm9, %v3859_v56 }
 0x6eb   : > { %v4682_v43 = vpop.permute.xlu1 %4681 }
 0x6ec   : > { %4715 = vst.msk [vmem:[%s6883_s9 + $0xea] sm:$0x1] %vm3555_vm9, %v4682_v43  ;;  %v3923_v10 = vpop.permute.xlu0 %3922 }
 0x6ed   : > { %3955 = vst.msk [vmem:[%s6883_s9 + $0xf5] sm:$0x1] %vm3555_vm9, %v3923_v10 }
 0x6ef   : > { %v4746_v61 = vpop.permute.xlu1 %4745 }
 0x6f0   : > { %4779 = vst.msk [vmem:[%s6883_s9 + $0xeb] sm:$0x1] %vm3555_vm9, %v4746_v61  ;;  %v3987_v52 = vpop.permute.xlu0 %3986 }
 0x6f1   : > { %4019 = vst.msk [vmem:[%s6883_s9 + $0xf6] sm:$0x1] %vm3555_vm9, %v3987_v52 }
 0x6f3   : > { %v4810_v7 = vpop.permute.xlu1 %4809 }
 0x6f4   : > { %4843 = vst.msk [vmem:[%s6883_s9 + $0xec] sm:$0x1] %vm3555_vm9, %v4810_v7  ;;  %v4297_v49 = vpop.permute.xlu0 %4296 }
 0x6f7   : > { %v4874_v5 = vpop.permute.xlu1 %4873 }
 0x6f8   : > { %4907 = vst.msk [vmem:[%s6883_s9 + $0xed] sm:$0x1] %vm3555_vm9, %v4874_v5  ;;  %v4313_v46 = vpop.permute.xlu0 %4312 }
 0x6fb   : > { %v5176_v0 = vpop.permute.xlu1 %5175 }
 0x6fc   : > { %v5213_v38 = vsel %vm5203_vm11, %v5176_v0, %v5178_v24  ;;  %v4556_v29 = vpop.permute.xlu0 %4555 }
 0x6fd   : > { %5245 = vst.msk [vmem:[%s6883_s9 + $0x9e] sm:$0x1] %vm3555_vm9, %v5213_v38  ;;  %4588 = vst.msk [vmem:[%s6883_s9 + $0xf8] sm:$0x1] %vm3555_vm9, %v4556_v29 }
 0x6ff   : > { %v5180_v41 = vpop.permute.xlu1 %5179 }
 0x700   : > { %v5214_v36 = vsel %vm5203_vm11, %v5180_v41, %v5182_v27  ;;  %v4620_v53 = vpop.permute.xlu0 %4619 }
 0x701   : > { %5246 = vst.msk [vmem:[%s6883_s9 + $0xae] sm:$0x1] %vm3555_vm9, %v5214_v36  ;;  %4652 = vst.msk [vmem:[%s6883_s9 + $0xf9] sm:$0x1] %vm3555_vm9, %v4620_v53 }
 0x703   : > { %v5192_v32 = vpop.permute.xlu1 %5191 }
 0x704   : > { %v5217_v59 = vsel %vm5203_vm11, %v5192_v32, %v5194_v17  ;;  %v4684_v37 = vpop.permute.xlu0 %4683 }
 0x705   : > { %5249 = vst.msk [vmem:[%s6883_s9 + $0xde] sm:$0x1] %vm3555_vm9, %v5217_v59  ;;  %4716 = vst.msk [vmem:[%s6883_s9 + $0xfa] sm:$0x1] %vm3555_vm9, %v4684_v37 }
 0x707   : > { %v5196_v47 = vpop.permute.xlu1 %5195 }
 0x708   : > { %v5218_v42 = vsel %vm5203_vm11, %v5196_v47, %v5198_v3  ;;  %v4748_v48 = vpop.permute.xlu0 %4747 }
 0x709   : > { %5250 = vst.msk [vmem:[%s6883_s9 + $0xee] sm:$0x1] %vm3555_vm9, %v5218_v42  ;;  %4780 = vst.msk [vmem:[%s6883_s9 + $0xfb] sm:$0x1] %vm3555_vm9, %v4748_v48 }
 0x70b   : > { %v4295_v13 = vpop.permute.xlu1 %4294 }
 0x70c   : > { %v4326_v6 = vsel %vm4314_vm10, %v4295_v13, %v4297_v49  ;;  %v4812_v16 = vpop.permute.xlu0 %4811 }
 0x70d   : > { %4358 = vst.msk [vmem:[%s6883_s9 + $0xb7] sm:$0x1] %vm3555_vm9, %v4326_v6  ;;  %4844 = vst.msk [vmem:[%s6883_s9 + $0xfc] sm:$0x1] %vm3555_vm9, %v4812_v16 }
 0x70f   : > { %v4311_v57 = vpop.permute.xlu1 %4310 }
 0x710   : > { %v4330_v62 = vsel %vm4314_vm10, %v4311_v57, %v4313_v46  ;;  %v4876_v21 = vpop.permute.xlu0 %4875 }
 0x711   : > { %4362 = vst.msk [vmem:[%s6883_s9 + $0xf7] sm:$0x1] %vm3555_vm9, %v4330_v62  ;;  %4908 = vst.msk [vmem:[%s6883_s9 + $0xfd] sm:$0x1] %vm3555_vm9, %v4876_v21 }
 0x713   : > { %v5184_v45 = vpop.permute.xlu1 %5183 }
 0x714   : > { %v5186_v9 = vpop.permute.xlu0 %5185 }
 0x715   : > { %v5215_v39 = vsel %vm5203_vm11, %v5184_v45, %v5186_v9 }
 0x716   : > { %5247 = vst.msk [vmem:[%s6883_s9 + $0xbe] sm:$0x1] %vm3555_vm9, %v5215_v39 }
 0x717   : > { %v5200_v8 = vpop.permute.xlu1 %5199 }
 0x718   : > { %v5202_v26 = vpop.permute.xlu0 %5201 }
 0x719   : > { %v5219_v2 = vsel %vm5203_vm11, %v5200_v8, %v5202_v26 }
 0x71a   : > { %5251 = vst.msk [vmem:[%s6883_s9 + $0xfe] sm:$0x1] %vm3555_vm9, %v5219_v2 }
 0x71b   : > { %v5443_v14 = vpop.permute.xlu1 %5442 }
 0x71c   : > { %5476 = vst.msk [vmem:[%s6883_s9 + $0xef] sm:$0x1] %vm3555_vm9, %v5443_v14  ;;  %v5445_v35 = vpop.permute.xlu0 %5444 }
 0x71d   : > { %5477 = vst.msk [vmem:[%s6883_s9 + $0xff] sm:$0x1] %vm3555_vm9, %v5445_v35 }
 0x71e   : > { %6144 = shalt.err (!%p6141_p3)
}
 0x71f   : > { %s6145_s9 = scalar_lea.hbm %s8421_s12, 4096  ;;  %s6149_s29 = scalar_lea.hbm %s8476_s6, 8192 }
 0x720   : > { %p6146_p4 = scmp.ne.s32.totalorder %s8421_s12, %s6145_s9  ;;  %p6150_p9 = scmp.lt.u32.totalorder %s8421_s12, %s8476_s6 }
 0x721   : > { %p6151_p10 = scmp.lt.u32.totalorder %s6149_s29, %s6145_s9  ;;  %p6153_p12 = scmp.lt.u32.totalorder %s6145_s9, %s8421_s12 }
 0x722   : > { %p6147_p7 = pnand %p6146_p4, %p6294_p5 }
 0x723   : > { %p6152_p11 = por %p6151_p10, %p6150_p9 }
 0x724   : > { %p6148_p8 = pneg %p6147_p7 }
 0x725   : > { %p6154_p13 = por %p6153_p12, %p6152_p11 }
 0x727   : > { %p6155_p0 = pnand %p6154_p13, %p6148_p8 }
 0x729   : > { %6158 = shalt.err (!%p6155_p0)
}
 0x72a   : > { %s6219_s10 = smov 128   ;;  %s6220_s11 = smov 8  }
 0x72b   : > { %5935 = dma.vmem_to_hbm [thread:$0]  (%p6294_p5), %s8423_s28, 4096, %s8421_s12, %s8429_s16, %s6219_s10, %s6219_s10, %s6220_s11  }
 0x72c PF: > { %p5941_p1 = scmp.ge.s32.totalorder %s6193_s24, 2  ;;  %s5507_s25 = sand.u32 1, %s6181_s21  }
 0x72d   : > { %s5508_s13 = scalar_lea.sflag [#allocation4], %s5507_s25 }
 0x72e   : > { %p5938_p2 = pnand %p5941_p1, %p6298_p6 }
 0x730   : > { %6176 = dma.done.wait (!%p5938_p2), %s5508_s13, 4096  }
 0x731   : > { %6178 = vsyncadd (!%p5938_p2), %s5508_s13, 4294963200  ;;  %p16_p3 = scmp.ge.s32.totalorder %s6281_s27, 4   ;;  %s8490_s21 = smov %s6185_s22 }
 0x732   : > { %s8491_s22 = smov %s6189_s23  ;;  %s8492_s23 = smov %s6292_s30 }
 0x733   : > { %s8493_s24 = smov %s6281_s27  ;;  %18 = sbr.rel (!%p16_p3) target bundleno = 3 (0x3), region = 95 }
 0x73a   :  { %5513 = vsyncpa [#allocation4], 1 }
 0x73b   :  { %5515 = vsyncpa [#allocation4 + $0x1], 1 }

</bundles_post_ra>
